<compile_context>
chip_gen: v6e
topology: v6e:2x2x1
jax: 0.10.0
libtpu: 0.0.40
codegen_flags: <defaults>
</compile_context>

<pallas_src>
import functools

import jax
import jax.numpy as jnp
from jax.experimental import pallas as pl
from jax.experimental.pallas import tpu as pltpu

IMAGE_SIZE = 784
H_DIM = 400
Z_DIM = 20
STATS_PAD = 128          # lane-dense width for the packed (mu || log_var) output


def _vae_kernel(x_ref, eps_ref,
                w1_ref, b1_ref, w23_ref, b23_ref,
                w4_ref, b4_ref, w5_ref, b5_ref,
                xrec_ref, stats_ref):
    x = x_ref[...]                                   # [TB, 784] f32
    eps = eps_ref[...]                               # [TB, 20]  f32

    # ---- encode: fc1 + relu ----
    h = jnp.dot(x.astype(jnp.bfloat16), w1_ref[...],
                preferred_element_type=jnp.float32) + b1_ref[...]
    h = jnp.maximum(h, 0.0)                          # [TB, 400] f32

    # ---- fused fc2/fc3 (mu || log_var, zero-padded to 128 lanes) ----
    stats = jnp.dot(h.astype(jnp.bfloat16), w23_ref[...],
                    preferred_element_type=jnp.float32) + b23_ref[...]
    stats_ref[...] = stats                           # lane-dense [TB, 128] store

    mu = stats[:, :Z_DIM]                            # [TB, 20]
    log_var = stats[:, Z_DIM:2 * Z_DIM]              # [TB, 20]

    # ---- reparameterize ----
    std = jnp.exp(log_var * 0.5)
    z = mu + eps * std                               # [TB, 20]

    # ---- decode: fc4 + relu, fc5 + sigmoid ----
    h2 = jnp.dot(z.astype(jnp.bfloat16), w4_ref[...],
                 preferred_element_type=jnp.float32) + b4_ref[...]
    h2 = jnp.maximum(h2, 0.0)                        # [TB, 400]

    logits = jnp.dot(h2.astype(jnp.bfloat16), w5_ref[...],
                     preferred_element_type=jnp.float32) + b5_ref[...]
    xrec_ref[...] = jax.nn.sigmoid(logits)           # [TB, 784]


@functools.partial(jax.jit, static_argnames=("batch_tile",))
def vae_forward(x, eps, params, batch_tile=256):
    """x: [B, 784] f32, eps: [B, 20] f32. Returns (x_reconst, mu, log_var)."""
    B = x.shape[0]
    w1, b1, w2, b2, w3, b3, w4, b4, w5, b5 = params

    # Pack fc2/fc3 into one lane-dense [400, 128] matrix (+ matching bias).
    w23 = jnp.pad(jnp.concatenate([w2, w3], axis=1),
                  ((0, 0), (0, STATS_PAD - 2 * Z_DIM)))
    b23 = jnp.pad(jnp.concatenate([b2, b3], axis=1),
                  ((0, 0), (0, STATS_PAD - 2 * Z_DIM)))

    # bf16 weights, f32 biases; accumulation inside the kernel is f32.
    w1b, w23b, w4b, w5b = (w.astype(jnp.bfloat16) for w in (w1, w23, w4, w5))

    # Pad batch up to a multiple of the tile.
    n_tiles = -(-B // batch_tile)
    B_pad = n_tiles * batch_tile
    if B_pad != B:
        x = jnp.pad(x, ((0, B_pad - B), (0, 0)))
        eps = jnp.pad(eps, ((0, B_pad - B), (0, 0)))

    def act_spec(feat):
        return pl.BlockSpec((batch_tile, feat), lambda i: (i, 0))

    def full_spec(arr):
        return pl.BlockSpec(arr.shape, lambda i: (0, 0))

    out_shapes = (
        jax.ShapeDtypeStruct((B_pad, IMAGE_SIZE), jnp.float32),
        jax.ShapeDtypeStruct((B_pad, STATS_PAD), jnp.float32),
    )

    xrec, stats = pl.pallas_call(
        _vae_kernel,
        out_shape=out_shapes,
        grid_spec=pltpu.PrefetchScalarGridSpec(
            num_scalar_prefetch=0,
            grid=(n_tiles,),
            in_specs=[
                act_spec(IMAGE_SIZE),      # x
                act_spec(Z_DIM),           # eps
                full_spec(w1b), full_spec(b1),
                full_spec(w23b), full_spec(b23),
                full_spec(w4b), full_spec(b4),
                full_spec(w5b), full_spec(b5),
            ],
            out_specs=[
                act_spec(IMAGE_SIZE),      # x_reconst (784 lanes)
                act_spec(STATS_PAD),       # packed mu||log_var (128 lanes, unmasked stores)
            ],
        ),
        compiler_params=pltpu.CompilerParams(
            dimension_semantics=("parallel",),
            vmem_limit_bytes=32 * 1024 * 1024,
        ),
    )(x, eps, w1b, b1, w23b, b23, w4b, b4, w5b, b5)

    x_reconst = xrec[:B]
    mu = stats[:B, :Z_DIM]
    log_var = stats[:B, Z_DIM:2 * Z_DIM]
    return x_reconst, mu, log_var


def init_linear(key, fan_in, fan_out):
    """PyTorch nn.Linear-style init; weight stored as [in, out]."""
    kw, kb = jax.random.split(key)
    bound = 1.0 / jnp.sqrt(jnp.float32(fan_in))
    w = jax.random.uniform(kw, (fan_in, fan_out), jnp.float32, -bound, bound)
    b = jax.random.uniform(kb, (1, fan_out), jnp.float32, -bound, bound)
    return w, b


def init_params(key):
    k1, k2, k3, k4, k5 = jax.random.split(key, 5)
    w1, b1 = init_linear(k1, IMAGE_SIZE, H_DIM)   # fc1
    w2, b2 = init_linear(k2, H_DIM, Z_DIM)        # fc2 (mu)
    w3, b3 = init_linear(k3, H_DIM, Z_DIM)        # fc3 (log_var)
    w4, b4 = init_linear(k4, Z_DIM, H_DIM)        # fc4
    w5, b5 = init_linear(k5, H_DIM, IMAGE_SIZE)   # fc5
    return (w1, b1, w2, b2, w3, b3, w4, b4, w5, b5)


def vae_reference(x, eps, params):
    """Pure-JAX f32 reference for correctness checking."""
    w1, b1, w2, b2, w3, b3, w4, b4, w5, b5 = params
    h = jax.nn.relu(x @ w1 + b1)
    mu = h @ w2 + b2
    log_var = h @ w3 + b3
    z = mu + eps * jnp.exp(log_var * 0.5)
    h2 = jax.nn.relu(z @ w4 + b4)
    xrec = jax.nn.sigmoid(h2 @ w5 + b5)
    return xrec, mu, log_var


if __name__ == "__main__":
    key = jax.random.PRNGKey(0)
    k_params, k_x, k_eps = jax.random.split(key, 3)

    B = 256            # 2 grid steps at batch_tile=128 -> both v7x TCs get work
    params = init_params(k_params)
    x = jax.random.uniform(k_x, (B, IMAGE_SIZE), jnp.float32)   # MNIST-like pixels in [0,1)
    eps = jax.random.normal(k_eps, (B, Z_DIM), jnp.float32)     # reparameterization noise

    x_reconst, mu, log_var = vae_forward(x, eps, params, batch_tile=128)
    jax.block_until_ready((x_reconst, mu, log_var))

    # sanity check against pure-JAX f32 reference (bf16 weights -> loose tolerance)
    xr_ref, mu_ref, lv_ref = vae_reference(x, eps, params)
    assert x_reconst.shape == (B, IMAGE_SIZE)
    assert mu.shape == (B, Z_DIM) and log_var.shape == (B, Z_DIM)
    assert jnp.allclose(x_reconst, xr_ref, atol=3e-2, rtol=3e-2)
    assert jnp.allclose(mu, mu_ref, atol=3e-2, rtol=3e-2)
    assert jnp.allclose(log_var, lv_ref, atol=3e-2, rtol=3e-2)

    print("KERNEL_OK")
</pallas_src>

<mosaic_0001>
module attributes {stable_mosaic.version = 11 : i64} {
  func.func @_vae_kernel(%arg0: i32, %arg1: memref<128x784xf32, #tpu.memory_space<vmem>>, %arg2: memref<128x20xf32, #tpu.memory_space<vmem>>, %arg3: memref<784x400xbf16, #tpu.memory_space<vmem>>, %arg4: memref<1x400xf32, #tpu.memory_space<vmem>>, %arg5: memref<400x128xbf16, #tpu.memory_space<vmem>>, %arg6: memref<1x128xf32, #tpu.memory_space<vmem>>, %arg7: memref<20x400xbf16, #tpu.memory_space<vmem>>, %arg8: memref<1x400xf32, #tpu.memory_space<vmem>>, %arg9: memref<400x784xbf16, #tpu.memory_space<vmem>>, %arg10: memref<1x784xf32, #tpu.memory_space<vmem>>, %arg11: memref<128x784xf32, #tpu.memory_space<vmem>>, %arg12: memref<128x128xf32, #tpu.memory_space<vmem>>) attributes {dimension_semantics = [#tpu.dimension_semantics<parallel>], iteration_bounds = array<i64: 2>, scalar_prefetch = 0 : i64, scratch_operands = 0 : i64, tpu.core_type = #tpu.core_type<tc>, window_params = [{transform_indices = @transform_0, window_bounds = array<i64: 128, 784>}, {transform_indices = @transform_1, window_bounds = array<i64: 128, 20>}, {pipeline_mode = #tpu.pipeline_mode<synchronous>, transform_indices = @transform_2, window_bounds = array<i64: 784, 400>}, {pipeline_mode = #tpu.pipeline_mode<synchronous>, transform_indices = @transform_3, window_bounds = array<i64: 1, 400>}, {pipeline_mode = #tpu.pipeline_mode<synchronous>, transform_indices = @transform_4, window_bounds = array<i64: 400, 128>}, {pipeline_mode = #tpu.pipeline_mode<synchronous>, transform_indices = @transform_5, window_bounds = array<i64: 1, 128>}, {pipeline_mode = #tpu.pipeline_mode<synchronous>, transform_indices = @transform_6, window_bounds = array<i64: 20, 400>}, {pipeline_mode = #tpu.pipeline_mode<synchronous>, transform_indices = @transform_7, window_bounds = array<i64: 1, 400>}, {pipeline_mode = #tpu.pipeline_mode<synchronous>, transform_indices = @transform_8, window_bounds = array<i64: 400, 784>}, {pipeline_mode = #tpu.pipeline_mode<synchronous>, transform_indices = @transform_9, window_bounds = array<i64: 1, 784>}, {transform_indices = @transform_10, window_bounds = array<i64: 128, 784>}, {transform_indices = @transform_11, window_bounds = array<i64: 128, 128>}]} {
    %c0 = arith.constant 0 : index
    %c0_0 = arith.constant 0 : index
    %0 = vector.load %arg1[%c0, %c0_0] : memref<128x784xf32, #tpu.memory_space<vmem>>, vector<128x784xf32>
    %c0_1 = arith.constant 0 : index
    %c0_2 = arith.constant 0 : index
    %1 = vector.load %arg2[%c0_1, %c0_2] : memref<128x20xf32, #tpu.memory_space<vmem>>, vector<128x20xf32>
    %2 = arith.truncf %0 : vector<128x784xf32> to vector<128x784xbf16>
    %c0_3 = arith.constant 0 : index
    %c0_4 = arith.constant 0 : index
    %3 = vector.load %arg3[%c0_3, %c0_4] : memref<784x400xbf16, #tpu.memory_space<vmem>>, vector<784x400xbf16>
    %cst = arith.constant dense<0.000000e+00> : vector<128x400xf32>
    %4 = tpu.matmul %2, %3, %cst {dimension_numbers = #tpu.dot_dimension_numbers<[1], [0], [0], [1], [0, 0, 1, 1], [], []>} : vector<128x784xbf16>, vector<784x400xbf16>, vector<128x400xf32> -> vector<128x400xf32>
    %c0_5 = arith.constant 0 : index
    %c0_6 = arith.constant 0 : index
    %5 = vector.load %arg4[%c0_5, %c0_6] : memref<1x400xf32, #tpu.memory_space<vmem>>, vector<1x400xf32>
    %6 = vector.broadcast %5 : vector<1x400xf32> to vector<128x400xf32>
    %7 = arith.addf %4, %6 : vector<128x400xf32>
    %cst_7 = arith.constant 0.000000e+00 : f32
    %8 = vector.broadcast %cst_7 : f32 to vector<128x400xf32>
    %9 = arith.maximumf %7, %8 : vector<128x400xf32>
    %10 = arith.truncf %9 : vector<128x400xf32> to vector<128x400xbf16>
    %c0_8 = arith.constant 0 : index
    %c0_9 = arith.constant 0 : index
    %11 = vector.load %arg5[%c0_8, %c0_9] : memref<400x128xbf16, #tpu.memory_space<vmem>>, vector<400x128xbf16>
    %cst_10 = arith.constant dense<0.000000e+00> : vector<128x128xf32>
    %12 = tpu.matmul %10, %11, %cst_10 {dimension_numbers = #tpu.dot_dimension_numbers<[1], [0], [0], [1], [0, 0, 1, 1], [], []>} : vector<128x400xbf16>, vector<400x128xbf16>, vector<128x128xf32> -> vector<128x128xf32>
    %c0_11 = arith.constant 0 : index
    %c0_12 = arith.constant 0 : index
    %13 = vector.load %arg6[%c0_11, %c0_12] : memref<1x128xf32, #tpu.memory_space<vmem>>, vector<1x128xf32>
    %14 = vector.broadcast %13 : vector<1x128xf32> to vector<128x128xf32>
    %15 = arith.addf %12, %14 : vector<128x128xf32>
    %c0_13 = arith.constant 0 : index
    %c0_14 = arith.constant 0 : index
    %16 = vector.load %arg12[%c0_13, %c0_14] : memref<128x128xf32, #tpu.memory_space<vmem>>, vector<128x128xf32>
    tpu.vector_store %arg12[%c0_13, %c0_14], %15 {strides = array<i32>} : memref<128x128xf32, #tpu.memory_space<vmem>>, vector<128x128xf32>,
    %17 = vector.extract_strided_slice %15 {offsets = [0, 0], sizes = [128, 20], strides = [1, 1]} : vector<128x128xf32> to vector<128x20xf32>
    %18 = vector.extract_strided_slice %15 {offsets = [0, 20], sizes = [128, 20], strides = [1, 1]} : vector<128x128xf32> to vector<128x20xf32>
    %cst_15 = arith.constant 5.000000e-01 : f32
    %19 = vector.broadcast %cst_15 : f32 to vector<128x20xf32>
    %20 = arith.mulf %18, %19 : vector<128x20xf32>
    %21 = math.exp %20 : vector<128x20xf32>
    %22 = arith.mulf %1, %21 : vector<128x20xf32>
    %23 = arith.addf %17, %22 : vector<128x20xf32>
    %24 = arith.truncf %23 : vector<128x20xf32> to vector<128x20xbf16>
    %c0_16 = arith.constant 0 : index
    %c0_17 = arith.constant 0 : index
    %25 = vector.load %arg7[%c0_16, %c0_17] : memref<20x400xbf16, #tpu.memory_space<vmem>>, vector<20x400xbf16>
    %cst_18 = arith.constant dense<0.000000e+00> : vector<128x400xf32>
    %26 = tpu.matmul %24, %25, %cst_18 {dimension_numbers = #tpu.dot_dimension_numbers<[1], [0], [0], [1], [0, 0, 1, 1], [], []>} : vector<128x20xbf16>, vector<20x400xbf16>, vector<128x400xf32> -> vector<128x400xf32>
    %c0_19 = arith.constant 0 : index
    %c0_20 = arith.constant 0 : index
    %27 = vector.load %arg8[%c0_19, %c0_20] : memref<1x400xf32, #tpu.memory_space<vmem>>, vector<1x400xf32>
    %28 = vector.broadcast %27 : vector<1x400xf32> to vector<128x400xf32>
    %29 = arith.addf %26, %28 : vector<128x400xf32>
    %cst_21 = arith.constant 0.000000e+00 : f32
    %30 = vector.broadcast %cst_21 : f32 to vector<128x400xf32>
    %31 = arith.maximumf %29, %30 : vector<128x400xf32>
    %32 = arith.truncf %31 : vector<128x400xf32> to vector<128x400xbf16>
    %c0_22 = arith.constant 0 : index
    %c0_23 = arith.constant 0 : index
    %33 = vector.load %arg9[%c0_22, %c0_23] : memref<400x784xbf16, #tpu.memory_space<vmem>>, vector<400x784xbf16>
    %cst_24 = arith.constant dense<0.000000e+00> : vector<128x784xf32>
    %34 = tpu.matmul %32, %33, %cst_24 {dimension_numbers = #tpu.dot_dimension_numbers<[1], [0], [0], [1], [0, 0, 1, 1], [], []>} : vector<128x400xbf16>, vector<400x784xbf16>, vector<128x784xf32> -> vector<128x784xf32>
    %c0_25 = arith.constant 0 : index
    %c0_26 = arith.constant 0 : index
    %35 = vector.load %arg10[%c0_25, %c0_26] : memref<1x784xf32, #tpu.memory_space<vmem>>, vector<1x784xf32>
    %36 = vector.broadcast %35 : vector<1x784xf32> to vector<128x784xf32>
    %37 = arith.addf %34, %36 : vector<128x784xf32>
    %38 = arith.negf %37 : vector<128x784xf32>
    %39 = math.exp %38 : vector<128x784xf32>
    %cst_27 = arith.constant 1.000000e+00 : f32
    %40 = vector.broadcast %cst_27 : f32 to vector<128x784xf32>
    %41 = arith.addf %40, %39 : vector<128x784xf32>
    %42 = arith.divf %40, %41 : vector<128x784xf32>
    %c0_28 = arith.constant 0 : index
    %c0_29 = arith.constant 0 : index
    %43 = vector.load %arg11[%c0_28, %c0_29] : memref<128x784xf32, #tpu.memory_space<vmem>>, vector<128x784xf32>
    tpu.vector_store %arg11[%c0_28, %c0_29], %42 {strides = array<i32>} : memref<128x784xf32, #tpu.memory_space<vmem>>, vector<128x784xf32>,
    return
  }
  func.func @transform_0(%arg0: i32) -> (i32, i32) {
    %c0_i32 = arith.constant 0 : i32
    %c0_i32_0 = arith.constant 0 : i32
    return %arg0, %c0_i32 : i32, i32
  }
  func.func @transform_1(%arg0: i32) -> (i32, i32) {
    %c0_i32 = arith.constant 0 : i32
    %c0_i32_0 = arith.constant 0 : i32
    return %arg0, %c0_i32 : i32, i32
  }
  func.func @transform_2(%arg0: i32) -> (i32, i32) {
    %c0_i32 = arith.constant 0 : i32
    %c0_i32_0 = arith.constant 0 : i32
    %c0_i32_1 = arith.constant 0 : i32
    return %c0_i32, %c0_i32_0 : i32, i32
  }
  func.func @transform_3(%arg0: i32) -> (i32, i32) {
    %c0_i32 = arith.constant 0 : i32
    %c0_i32_0 = arith.constant 0 : i32
    %c0_i32_1 = arith.constant 0 : i32
    return %c0_i32, %c0_i32_0 : i32, i32
  }
  func.func @transform_4(%arg0: i32) -> (i32, i32) {
    %c0_i32 = arith.constant 0 : i32
    %c0_i32_0 = arith.constant 0 : i32
    %c0_i32_1 = arith.constant 0 : i32
    return %c0_i32, %c0_i32_0 : i32, i32
  }
  func.func @transform_5(%arg0: i32) -> (i32, i32) {
    %c0_i32 = arith.constant 0 : i32
    %c0_i32_0 = arith.constant 0 : i32
    %c0_i32_1 = arith.constant 0 : i32
    return %c0_i32, %c0_i32_0 : i32, i32
  }
  func.func @transform_6(%arg0: i32) -> (i32, i32) {
    %c0_i32 = arith.constant 0 : i32
    %c0_i32_0 = arith.constant 0 : i32
    %c0_i32_1 = arith.constant 0 : i32
    return %c0_i32, %c0_i32_0 : i32, i32
  }
  func.func @transform_7(%arg0: i32) -> (i32, i32) {
    %c0_i32 = arith.constant 0 : i32
    %c0_i32_0 = arith.constant 0 : i32
    %c0_i32_1 = arith.constant 0 : i32
    return %c0_i32, %c0_i32_0 : i32, i32
  }
  func.func @transform_8(%arg0: i32) -> (i32, i32) {
    %c0_i32 = arith.constant 0 : i32
    %c0_i32_0 = arith.constant 0 : i32
    %c0_i32_1 = arith.constant 0 : i32
    return %c0_i32, %c0_i32_0 : i32, i32
  }
  func.func @transform_9(%arg0: i32) -> (i32, i32) {
    %c0_i32 = arith.constant 0 : i32
    %c0_i32_0 = arith.constant 0 : i32
    %c0_i32_1 = arith.constant 0 : i32
    return %c0_i32, %c0_i32_0 : i32, i32
  }
  func.func @transform_10(%arg0: i32) -> (i32, i32) {
    %c0_i32 = arith.constant 0 : i32
    %c0_i32_0 = arith.constant 0 : i32
    return %arg0, %c0_i32 : i32, i32
  }
  func.func @transform_11(%arg0: i32) -> (i32, i32) {
    %c0_i32 = arith.constant 0 : i32
    %c0_i32_0 = arith.constant 0 : i32
    return %arg0, %c0_i32 : i32, i32
  }
}

</mosaic_0001>

<bundles_post_ra>
// kernel: vae_forward.1
= control target key start
LH: loop header
LB: loop body
LE: loop exit
PB: predicated region body
PF: predicated region fallthrough
CT: control target
= control target key end

     0   :  { %s8646_s17 = smov 0   ;;  %s11467_s0 = inlined_call_operand.vmem [shape: f32[256,784], index: 0, kind: input, shape index: {}]   ;;  %s11468_s1 = inlined_call_operand.vmem [shape: f32[256,20], index: 1, kind: input, shape index: {}]   ;;  %s11469_s2 = inlined_call_operand.vmem [shape: bf16[784,400], index: 2, kind: input, shape index: {}]   ;;  %s11470_s3 = inlined_call_operand.vmem [shape: f32[1,400], index: 3, kind: input, shape index: {}]   ;;  %s11471_s4 = inlined_call_operand.vmem [shape: bf16[400,128], index: 4, kind: input, shape index: {}]   ;;  %s11472_s5 = inlined_call_operand.vmem [shape: f32[1,128], index: 5, kind: input, shape index: {}]   ;;  %s11473_s6 = inlined_call_operand.vmem [shape: bf16[20,400], index: 6, kind: input, shape index: {}]   ;;  %s11474_s7 = inlined_call_operand.vmem [shape: f32[1,400], index: 7, kind: input, shape index: {}]   ;;  %s11475_s8 = inlined_call_operand.vmem [shape: bf16[400,784], index: 8, kind: input, shape index: {}]   ;;  %s11476_s9 = inlined_call_operand.vmem [shape: f32[1,784], index: 9, kind: input, shape index: {}]   ;;  %s11477_s10 = inlined_call_operand.vmem [shape: f32[256,784], index: 10, kind: output, shape index: {0}]   ;;  %s11478_s11 = inlined_call_operand.vmem [shape: f32[256,128], index: 11, kind: output, shape index: {1}]  }
   0x1 LB: > { %s6771_s18 = sadd.s32 4294967295, %s8582_s17   ;;  %p6775_p0 = scmp.ge.s32.totalorder %s8582_s17, 1  ;;  %s8582_s17 = sphi %s8646_s17, %s22_s17  }
   0x2   : > { %p353_p1 = scmp.lt.s32.totalorder %s8582_s17, 3 }
   0x4   : > { %p354_p2 = pnand %p6775_p0, %p353_p1 }
   0x6   : > { %357 = sbr.rel (%p354_p2) target bundleno = 1508 (0x5e4), region = 60 }
   0xb   : > { %v7516_v0 = vld [vmem:[%s11469_s2 + $0xe4] ss:$16 sps:$4 sm:$0xff]   ;;  %v7520_v2 = vld [vmem:[%s11469_s2 + $0xe0] ss:$16 sps:$4 sm:$0xff]   ;;  %s6776_s26 = sshll.u32 %s6771_s18, 4  ;;  %vm1814_vm0 = vcmask 130048  }
   0xc   : > { %v7518_v1 = vld [vmem:[%s11469_s2 + $0x2e4] ss:$16 sps:$4 sm:$0xff]   ;;  %1839 = vmatprep.subr.bf16.mxu0 %v7516_v0  ;;  %v7521_v3 = vld [vmem:[%s11469_s2 + $0x2e0] ss:$16 sps:$4 sm:$0xff]   ;;  %p406_p3 = scmp.lt.s32.totalorder %s6776_s26, 31  ;;  %vm3515_vm1 = vcmask 1041408  }
   0xd   : > { %1952 = vmatprep.subr.bf16.mxu1 %v7518_v1  ;;  %v7522_v4 = vld [vmem:[%s11469_s2 + $0xc4] ss:$16 sps:$4 sm:$0xff]   ;;  %1840 = vmatpush1.bf16.msra.mxu0 %v7520_v2  ;;  %v7526_v6 = vld [vmem:[%s11469_s2 + $0xc0] ss:$16 sps:$4 sm:$0xff]   ;;  %s8585_s13 = smov 108   ;;  %vm3490_vm2 = vcmask 162816  }
   0xe   : > { %1953 = vmatpush1.bf16.msra.mxu1 %v7521_v3  ;;  %v7524_v5 = vld [vmem:[%s11469_s2 + $0x2c4] ss:$16 sps:$4 sm:$0xff]   ;;  %1841 = vmatprep.subr.bf16.mxu0 %v7522_v4  ;;  %v7527_v7 = vld [vmem:[%s11469_s2 + $0x2c0] ss:$16 sps:$4 sm:$0xff]   ;;  %s11547_s26 = smov (!%p406_p3, %s6776_s26), 31 }
   0xf   : > { %1954 = vmatprep.subr.bf16.mxu1 %v7524_v5  ;;  %v7528_v8 = vld [vmem:[%s11469_s2 + $0xa4] ss:$16 sps:$4 sm:$0xff]   ;;  %v7532_v10 = vld [vmem:[%s11469_s2 + $0xa0] ss:$16 sps:$4 sm:$0xff]   ;;  %s7505_s30 = smul.u32 56, %s11547_s26  ;;  %s6779_s27 = sshll.u32 %s11547_s26, 3 }
  0x10   : > { %v7530_v9 = vld [vmem:[%s11469_s2 + $0x2a4] ss:$16 sps:$4 sm:$0xff]   ;;  %v7533_v11 = vld [vmem:[%s11469_s2 + $0x2a0] ss:$16 sps:$4 sm:$0xff]   ;;  %s10143_s12 = scalar_lea.vmem %s11478_s11, %s6779_s27  ;;  %s10284_s21 = scalar_lea.vmem %s11468_s1, %s6779_s27 }
  0x11   : > { %1842 = vmatpush1.bf16.msra.mxu0 %v7526_v6  ;;  %v7534_v12 = vld [vmem:[%s11469_s2 + $0x84] ss:$16 sps:$4 sm:$0xff]   ;;  %v7538_v14 = vld [vmem:[%s11469_s2 + $0x80] ss:$16 sps:$4 sm:$0xff]   ;;  %s8796_s25 = scalar_lea.vmem %s11467_s0, %s7505_s30  ;;  %s11200_s27 = scalar_lea.vmem %s11477_s10, %s7505_s30 }
  0x12   : > { %1955 = vmatpush1.bf16.msra.mxu1 %v7527_v7  ;;  %1843 = vmatprep.subr.bf16.mxu0 %v7528_v8  ;;  %v7536_v13 = vld [vmem:[%s11469_s2 + $0x284] ss:$16 sps:$4 sm:$0xff]   ;;  %v7539_v15 = vld [vmem:[%s11469_s2 + $0x280] ss:$16 sps:$4 sm:$0xff]   ;;  %v433_v46 = vld [vmem:[%s8796_s25 + $0x8] sm:$0xff] }
  0x13   : > { %1956 = vmatprep.subr.bf16.mxu1 %v7530_v9  ;;  %v7540_v16 = vld [vmem:[%s11469_s2 + $0x64] ss:$16 sps:$4 sm:$0xff]   ;;  %v7544_v18 = vld [vmem:[%s11469_s2 + $0x60] ss:$16 sps:$4 sm:$0xff]   ;;  %v435_v48 = vld [vmem:[%s8796_s25 + $0x18] sm:$0xff] }
  0x14   : > { %v7542_v17 = vld [vmem:[%s11469_s2 + $0x264] ss:$16 sps:$4 sm:$0xff]   ;;  %v7545_v19 = vld [vmem:[%s11469_s2 + $0x260] ss:$16 sps:$4 sm:$0xff]   ;;  %v439_v7 = vld [vmem:[%s8796_s25 + $0x38] sm:$0xff] }
  0x15   : > { %1844 = vmatpush1.bf16.msra.mxu0 %v7532_v10  ;;  %v7546_v20 = vld [vmem:[%s11469_s2 + $0x44] ss:$16 sps:$4 sm:$0xff]   ;;  %v7550_v22 = vld [vmem:[%s11469_s2 + $0x40] ss:$16 sps:$4 sm:$0xff]   ;;  %v441_v9 = vld [vmem:[%s8796_s25 + $0x48] sm:$0xff] }
  0x16   : > { %1957 = vmatpush1.bf16.msra.mxu1 %v7533_v11  ;;  %1845 = vmatprep.subr.bf16.mxu0 %v7534_v12  ;;  %v7548_v21 = vld [vmem:[%s11469_s2 + $0x244] ss:$16 sps:$4 sm:$0xff]   ;;  %v7551_v23 = vld [vmem:[%s11469_s2 + $0x240] ss:$16 sps:$4 sm:$0xff]  }
  0x17   : > { %1958 = vmatprep.subr.bf16.mxu1 %v7536_v13  ;;  %v7552_v24 = vld [vmem:[%s11469_s2 + $0x24] ss:$16 sps:$4 sm:$0xff]   ;;  %v7556_v26 = vld [vmem:[%s11469_s2 + $0x20] ss:$16 sps:$4 sm:$0xff]   ;;  %v447_v13 = vld [vmem:[%s8796_s25 + $0x78] sm:$0xff] }
  0x18   : > { %v7554_v25 = vld [vmem:[%s11469_s2 + $0x224] ss:$16 sps:$4 sm:$0xff]   ;;  %v7557_v27 = vld [vmem:[%s11469_s2 + $0x220] ss:$16 sps:$4 sm:$0xff]  }
  0x19   : > { %1846 = vmatpush1.bf16.msra.mxu0 %v7538_v14  ;;  %v7558_v28 = vld [vmem:[%s11469_s2 + $0x4] ss:$16 sps:$4 sm:$0xff]   ;;  %v7562_v30 = vld [vmem:[%s11469_s2] ss:$16 sps:$4 sm:$0xff]  }
  0x1a   : > { %1959 = vmatpush1.bf16.msra.mxu1 %v7539_v15  ;;  %1847 = vmatprep.subr.bf16.mxu0 %v7540_v16  ;;  %v7560_v29 = vld [vmem:[%s11469_s2 + $0x204] ss:$16 sps:$4 sm:$0xff]   ;;  %v7563_v31 = vld [vmem:[%s11469_s2 + $0x200] ss:$16 sps:$4 sm:$0xff]  }
  0x1b   : > { %1960 = vmatprep.subr.bf16.mxu1 %v7542_v17  ;;  %v7564_v32 = vld [vmem:[%s11469_s2 + $0x1e4] ss:$16 sps:$4 sm:$0xff]   ;;  %v7568_v34 = vld [vmem:[%s11469_s2 + $0x1e0] ss:$16 sps:$4 sm:$0xff]   ;;  %v449_v17 = vld [vmem:[%s8796_s25 + $0x88] sm:$0xff] }
  0x1c   : > { %v7566_v33 = vld [vmem:[%s11469_s2 + $0x3e4] ss:$16 sps:$4 sm:$0xff]   ;;  %v7569_v35 = vld [vmem:[%s11469_s2 + $0x3e0] ss:$16 sps:$4 sm:$0xff]  }
  0x1d   : > { %1848 = vmatpush1.bf16.msra.mxu0 %v7544_v18  ;;  %v7570_v36 = vld [vmem:[%s11469_s2 + $0x1c4] ss:$16 sps:$4 sm:$0xff]   ;;  %v7574_v38 = vld [vmem:[%s11469_s2 + $0x1c0] ss:$16 sps:$4 sm:$0xff]  }
  0x1e   : > { %1961 = vmatpush1.bf16.msra.mxu1 %v7545_v19  ;;  %1849 = vmatprep.subr.bf16.mxu0 %v7546_v20  ;;  %v7572_v37 = vld [vmem:[%s11469_s2 + $0x3c4] ss:$16 sps:$4 sm:$0xff]   ;;  %v7575_v39 = vld [vmem:[%s11469_s2 + $0x3c0] ss:$16 sps:$4 sm:$0xff]  }
  0x1f   : > { %1962 = vmatprep.subr.bf16.mxu1 %v7548_v21  ;;  %v7576_v40 = vld [vmem:[%s11469_s2 + $0x1a4] ss:$16 sps:$4 sm:$0xff]   ;;  %v7580_v42 = vld [vmem:[%s11469_s2 + $0x1a0] ss:$16 sps:$4 sm:$0xff]  }
  0x20   : > { %v7578_v41 = vld [vmem:[%s11469_s2 + $0x3a4] ss:$16 sps:$4 sm:$0xff]   ;;  %v7581_v43 = vld [vmem:[%s11469_s2 + $0x3a0] ss:$16 sps:$4 sm:$0xff]  }
  0x21   : > { %1850 = vmatpush1.bf16.msra.mxu0 %v7550_v22  ;;  %v7582_v44 = vld [vmem:[%s11469_s2 + $0x184] ss:$16 sps:$4 sm:$0xff]   ;;  %v7586_v50 = vld [vmem:[%s11469_s2 + $0x180] ss:$16 sps:$4 sm:$0xff]  }
  0x22   : > { %1963 = vmatpush1.bf16.msra.mxu1 %v7551_v23  ;;  %1851 = vmatprep.subr.bf16.mxu0 %v7552_v24  ;;  %v7584_v45 = vld [vmem:[%s11469_s2 + $0x384] ss:$16 sps:$4 sm:$0xff]   ;;  %v7587_v51 = vld [vmem:[%s11469_s2 + $0x380] ss:$16 sps:$4 sm:$0xff]  }
  0x23   : > { %1964 = vmatprep.subr.bf16.mxu1 %v7554_v25  ;;  %v440_v47 = vld [vmem:[%s8796_s25 + $0x40] sm:$0xff]  ;;  %v442_v49 = vld [vmem:[%s8796_s25 + $0x50] sm:$0xff]  ;;  %v453_v25 = vld [vmem:[%s8796_s25 + $0xa8] sm:$0xff] }
  0x24   : > { %v7588_v52 = vld [vmem:[%s11469_s2 + $0x164] ss:$16 sps:$4 sm:$0xff]   ;;  %v8817_v53 = vpack.c.bf16 %v440_v47, %v433_v46  ;;  %v8819_v54 = vpack.c.bf16 %v442_v49, %v435_v48  ;;  %v7592_v56 = vld [vmem:[%s11469_s2 + $0x160] ss:$16 sps:$4 sm:$0xff]   ;;  %v477_v47 = vld [vmem:[%s8796_s25 + $0x168] sm:$0xff] }
  0x25   : > { %1852 = vmatpush1.bf16.msra.mxu0 %v7556_v26  ;;  %v7590_v55 = vld [vmem:[%s11469_s2 + $0x364] ss:$16 sps:$4 sm:$0xff]   ;;  %v7593_v57 = vld [vmem:[%s11469_s2 + $0x360] ss:$16 sps:$4 sm:$0xff]  }
  0x26   : > { %1965 = vmatpush1.bf16.msra.mxu1 %v7557_v27  ;;  %1853 = vmatprep.subr.bf16.mxu0 %v7558_v28  ;;  %v7594_v58 = vld [vmem:[%s11469_s2 + $0x144] ss:$16 sps:$4 sm:$0xff]   ;;  %v7598_v60 = vld [vmem:[%s11469_s2 + $0x140] ss:$16 sps:$4 sm:$0xff]   ;;  %v455_v27 = vld [vmem:[%s8796_s25 + $0xb8] sm:$0xff] }
  0x27   : > { %1966 = vmatprep.subr.bf16.mxu1 %v7560_v29  ;;  %1871 = vmatprep.mubr.bf16.mxu0 %v8817_v53  ;;  %v7596_v59 = vld [vmem:[%s11469_s2 + $0x344] ss:$16 sps:$4 sm:$0xff]   ;;  %v7599_v61 = vld [vmem:[%s11469_s2 + $0x340] ss:$16 sps:$4 sm:$0xff]   ;;  %v461_v29 = vld [vmem:[%s8796_s25 + $0xe8] sm:$0xff] }
  0x28   : > { %1984 = vmatprep.mubr.bf16.mxu1 %v8819_v54  ;;  %v7600_v62 = vld [vmem:[%s11469_s2 + $0x124] ss:$16 sps:$4 sm:$0xff]   ;;  %v7604_v0 = vld [vmem:[%s11469_s2 + $0x120] ss:$16 sps:$4 sm:$0xff]  }
  0x29   : > { %1854 = vmatpush1.bf16.msra.mxu0 %v7562_v30  ;;  %v7602_v63 = vld [vmem:[%s11469_s2 + $0x324] ss:$16 sps:$4 sm:$0xff]   ;;  %v7605_v1 = vld [vmem:[%s11469_s2 + $0x320] ss:$16 sps:$4 sm:$0xff]  }
  0x2a   : > { %1967 = vmatpush1.bf16.msra.mxu1 %v7563_v31  ;;  %1855 = vmatprep.subr.bf16.mxu0 %v7564_v32  ;;  %v7606_v2 = vld [vmem:[%s11469_s2 + $0x104] ss:$16 sps:$4 sm:$0xff]   ;;  %v7610_v4 = vld [vmem:[%s11469_s2 + $0x100] ss:$16 sps:$4 sm:$0xff]   ;;  %v463_v31 = vld [vmem:[%s8796_s25 + $0xf8] sm:$0xff] }
  0x2b   : > { %1968 = vmatprep.subr.bf16.mxu1 %v7566_v33  ;;  %v7608_v3 = vld [vmem:[%s11469_s2 + $0x304] ss:$16 sps:$4 sm:$0xff]   ;;  %v7611_v5 = vld [vmem:[%s11469_s2 + $0x300] ss:$16 sps:$4 sm:$0xff]  }
  0x2c   : > { %v432_v6 = vld [vmem:[%s8796_s25] sm:$0xff]  ;;  %v434_v8 = vld [vmem:[%s8796_s25 + $0x10] sm:$0xff] }
  0x2d   : > { %1856 = vmatpush2.bf16.msra.mxu0 %v7568_v34  ;;  %v7614_v10 = vld [vmem:[%s11469_s2 + $0x4e4] ss:$16 sps:$4 sm:$0xff]   ;;  %v7612_v12 = vld [vmem:[%s11469_s2 + $0x4e0] ss:$16 sps:$4 sm:$0xff]   ;;  %v8883_v15 = vpack.c.bf16 %v439_v7, %v432_v6  ;;  %v8885_v16 = vpack.c.bf16 %v441_v9, %v434_v8 }
  0x2e   : > { %1969 = vmatpush2.bf16.msra.mxu1 %v7569_v35  ;;  %1857 = vmatprep.subr.bf16.mxu0 %v7570_v36  ;;  %v7617_v11 = vld [vmem:[%s11469_s2 + $0x604] ss:$16 sps:$4 sm:$0xff]   ;;  %v7615_v19 = vld [vmem:[%s11469_s2 + $0x600] ss:$16 sps:$4 sm:$0xff]  }
  0x2f   : > { %1970 = vmatprep.subr.bf16.mxu1 %v7572_v37  ;;  %v454_v14 = vld [vmem:[%s8796_s25 + $0xb0] sm:$0xff]  ;;  %v456_v18 = vld [vmem:[%s8796_s25 + $0xc0] sm:$0xff] }
  0x30   : > { %v7620_v20 = vld [vmem:[%s11469_s2 + $0x4c4] ss:$16 sps:$4 sm:$0xff]   ;;  %v8895_v21 = vpack.c.bf16 %v454_v14, %v447_v13  ;;  %v7618_v22 = vld [vmem:[%s11469_s2 + $0x4c0] ss:$16 sps:$4 sm:$0xff]   ;;  %v8900_v23 = vpack.c.bf16 %v456_v18, %v449_v17  ;;  %v7668_v13 = vld [vmem:[%s11469_s2 + $0x2ec] ss:$16 sps:$4 sm:$0xff]  }
  0x31   : > { %1858 = vmatpush2.bf16.msra.mxu0 %v7574_v38  ;;  %v446_v24 = vld [vmem:[%s8796_s25 + $0x70] sm:$0xff]  ;;  %v448_v26 = vld [vmem:[%s8796_s25 + $0x80] sm:$0xff]  ;;  %v497_v14 = vld [vmem:[%s8796_s25 + $0x208] sm:$0xff] }
  0x32   : > { %1971 = vmatpush2.bf16.msra.mxu1 %v7575_v39  ;;  %1859 = vmatprep.subr.bf16.mxu0 %v7576_v40  ;;  %v7623_v28 = vld [vmem:[%s11469_s2 + $0x4a4] ss:$16 sps:$4 sm:$0xff]   ;;  %v8917_v33 = vpack.c.bf16 %v453_v25, %v446_v24  ;;  %v8919_v34 = vpack.c.bf16 %v455_v27, %v448_v26  ;;  %v7621_v35 = vld [vmem:[%s11469_s2 + $0x4a0] ss:$16 sps:$4 sm:$0xff]   ;;  %v503_v18 = vld [vmem:[%s8796_s25 + $0x238] sm:$0xff] }
  0x33   : > { %1972 = vmatprep.subr.bf16.mxu1 %v7578_v41  ;;  %v468_v30 = vld [vmem:[%s8796_s25 + $0x120] sm:$0xff]  ;;  %v470_v32 = vld [vmem:[%s8796_s25 + $0x130] sm:$0xff]  ;;  %v467_v41 = vld [vmem:[%s8796_s25 + $0x118] sm:$0xff] }
  0x34   : > { %v8924_v36 = vpack.c.bf16 %v468_v30, %v461_v29  ;;  %v7626_v37 = vld [vmem:[%s11469_s2 + $0x484] ss:$16 sps:$4 sm:$0xff]   ;;  %v8929_v38 = vpack.c.bf16 %v470_v32, %v463_v31  ;;  %v7624_v39 = vld [vmem:[%s11469_s2 + $0x480] ss:$16 sps:$4 sm:$0xff]   ;;  %v509_v32 = vld [vmem:[%s8796_s25 + $0x268] sm:$0xff] }
  0x35   : > { %1860 = vmatpush2.bf16.msra.mxu0 %v7580_v42  ;;  %v460_v40 = vld [vmem:[%s8796_s25 + $0xe0] sm:$0xff]  ;;  %v462_v42 = vld [vmem:[%s8796_s25 + $0xf0] sm:$0xff] }
  0x36   : > { %1973 = vmatpush2.bf16.msra.mxu1 %v7581_v43  ;;  %1861 = vmatprep.subr.bf16.mxu0 %v7582_v44  ;;  %v469_v43 = vld [vmem:[%s8796_s25 + $0x128] sm:$0xff]  ;;  %v7629_v44 = vld [vmem:[%s11469_s2 + $0x464] ss:$16 sps:$4 sm:$0xff]   ;;  %v8949_v49 = vpack.c.bf16 %v467_v41, %v460_v40  ;;  %v7636_v9 = vld [vmem:[%s11469_s2 + $0x400] ss:$16 sps:$4 sm:$0xff]  }
  0x37   : > { %1974 = vmatprep.subr.bf16.mxu1 %v7584_v45  ;;  %v475_v45 = vld [vmem:[%s8796_s25 + $0x158] sm:$0xff]  ;;  %v482_v46 = vld [vmem:[%s8796_s25 + $0x190] sm:$0xff]  ;;  %v484_v48 = vld [vmem:[%s8796_s25 + $0x1a0] sm:$0xff] }
  0x38   : > { %v7638_v7 = vld [vmem:[%s11469_s2 + $0x404] ss:$16 sps:$4 sm:$0xff]   ;;  %v7639_v26 = vld [vmem:[%s11469_s2 + $0x5e0] ss:$16 sps:$4 sm:$0xff]   ;;  %v517_v40 = vld [vmem:[%s8796_s25 + $0x2a8] sm:$0xff] }
  0x39   : > { %1862 = vmatpush2.bf16.msra.mxu0 %v7586_v50  ;;  %v8951_v50 = vpack.c.bf16 %v469_v43, %v462_v42  ;;  %v7641_v17 = vld [vmem:[%s11469_s2 + $0x5e4] ss:$16 sps:$4 sm:$0xff]   ;;  %v7642_v30 = vld [vmem:[%s11469_s2 + $0x5c0] ss:$16 sps:$4 sm:$0xff]   ;;  %v519_v42 = vld [vmem:[%s8796_s25 + $0x2b8] sm:$0xff] }
  0x3a   : > { %1975 = vmatpush2.bf16.msra.mxu1 %v7587_v51  ;;  %1863 = vmatprep.subr.bf16.mxu0 %v7588_v52  ;;  %v7627_v51 = vld [vmem:[%s11469_s2 + $0x460] ss:$16 sps:$4 sm:$0xff]   ;;  %v8956_v52 = vpack.c.bf16 %v482_v46, %v475_v45 }
  0x3b   : > { %1976 = vmatprep.subr.bf16.mxu1 %v7590_v55  ;;  %v7632_v55 = vld [vmem:[%s11469_s2 + $0x444] ss:$16 sps:$4 sm:$0xff]   ;;  %v7645_v46 = vld [vmem:[%s11469_s2 + $0x5a0] ss:$16 sps:$4 sm:$0xff]  }
  0x3c   : > { %v502_v31 = vld [vmem:[%s8796_s25 + $0x230] sm:$0xff]  ;;  %v524_v41 = vld [vmem:[%s8796_s25 + $0x2e0] sm:$0xff] }
  0x3d   : > { %1864 = vmatpush2.bf16.msra.mxu0 %v7592_v56  ;;  %v8961_v56 = vpack.c.bf16 %v484_v48, %v477_v47  ;;  %v526_v43 = vld [vmem:[%s8796_s25 + $0x2f0] sm:$0xff]  ;;  %v9055_v47 = vpack.c.bf16 %v524_v41, %v517_v40  ;;  %v445_v41 = vld [vmem:[%s8796_s25 + $0x68] sm:$0xff] }
  0x3e   : > { %1977 = vmatpush2.bf16.msra.mxu1 %v7593_v57  ;;  %1865 = vmatprep.subr.bf16.mxu0 %v7594_v58  ;;  %v7630_v57 = vld [vmem:[%s11469_s2 + $0x440] ss:$16 sps:$4 sm:$0xff]   ;;  %v7650_v48 = vld [vmem:[%s11469_s2 + $0x584] ss:$16 sps:$4 sm:$0xff]  }
  0x3f   : > { %1978 = vmatprep.subr.bf16.mxu1 %v7596_v59  ;;  %v474_v58 = vld [vmem:[%s8796_s25 + $0x150] sm:$0xff]  ;;  %v481_v59 = vld [vmem:[%s8796_s25 + $0x188] sm:$0xff] }
  0x40   : > { %v438_v40 = vld [vmem:[%s8796_s25 + $0x30] sm:$0xff] }
  0x41   : > { %1866 = vmatpush2.bf16.msra.mxu0 %v7598_v60  ;;  %v476_v60 = vld [vmem:[%s8796_s25 + $0x160] sm:$0xff] }
  0x42   : > { %1979 = vmatpush2.bf16.msra.mxu1 %v7599_v61  ;;  %1867 = vmatprep.subr.bf16.mxu0 %v7600_v62  ;;  %v483_v61 = vld [vmem:[%s8796_s25 + $0x198] sm:$0xff]  ;;  %v7635_v62 = vld [vmem:[%s11469_s2 + $0x424] ss:$16 sps:$4 sm:$0xff]  }
  0x43   : > { %1980 = vmatprep.subr.bf16.mxu1 %v7602_v63  ;;  %v489_v63 = vld [vmem:[%s8796_s25 + $0x1c8] sm:$0xff] }
  0x45   : > { %1868 = vmatpush2.bf16.msra.mxu0 %v7604_v0  ;;  %v496_v0 = vld [vmem:[%s8796_s25 + $0x200] sm:$0xff] }
  0x46   : > { %1981 = vmatpush2.bf16.msra.mxu1 %v7605_v1  ;;  %1869 = vmatprep.subr.bf16.mxu0 %v7606_v2  ;;  %v491_v1 = vld [vmem:[%s8796_s25 + $0x1d8] sm:$0xff]  ;;  %v498_v2 = vld [vmem:[%s8796_s25 + $0x210] sm:$0xff]  ;;  %v8988_v6 = vpack.c.bf16 %v496_v0, %v489_v63  ;;  %v533_v0 = vld [vmem:[%s8796_s25 + $0x328] sm:$0xff] }
  0x47   : > { %1982 = vmatprep.subr.bf16.mxu1 %v7608_v3  ;;  %v8981_v3 = vpack.c.bf16 %v481_v59, %v474_v58  ;;  %v8993_v8 = vpack.c.bf16 %v498_v2, %v491_v1  ;;  %v523_v58 = vld [vmem:[%s8796_s25 + $0x2d8] sm:$0xff]  ;;  %v518_v59 = vld [vmem:[%s8796_s25 + $0x2b0] sm:$0xff]  ;;  %v540_v1 = vld [vmem:[%s8796_s25 + $0x360] sm:$0xff] }
  0x48   : > { %v538_v63 = vld [vmem:[%s8796_s25 + $0x350] sm:$0xff] }
  0x49   : > { %1870 = vmatpush2.bf16.msra.mxu0 %v7610_v4  ;;  %v8983_v4 = vpack.c.bf16 %v483_v61, %v476_v60  ;;  %v525_v60 = vld [vmem:[%s8796_s25 + $0x2e8] sm:$0xff]  ;;  %v7653_v61 = vld [vmem:[%s11469_s2 + $0x564] ss:$16 sps:$4 sm:$0xff]  }
  0x4a   : > { %1983 = vmatpush2.bf16.msra.mxu1 %v7611_v5  ;;  %2065 = vmatprep.subr.bf16.mxu0 %v7614_v10  ;;  %v7633_v5 = vld [vmem:[%s11469_s2 + $0x420] ss:$16 sps:$4 sm:$0xff]  }
  0x4b   : > { %2192 = vmatprep.subr.bf16.mxu1 %v7617_v11  ;;  %v488_v10 = vld [vmem:[%s8796_s25 + $0x1c0] sm:$0xff]  ;;  %v495_v11 = vld [vmem:[%s8796_s25 + $0x1f8] sm:$0xff] }
  0x4c   : > { %1872 = vmatmul.mubr.bf16.vlgmr.msra.gmra.mxu0 %v8883_v15  ;;  %v9016_v24 = vpack.c.bf16 %v495_v11, %v488_v10  ;;  %v7656_v10 = vld [vmem:[%s11469_s2 + $0x544] ss:$16 sps:$4 sm:$0xff]   ;;  %v9092_v11 = vpack.c.bf16 %v540_v1, %v533_v0  ;;  %v7672_v0 = vld [vmem:[%s11469_s2 + $0x2c8] ss:$16 sps:$4 sm:$0xff]  }
  0x4d   : > { %1985 = vmatmul.mubr.bf16.vlgmr.msra.gmra.mxu1 %v8885_v16  ;;  %2066 = vmatpush1.bf16.msra.mxu0 %v7612_v12  ;;  %v490_v12 = vld [vmem:[%s8796_s25 + $0x1d0] sm:$0xff] }
  0x4e   : > { %2193 = vmatpush1.bf16.msra.mxu1 %v7615_v19  ;;  %2067 = vmatprep.subr.bf16.mxu0 %v7620_v20  ;;  %v510_v19 = vld [vmem:[%s8796_s25 + $0x270] sm:$0xff]  ;;  %v505_v20 = vld [vmem:[%s8796_s25 + $0x248] sm:$0xff]  ;;  %v9018_v25 = vpack.c.bf16 %v497_v14, %v490_v12 }
  0x4f   : > { %1881 = vmatprep.mubr.bf16.mxu0 %v8895_v21  ;;  %1994 = vmatprep.mubr.bf16.mxu1 %v8900_v23  ;;  %v9023_v27 = vpack.c.bf16 %v510_v19, %v503_v18  ;;  %v7654_v12 = vld [vmem:[%s11469_s2 + $0x540] ss:$16 sps:$4 sm:$0xff]   ;;  %v537_v14 = vld [vmem:[%s8796_s25 + $0x348] sm:$0xff]  ;;  %v539_v18 = vld [vmem:[%s8796_s25 + $0x358] sm:$0xff] }
  0x50   : > { %2404 = vmatprep.subr.bf16.mxu1 %v7668_v13  ;;  %v530_v13 = vld [vmem:[%s8796_s25 + $0x310] sm:$0xff] }
  0x51   : > { %2068 = vmatpush1.bf16.msra.mxu0 %v7618_v22  ;;  %v512_v22 = vld [vmem:[%s8796_s25 + $0x280] sm:$0xff]  ;;  %v450_v1 = vld [vmem:[%s8796_s25 + $0x90] sm:$0xff] }
  0x52   : > { %2069 = vmatprep.subr.bf16.mxu0 %v7623_v28  ;;  %v7644_v28 = vld [vmem:[%s11469_s2 + $0x5c4] ss:$16 sps:$4 sm:$0xff]   ;;  %v9028_v29 = vpack.c.bf16 %v512_v22, %v505_v20  ;;  %v437_v20 = vld [vmem:[%s8796_s25 + $0x28] sm:$0xff] }
  0x53   : > { %v7659_v19 = vld [vmem:[%s11469_s2 + $0x524] ss:$16 sps:$4 sm:$0xff]  }
  0x54   : > { %1882 = vmatmul.mubr.bf16.gmra.mxu0 %v8917_v33  ;;  %v444_v22 = vld [vmem:[%s8796_s25 + $0x60] sm:$0xff] }
  0x55   : > { %1995 = vmatmul.mubr.bf16.gmra.mxu1 %v8919_v34  ;;  %2070 = vmatpush1.bf16.msra.mxu0 %v7621_v35  ;;  %v504_v35 = vld [vmem:[%s8796_s25 + $0x240] sm:$0xff] }
  0x56   : > { %1891 = vmatprep.mubr.bf16.mxu0 %v8924_v36  ;;  %2071 = vmatprep.subr.bf16.mxu0 %v7626_v37  ;;  %v511_v37 = vld [vmem:[%s8796_s25 + $0x278] sm:$0xff] }
  0x57   : > { %2004 = vmatprep.mubr.bf16.mxu1 %v8929_v38  ;;  %v9050_v45 = vpack.c.bf16 %v511_v37, %v504_v35  ;;  %v7660_v35 = vld [vmem:[%s11469_s2 + $0x500] ss:$16 sps:$4 sm:$0xff]  }
  0x58   : > { %v436_v37 = vld [vmem:[%s8796_s25 + $0x20] sm:$0xff] }
  0x59   : > { %2072 = vmatpush1.bf16.msra.mxu0 %v7624_v39  ;;  %v7647_v39 = vld [vmem:[%s11469_s2 + $0x5a4] ss:$16 sps:$4 sm:$0xff]  }
  0x5a   : > { %2073 = vmatprep.subr.bf16.mxu0 %v7629_v44  ;;  %v9048_v44 = vpack.c.bf16 %v509_v32, %v502_v31  ;;  %v9117_v31 = vpack.c.bf16 %v444_v22, %v437_v20  ;;  %v7662_v32 = vld [vmem:[%s11469_s2 + $0x504] ss:$16 sps:$4 sm:$0xff]   ;;  %v7675_v22 = vld [vmem:[%s11469_s2 + $0xa8] ss:$16 sps:$4 sm:$0xff]  }
  0x5b   : > { %v472_v20 = vld [vmem:[%s8796_s25 + $0x140] sm:$0xff] }
  0x5c   : > { %1892 = vmatmul.mubr.bf16.gmra.mxu0 %v8949_v49 }
  0x5d   : > { %2005 = vmatmul.mubr.bf16.gmra.mxu1 %v8951_v50  ;;  %2074 = vmatpush1.bf16.msra.mxu0 %v7627_v51  ;;  %v9060_v51 = vpack.c.bf16 %v526_v43, %v519_v42  ;;  %v11479_v42 = vmov 0   ;;  %v7665_v43 = vld [vmem:[%s11469_s2 + $0xec] ss:$16 sps:$4 sm:$0xff]  }
  0x5e   : > { %1901 = vmatprep.mubr.bf16.mxu0 %v8956_v52  ;;  %2075 = vmatprep.subr.bf16.mxu0 %v7632_v55  ;;  %v7648_v55 = vld [vmem:[%s11469_s2 + $0x580] ss:$16 sps:$4 sm:$0xff]  }
  0x5f   : > { %2014 = vmatprep.mubr.bf16.mxu1 %v8961_v56 }
  0x61   : > { %2076 = vmatpush1.bf16.msra.mxu0 %v7630_v57  ;;  %v516_v57 = vld [vmem:[%s8796_s25 + $0x2a0] sm:$0xff] }
  0x62   : > { %2077 = vmatprep.subr.bf16.mxu0 %v7635_v62  ;;  %v531_v62 = vld [vmem:[%s8796_s25 + $0x318] sm:$0xff]  ;;  %v9080_v2 = vpack.c.bf16 %v523_v58, %v516_v57  ;;  %v9144_v57 = vpack.c.bf16 %v445_v41, %v438_v40  ;;  %v464_v41 = vld [vmem:[%s8796_s25 + $0x100] sm:$0xff] }
  0x63   : > { %v451_v58 = vld [vmem:[%s8796_s25 + $0x98] sm:$0xff] }
  0x64   : > { %1902 = vmatmul.mubr.bf16.gmra.mxu0 %v8981_v3 }
  0x65   : > { %2015 = vmatmul.mubr.bf16.gmra.mxu1 %v8983_v4  ;;  %2078 = vmatpush1.bf16.msra.mxu0 %v7633_v5  ;;  %v9082_v5 = vpack.c.bf16 %v525_v60, %v518_v59  ;;  %v458_v59 = vld [vmem:[%s8796_s25 + $0xd0] sm:$0xff]  ;;  %v7671_v60 = vld [vmem:[%s11469_s2 + $0xcc] ss:$16 sps:$4 sm:$0xff]  }
  0x66   : > { %1911 = vmatprep.mubr.bf16.mxu0 %v8988_v6  ;;  %2079 = vmatprep.subr.bf16.mxu0 %v7638_v7  ;;  %v7651_v7 = vld [vmem:[%s11469_s2 + $0x560] ss:$16 sps:$4 sm:$0xff]  }
  0x67   : > { %2024 = vmatprep.mubr.bf16.mxu1 %v8993_v8 }
  0x69   : > { %2080 = vmatpush1.bf16.msra.mxu0 %v7636_v9  ;;  %v9087_v9 = vpack.c.bf16 %v538_v63, %v531_v62  ;;  %v7669_v62 = vld [vmem:[%s11469_s2 + $0xc8] ss:$16 sps:$4 sm:$0xff]   ;;  %v9157_v63 = vpack.c.bf16 %v458_v59, %v451_v58  ;;  %v7689_v58 = vld [vmem:[%s11469_s2 + $0x6c] ss:$16 sps:$4 sm:$0xff]  }
  0x6a   : > { %2081 = vmatprep.subr.bf16.mxu0 %v7641_v17  ;;  %v532_v17 = vld [vmem:[%s8796_s25 + $0x320] sm:$0xff]  ;;  %v7692_v59 = vld [vmem:[%s11469_s2 + $0x26c] ss:$16 sps:$4 sm:$0xff]  }
  0x6c   : > { %1912 = vmatmul.mubr.bf16.gmra.mxu0 %v9016_v24 }
  0x6d   : > { %2025 = vmatmul.mubr.bf16.gmra.mxu1 %v9018_v25  ;;  %2082 = vmatpush2.bf16.msra.mxu0 %v7639_v26  ;;  %v9110_v26 = vpack.c.bf16 %v537_v14, %v530_v13  ;;  %v7677_v13 = vld [vmem:[%s11469_s2 + $0xac] ss:$16 sps:$4 sm:$0xff]  }
  0x6e   : > { %1921 = vmatprep.mubr.bf16.mxu0 %v9023_v27  ;;  %2083 = vmatprep.subr.bf16.mxu0 %v7644_v28  ;;  %v9112_v28 = vpack.c.bf16 %v539_v18, %v532_v17  ;;  %v7680_v14 = vld [vmem:[%s11469_s2 + $0x2ac] ss:$16 sps:$4 sm:$0xff]  }
  0x6f   : > { %2034 = vmatprep.mubr.bf16.mxu1 %v9028_v29  ;;  %v465_v17 = vld [vmem:[%s8796_s25 + $0x108] sm:$0xff] }
  0x70   : > { %v9201_v40 = vpack.c.bf16 %v472_v20, %v465_v17  ;;  %v478_v20 = vld [vmem:[%s8796_s25 + $0x170] sm:$0xff] }
  0x71   : > { %2084 = vmatpush2.bf16.msra.mxu0 %v7642_v30  ;;  %v7657_v30 = vld [vmem:[%s11469_s2 + $0x520] ss:$16 sps:$4 sm:$0xff]  }
  0x72   : > { %2085 = vmatprep.subr.bf16.mxu0 %v7647_v39  ;;  %v443_v39 = vld [vmem:[%s8796_s25 + $0x58] sm:$0xff] }
  0x74   : > { %1922 = vmatmul.mubr.bf16.gmra.mxu0 %v9048_v44 }
  0x75   : > { %2035 = vmatmul.mubr.bf16.gmra.mxu1 %v9050_v45  ;;  %2086 = vmatpush2.bf16.msra.mxu0 %v7645_v46  ;;  %v7663_v46 = vld [vmem:[%s11469_s2 + $0xe8] ss:$16 sps:$4 sm:$0xff]  }
  0x76   : > { %1931 = vmatprep.mubr.bf16.mxu0 %v9055_v47  ;;  %2087 = vmatprep.subr.bf16.mxu0 %v7650_v48  ;;  %v7666_v48 = vld [vmem:[%s11469_s2 + $0x2e8] ss:$16 sps:$4 sm:$0xff]  }
  0x77   : > { %2044 = vmatprep.mubr.bf16.mxu1 %v9060_v51 }
  0x79   : > { %2088 = vmatpush2.bf16.msra.mxu0 %v7648_v55  ;;  %v9142_v55 = vpack.c.bf16 %v443_v39, %v436_v37  ;;  %v7681_v37 = vld [vmem:[%s11469_s2 + $0x88] ss:$16 sps:$4 sm:$0xff]  }
  0x7a   : > { %2089 = vmatprep.subr.bf16.mxu0 %v7653_v61  ;;  %v7674_v61 = vld [vmem:[%s11469_s2 + $0x2cc] ss:$16 sps:$4 sm:$0xff]   ;;  %v7684_v39 = vld [vmem:[%s11469_s2 + $0x288] ss:$16 sps:$4 sm:$0xff]  }
  0x7c   : > { %1932 = vmatmul.mubr.bf16.gmra.mxu0 %v9080_v2 }
  0x7d   : > { %2045 = vmatmul.mubr.bf16.gmra.mxu1 %v9082_v5  ;;  %2090 = vmatpush2.bf16.msra.mxu0 %v7651_v7  ;;  %v457_v7 = vld [vmem:[%s8796_s25 + $0xc8] sm:$0xff] }
  0x7e   : > { %1941 = vmatprep.mubr.bf16.mxu0 %v9087_v9  ;;  %2091 = vmatprep.subr.bf16.mxu0 %v7656_v10  ;;  %v452_v10 = vld [vmem:[%s8796_s25 + $0xa0] sm:$0xff]  ;;  %v9178_v18 = vpack.c.bf16 %v457_v7, %v450_v1  ;;  %v479_v1 = vld [vmem:[%s8796_s25 + $0x178] sm:$0xff]  ;;  %v486_v7 = vld [vmem:[%s8796_s25 + $0x1b0] sm:$0xff] }
  0x7f   : > { %2054 = vmatprep.mubr.bf16.mxu1 %v9092_v11  ;;  %v9242_v17 = vpack.c.bf16 %v486_v7, %v479_v1  ;;  %v7708_v1 = vld [vmem:[%s11469_s2 + $0x208] ss:$16 sps:$4 sm:$0xff]  }
  0x81   : > { %2092 = vmatpush2.bf16.msra.mxu0 %v7654_v12  ;;  %v459_v12 = vld [vmem:[%s8796_s25 + $0xd8] sm:$0xff] }
  0x82   : > { %2093 = vmatprep.subr.bf16.mxu0 %v7659_v19  ;;  %v9180_v19 = vpack.c.bf16 %v459_v12, %v452_v10  ;;  %v7695_v10 = vld [vmem:[%s11469_s2 + $0x4c] ss:$16 sps:$4 sm:$0xff]  }
  0x83   : > { %v7698_v12 = vld [vmem:[%s11469_s2 + $0x24c] ss:$16 sps:$4 sm:$0xff]  }
  0x84   : > { %1942 = vmatmul.mubr.bf16.gmra.mxu0 %v9110_v26 }
  0x85   : > { %2055 = vmatmul.mubr.bf16.gmra.mxu1 %v9112_v28  ;;  %2094 = vmatpush2.bf16.msra.mxu0 %v7657_v30  ;;  %v7678_v30 = vld [vmem:[%s11469_s2 + $0x2a8] ss:$16 sps:$4 sm:$0xff]  }
  0x86   : > { %2097 = vmatprep.mubr.bf16.mxu0 %v9117_v31  ;;  %2095 = vmatprep.subr.bf16.mxu0 %v7662_v32  ;;  %v7683_v32 = vld [vmem:[%s11469_s2 + $0x8c] ss:$16 sps:$4 sm:$0xff]  }
  0x87   : > { %2210 = vmatprep.mubr.bf16.mxu1 %v11479_v42 }
  0x89   : > { %2096 = vmatpush2.bf16.msra.mxu0 %v7660_v35  ;;  %v7686_v35 = vld [vmem:[%s11469_s2 + $0x28c] ss:$16 sps:$4 sm:$0xff]  }
  0x8a   : > { %2291 = vmatprep.subr.bf16.mxu0 %v7665_v43  ;;  %v471_v43 = vld [vmem:[%s8796_s25 + $0x138] sm:$0xff] }
  0x8c   : > { %2098 = vmatmul.mubr.bf16.vlgmr.msra.gmra.mxu0 %v9142_v55 }
  0x8d   : > { %6980 = vmatmul.mubr.msk.bf16.vlgmr.msra.gmra.mxu1 %vm1814_vm0, %v9144_v57  ;;  %2292 = vmatpush1.bf16.msra.mxu0 %v7663_v46  ;;  %v466_v46 = vld [vmem:[%s8796_s25 + $0x110] sm:$0xff] }
  0x8e   : > { %2405 = vmatpush1.bf16.msra.mxu1 %v7666_v48  ;;  %2293 = vmatprep.subr.bf16.mxu0 %v7671_v60  ;;  %v473_v48 = vld [vmem:[%s8796_s25 + $0x148] sm:$0xff] }
  0x8f   : > { %2406 = vmatprep.subr.bf16.mxu1 %v7674_v61  ;;  %2107 = vmatprep.mubr.bf16.mxu0 %v9157_v63  ;;  %v7687_v60 = vld [vmem:[%s11469_s2 + $0x68] ss:$16 sps:$4 sm:$0xff]  }
  0x90   : > { %2220 = vmatprep.mubr.bf16.mxu1 %v11479_v42  ;;  %v7690_v61 = vld [vmem:[%s11469_s2 + $0x268] ss:$16 sps:$4 sm:$0xff]  }
  0x91   : > { %2294 = vmatpush1.bf16.msra.mxu0 %v7669_v62  ;;  %v9224_v62 = vpack.c.bf16 %v471_v43, %v464_v41  ;;  %v7702_v41 = vld [vmem:[%s11469_s2 + $0x228] ss:$16 sps:$4 sm:$0xff]  }
  0x92   : > { %2407 = vmatpush1.bf16.msra.mxu1 %v7672_v0  ;;  %2295 = vmatprep.subr.bf16.mxu0 %v7677_v13  ;;  %v9226_v0 = vpack.c.bf16 %v473_v48, %v466_v46  ;;  %v7693_v13 = vld [vmem:[%s11469_s2 + $0x48] ss:$16 sps:$4 sm:$0xff]  }
  0x93   : > { %2408 = vmatprep.subr.bf16.mxu1 %v7680_v14  ;;  %v7696_v14 = vld [vmem:[%s11469_s2 + $0x248] ss:$16 sps:$4 sm:$0xff]  }
  0x94   : > { %2108 = vmatmul.mubr.bf16.gmra.mxu0 %v9178_v18  ;;  %v493_v48 = vld [vmem:[%s8796_s25 + $0x1e8] sm:$0xff] }
  0x95   : > { %6981 = vmatmul.mubr.msk.bf16.gmra.mxu1 %vm1814_vm0, %v9180_v19  ;;  %2296 = vmatpush1.bf16.msra.mxu0 %v7675_v22  ;;  %v485_v22 = vld [vmem:[%s8796_s25 + $0x1a8] sm:$0xff] }
  0x96   : > { %2409 = vmatpush1.bf16.msra.mxu1 %v7678_v30  ;;  %2297 = vmatprep.subr.bf16.mxu0 %v7683_v32  ;;  %v480_v30 = vld [vmem:[%s8796_s25 + $0x180] sm:$0xff]  ;;  %v487_v32 = vld [vmem:[%s8796_s25 + $0x1b8] sm:$0xff]  ;;  %v9265_v43 = vpack.c.bf16 %v485_v22, %v478_v20 }
  0x97   : > { %2410 = vmatprep.subr.bf16.mxu1 %v7686_v35  ;;  %2117 = vmatprep.mubr.bf16.mxu0 %v9201_v40  ;;  %v7701_v35 = vld [vmem:[%s11469_s2 + $0x2c] ss:$16 sps:$4 sm:$0xff]   ;;  %v9267_v46 = vpack.c.bf16 %v487_v32, %v480_v30  ;;  %v7711_v30 = vld [vmem:[%s11469_s2 + $0x1e8] ss:$16 sps:$4 sm:$0xff]  }
  0x98   : > { %2230 = vmatprep.mubr.bf16.mxu1 %v11479_v42  ;;  %v7713_v20 = vld [vmem:[%s11469_s2 + $0x1ec] ss:$16 sps:$4 sm:$0xff]   ;;  %v7714_v32 = vld [vmem:[%s11469_s2 + $0x3e8] ss:$16 sps:$4 sm:$0xff]  }
  0x99   : > { %2298 = vmatpush1.bf16.msra.mxu0 %v7681_v37  ;;  %v7704_v37 = vld [vmem:[%s11469_s2 + $0x22c] ss:$16 sps:$4 sm:$0xff]  }
  0x9a   : > { %2411 = vmatpush1.bf16.msra.mxu1 %v7684_v39  ;;  %2299 = vmatprep.subr.bf16.mxu0 %v7689_v58  ;;  %v7699_v39 = vld [vmem:[%s11469_s2 + $0x28] ss:$16 sps:$4 sm:$0xff]   ;;  %v500_v58 = vld [vmem:[%s8796_s25 + $0x220] sm:$0xff]  ;;  %v7716_v22 = vld [vmem:[%s11469_s2 + $0x3ec] ss:$16 sps:$4 sm:$0xff]  }
  0x9b   : > { %2412 = vmatprep.subr.bf16.mxu1 %v7692_v59  ;;  %v7707_v59 = vld [vmem:[%s11469_s2 + $0xc] ss:$16 sps:$4 sm:$0xff]   ;;  %v9283_v7 = vpack.c.bf16 %v500_v58, %v493_v48 }
  0x9c   : > { %2118 = vmatmul.mubr.bf16.gmra.mxu0 %v9224_v62  ;;  %v7719_v48 = vld [vmem:[%s11469_s2 + $0x1cc] ss:$16 sps:$4 sm:$0xff]  }
  0x9d   : > { %6982 = vmatmul.mubr.msk.bf16.gmra.mxu1 %vm1814_vm0, %v9226_v0  ;;  %2300 = vmatpush1.bf16.msra.mxu0 %v7687_v60  ;;  %v7710_v60 = vld [vmem:[%s11469_s2 + $0x20c] ss:$16 sps:$4 sm:$0xff]  }
  0x9e   : > { %2413 = vmatpush1.bf16.msra.mxu1 %v7690_v61  ;;  %2301 = vmatprep.subr.bf16.mxu0 %v7695_v10  ;;  %v7705_v61 = vld [vmem:[%s11469_s2 + $0x8] ss:$16 sps:$4 sm:$0xff]   ;;  %v492_v10 = vld [vmem:[%s8796_s25 + $0x1e0] sm:$0xff]  ;;  %v7722_v58 = vld [vmem:[%s11469_s2 + $0x3cc] ss:$16 sps:$4 sm:$0xff]  }
  0x9f   : > { %2414 = vmatprep.subr.bf16.mxu1 %v7698_v12  ;;  %2127 = vmatprep.mubr.bf16.mxu0 %v9242_v17  ;;  %v499_v12 = vld [vmem:[%s8796_s25 + $0x218] sm:$0xff] }
  0xa0   : > { %2240 = vmatprep.mubr.bf16.mxu1 %v11479_v42 }
  0xa1   : > { %2302 = vmatpush1.bf16.msra.mxu0 %v7693_v13  ;;  %v494_v13 = vld [vmem:[%s8796_s25 + $0x1f0] sm:$0xff] }
  0xa2   : > { %2415 = vmatpush1.bf16.msra.mxu1 %v7696_v14  ;;  %2303 = vmatprep.subr.bf16.mxu0 %v7701_v35  ;;  %v501_v14 = vld [vmem:[%s8796_s25 + $0x228] sm:$0xff]  ;;  %v9306_v35 = vpack.c.bf16 %v499_v12, %v492_v10  ;;  %v508_v12 = vld [vmem:[%s8796_s25 + $0x260] sm:$0xff] }
  0xa3   : > { %2416 = vmatprep.subr.bf16.mxu1 %v7704_v37  ;;  %v9308_v37 = vpack.c.bf16 %v501_v14, %v494_v13  ;;  %v513_v10 = vld [vmem:[%s8796_s25 + $0x288] sm:$0xff]  ;;  %v515_v13 = vld [vmem:[%s8796_s25 + $0x298] sm:$0xff] }
  0xa4   : > { %2128 = vmatmul.mubr.bf16.gmra.mxu0 %v9265_v43  ;;  %v7725_v14 = vld [vmem:[%s11469_s2 + $0x1ac] ss:$16 sps:$4 sm:$0xff]  }
  0xa5   : > { %6983 = vmatmul.mubr.msk.bf16.gmra.mxu1 %vm1814_vm0, %v9267_v46  ;;  %2304 = vmatpush1.bf16.msra.mxu0 %v7699_v39  ;;  %11501 = vst [vmem:[#allocation2_spill] sm:$0xff] %v9308_v37  ;;  %v507_v39 = vld [vmem:[%s8796_s25 + $0x258] sm:$0xff] }
  0xa6   : > { %2417 = vmatpush1.bf16.msra.mxu1 %v7702_v41  ;;  %2305 = vmatprep.subr.bf16.mxu0 %v7707_v59  ;;  %v514_v41 = vld [vmem:[%s8796_s25 + $0x290] sm:$0xff]  ;;  %v7717_v59 = vld [vmem:[%s11469_s2 + $0x1c8] ss:$16 sps:$4 sm:$0xff]  }
  0xa7   : > { %2418 = vmatprep.subr.bf16.mxu1 %v7710_v60  ;;  %2137 = vmatprep.mubr.bf16.mxu0 %v9283_v7  ;;  %v7720_v60 = vld [vmem:[%s11469_s2 + $0x3c8] ss:$16 sps:$4 sm:$0xff]  }
  0xa8   : > { %2250 = vmatprep.mubr.bf16.mxu1 %v11479_v42 }
  0xa9   : > { %2306 = vmatpush1.bf16.msra.mxu0 %v7705_v61  ;;  %v9324_v61 = vpack.c.bf16 %v514_v41, %v507_v39  ;;  %v9349_v39 = vpack.c.bf16 %v515_v13, %v508_v12  ;;  %v7731_v41 = vld [vmem:[%s11469_s2 + $0x18c] ss:$16 sps:$4 sm:$0xff]   ;;  %v522_v13 = vld [vmem:[%s8796_s25 + $0x2d0] sm:$0xff] }
  0xaa   : > { %2419 = vmatpush1.bf16.msra.mxu1 %v7708_v1  ;;  %2307 = vmatprep.subr.bf16.mxu0 %v7713_v20  ;;  %v506_v1 = vld [vmem:[%s8796_s25 + $0x250] sm:$0xff]  ;;  %v7728_v20 = vld [vmem:[%s11469_s2 + $0x3ac] ss:$16 sps:$4 sm:$0xff]  }
  0xab   : > { %2420 = vmatprep.subr.bf16.mxu1 %v7716_v22  ;;  %11502 = vst [vmem:[#allocation3_spill] sm:$0xff] %v9324_v61  ;;  %v7723_v22 = vld [vmem:[%s11469_s2 + $0x1a8] ss:$16 sps:$4 sm:$0xff]   ;;  %11504 = vst [vmem:[#allocation5_spill] sm:$0xff] %v9349_v39 }
  0xac   : > { %2138 = vmatmul.mubr.bf16.gmra.mxu0 %v9306_v35 }
  0xad   : > { %6984 = vmatmul.mubr.msk.bf16.gmra.mxu1 %vm1814_vm0, %v9308_v37  ;;  %2308 = vmatpush2.bf16.msra.mxu0 %v7711_v30  ;;  %v7726_v30 = vld [vmem:[%s11469_s2 + $0x3a8] ss:$16 sps:$4 sm:$0xff]  }
  0xae   : > { %2421 = vmatpush2.bf16.msra.mxu1 %v7714_v32  ;;  %2309 = vmatprep.subr.bf16.mxu0 %v7719_v48  ;;  %v9347_v32 = vpack.c.bf16 %v513_v10, %v506_v1  ;;  %v521_v48 = vld [vmem:[%s8796_s25 + $0x2c8] sm:$0xff] }
  0xaf   : > { %2422 = vmatprep.subr.bf16.mxu1 %v7722_v58  ;;  %2147 = vmatprep.mubr.bf16.mxu0 %v9324_v61  ;;  %v528_v58 = vld [vmem:[%s8796_s25 + $0x300] sm:$0xff]  ;;  %v7729_v1 = vld [vmem:[%s11469_s2 + $0x188] ss:$16 sps:$4 sm:$0xff]  }
  0xb0   : > { %2260 = vmatprep.mubr.bf16.mxu1 %v11479_v42  ;;  %11503 = vst [vmem:[#allocation4_spill] sm:$0xff] %v9347_v32  ;;  %v7734_v42 = vld [vmem:[%s11469_s2 + $0x38c] ss:$16 sps:$4 sm:$0xff]   ;;  %v7732_v10 = vld [vmem:[%s11469_s2 + $0x388] ss:$16 sps:$4 sm:$0xff]   ;;  %v9365_v12 = vpack.c.bf16 %v528_v58, %v521_v48  ;;  %v542_v58 = vld [vmem:[%s8796_s25 + $0x370] sm:$0xff] }
  0xb1   : > { %2310 = vmatpush2.bf16.msra.mxu0 %v7717_v59  ;;  %v520_v59 = vld [vmem:[%s8796_s25 + $0x2c0] sm:$0xff]  ;;  %v529_v61 = vld [vmem:[%s8796_s25 + $0x308] sm:$0xff]  ;;  %v535_v48 = vld [vmem:[%s8796_s25 + $0x338] sm:$0xff] }
  0xb2   : > { %2423 = vmatpush2.bf16.msra.mxu1 %v7720_v60  ;;  %2311 = vmatprep.subr.bf16.mxu0 %v7725_v14  ;;  %11505 = vst [vmem:[#allocation6_spill] sm:$0xff] %v9365_v12  ;;  %v527_v60 = vld [vmem:[%s8796_s25 + $0x2f8] sm:$0xff] }
  0xb3   : > { %2424 = vmatprep.subr.bf16.mxu1 %v7728_v20  ;;  %v7737_v14 = vld [vmem:[%s11469_s2 + $0x16c] ss:$16 sps:$4 sm:$0xff]   ;;  %v7741_v37 = vld [vmem:[%s11469_s2 + $0x148] ss:$16 sps:$4 sm:$0xff]  }
  0xb4   : > { %2148 = vmatmul.mubr.bf16.gmra.mxu0 %v9347_v32  ;;  %v7740_v20 = vld [vmem:[%s11469_s2 + $0x36c] ss:$16 sps:$4 sm:$0xff]   ;;  %v11506_v32 = vmov 0  }
  0xb5   : > { %6985 = vmatmul.mubr.msk.bf16.gmra.mxu1 %vm1814_vm0, %v9349_v39  ;;  %2312 = vmatpush2.bf16.msra.mxu0 %v7723_v22  ;;  %v7735_v39 = vld [vmem:[%s11469_s2 + $0x168] ss:$16 sps:$4 sm:$0xff]  }
  0xb6   : > { %2425 = vmatpush2.bf16.msra.mxu1 %v7726_v30  ;;  %2313 = vmatprep.subr.bf16.mxu0 %v7731_v41  ;;  %v7738_v22 = vld [vmem:[%s11469_s2 + $0x368] ss:$16 sps:$4 sm:$0xff]   ;;  %v9390_v30 = vpack.c.bf16 %v527_v60, %v520_v59  ;;  %v7743_v41 = vld [vmem:[%s11469_s2 + $0x14c] ss:$16 sps:$4 sm:$0xff]   ;;  %v9406_v59 = vpack.c.bf16 %v542_v58, %v535_v48  ;;  %v534_v60 = vld [vmem:[%s8796_s25 + $0x330] sm:$0xff] }
  0xb7   : > { %2426 = vmatprep.subr.bf16.mxu1 %v7734_v42  ;;  %2157 = vmatprep.mubr.bf16.mxu0 %v9365_v12  ;;  %v9392_v42 = vpack.c.bf16 %v529_v61, %v522_v13  ;;  %v7746_v12 = vld [vmem:[%s11469_s2 + $0x34c] ss:$16 sps:$4 sm:$0xff]   ;;  %v7744_v61 = vld [vmem:[%s11469_s2 + $0x348] ss:$16 sps:$4 sm:$0xff]  }
  0xb8   : > { %2270 = vmatprep.mubr.bf16.mxu1 %v11506_v32  ;;  %11507 = vst [vmem:[#allocation7_spill] sm:$0xff] %v9406_v59  ;;  %v541_v13 = vld [vmem:[%s8796_s25 + $0x368] sm:$0xff] }
  0xb9   : > { %2314 = vmatpush2.bf16.msra.mxu0 %v7729_v1  ;;  %v536_v1 = vld [vmem:[%s8796_s25 + $0x340] sm:$0xff]  ;;  %v7747_v48 = vld [vmem:[%s11469_s2 + $0x128] ss:$16 sps:$4 sm:$0xff]  }
  0xba   : > { %2427 = vmatpush2.bf16.msra.mxu1 %v7732_v10  ;;  %2315 = vmatprep.subr.bf16.mxu0 %v7737_v14  ;;  %v543_v10 = vld [vmem:[%s8796_s25 + $0x378] sm:$0xff] }
  0xbb   : > { %2428 = vmatprep.subr.bf16.mxu1 %v7740_v20  ;;  %v7749_v14 = vld [vmem:[%s11469_s2 + $0x12c] ss:$16 sps:$4 sm:$0xff]   ;;  %v7750_v58 = vld [vmem:[%s11469_s2 + $0x328] ss:$16 sps:$4 sm:$0xff]  }
  0xbc   : > { %2158 = vmatmul.mubr.bf16.gmra.mxu0 %v9390_v30  ;;  %v7752_v20 = vld [vmem:[%s11469_s2 + $0x32c] ss:$16 sps:$4 sm:$0xff]  }
  0xbd   : > { %6986 = vmatmul.mubr.msk.bf16.gmra.mxu1 %vm1814_vm0, %v9392_v42  ;;  %2316 = vmatpush2.bf16.msra.mxu0 %v7735_v39  ;;  %v9429_v39 = vpack.c.bf16 %v541_v13, %v534_v60  ;;  %v7756_v60 = vld [vmem:[%s11469_s2 + $0x308] ss:$16 sps:$4 sm:$0xff]  }
  0xbe   : > { %2429 = vmatpush2.bf16.msra.mxu1 %v7738_v22  ;;  %2317 = vmatprep.subr.bf16.mxu0 %v7743_v41  ;;  %v9431_v22 = vpack.c.bf16 %v543_v10, %v536_v1  ;;  %v7758_v41 = vld [vmem:[%s11469_s2 + $0x30c] ss:$16 sps:$4 sm:$0xff]   ;;  %v7759_v13 = vld [vmem:[%s11469_s2 + $0x4e8] ss:$16 sps:$4 sm:$0xff]  }
  0xbf   : > { %2430 = vmatprep.subr.bf16.mxu1 %v7746_v12  ;;  %2167 = vmatprep.mubr.bf16.mxu0 %v9406_v59  ;;  %v7755_v12 = vld [vmem:[%s11469_s2 + $0x10c] ss:$16 sps:$4 sm:$0xff]   ;;  %v7753_v59 = vld [vmem:[%s11469_s2 + $0x108] ss:$16 sps:$4 sm:$0xff]  }
  0xc0   : > { %2280 = vmatprep.mubr.bf16.mxu1 %v11506_v32  ;;  %v7762_v1 = vld [vmem:[%s11469_s2 + $0x608] ss:$16 sps:$4 sm:$0xff]   ;;  %v7767_v10 = vld [vmem:[%s11469_s2 + $0x4cc] ss:$16 sps:$4 sm:$0xff]  }
  0xc1   : > { %2318 = vmatpush2.bf16.msra.mxu0 %v7741_v37  ;;  %v7761_v37 = vld [vmem:[%s11469_s2 + $0x4ec] ss:$16 sps:$4 sm:$0xff]  }
  0xc2   : > { %2431 = vmatpush2.bf16.msra.mxu1 %v7744_v61  ;;  %2319 = vmatprep.subr.bf16.mxu0 %v7749_v14  ;;  %v7764_v61 = vld [vmem:[%s11469_s2 + $0x60c] ss:$16 sps:$4 sm:$0xff]   ;;  %v7795_v14 = vld [vmem:[%s11469_s2 + $0x588] ss:$16 sps:$4 sm:$0xff]  }
  0xc3   : > { %2432 = vmatprep.subr.bf16.mxu1 %v7752_v20  ;;  %v7798_v20 = vld [vmem:[%s11469_s2 + $0x568] ss:$16 sps:$4 sm:$0xff]  }
  0xc4   : > { %2168 = vmatmul.mubr.bf16.gmra.mxu0 %v9429_v39 }
  0xc5   : > { %6987 = vmatmul.mubr.msk.bf16.gmra.mxu1 %vm1814_vm0, %v9431_v22  ;;  %2320 = vmatpush2.bf16.msra.mxu0 %v7747_v48  ;;  %v7806_v48 = vld [vmem:[%s11469_s2 + $0x52c] ss:$16 sps:$4 sm:$0xff]  }
  0xc6   : > { %2433 = vmatpush2.bf16.msra.mxu1 %v7750_v58  ;;  %2321 = vmatprep.subr.bf16.mxu0 %v7755_v12  ;;  %v7804_v58 = vld [vmem:[%s11469_s2 + $0x528] ss:$16 sps:$4 sm:$0xff]  }
  0xc7   : > { %2434 = vmatprep.subr.bf16.mxu1 %v7758_v41  ;;  %2323 = vmatprep.mubr.bf16.mxu0 %v8817_v53  ;;  %v7765_v53 = vld [vmem:[%s11469_s2 + $0x4c8] ss:$16 sps:$4 sm:$0xff]  }
  0xc8   : > { %2436 = vmatprep.mubr.bf16.mxu1 %v8819_v54  ;;  %v7770_v54 = vld [vmem:[%s11469_s2 + $0x4ac] ss:$16 sps:$4 sm:$0xff]  }
  0xc9   : > { %2322 = vmatpush2.bf16.msra.mxu0 %v7753_v59  ;;  %v7768_v59 = vld [vmem:[%s11469_s2 + $0x4a8] ss:$16 sps:$4 sm:$0xff]  }
  0xca   : > { %2435 = vmatpush2.bf16.msra.mxu1 %v7756_v60  ;;  %2517 = vmatprep.subr.bf16.mxu0 %v7761_v37 }
  0xcb   : > { %2644 = vmatprep.subr.bf16.mxu1 %v7764_v61 }
  0xcc   : > { %2324 = vmatmul.mubr.bf16.vlgmr.msra.gmra.mxu0 %v8883_v15  ;;  %v7773_v15 = vld [vmem:[%s11469_s2 + $0x48c] ss:$16 sps:$4 sm:$0xff]  }
  0xcd   : > { %2437 = vmatmul.mubr.bf16.vlgmr.msra.gmra.mxu1 %v8885_v16  ;;  %2518 = vmatpush1.bf16.msra.mxu0 %v7759_v13  ;;  %v7771_v16 = vld [vmem:[%s11469_s2 + $0x488] ss:$16 sps:$4 sm:$0xff]  }
  0xce   : > { %2645 = vmatpush1.bf16.msra.mxu1 %v7762_v1  ;;  %2519 = vmatprep.subr.bf16.mxu0 %v7767_v10  ;;  %v7813_v1 = vld [vmem:[%s11471_s4 + $0x30] sm:$0xff]  }
  0xcf   : > { %2333 = vmatprep.mubr.bf16.mxu0 %v8895_v21  ;;  %2446 = vmatprep.mubr.bf16.mxu1 %v8900_v23  ;;  %v7776_v21 = vld [vmem:[%s11469_s2 + $0x46c] ss:$16 sps:$4 sm:$0xff]   ;;  %v7774_v23 = vld [vmem:[%s11469_s2 + $0x468] ss:$16 sps:$4 sm:$0xff]  }
  0xd0   : > { %3167 = vmatprep.subr.bf16.mxu1 %v11506_v32 }
  0xd1   : > { %2520 = vmatpush1.bf16.msra.mxu0 %v7765_v53 }
  0xd2   : > { %2521 = vmatprep.subr.bf16.mxu0 %v7770_v54 }
  0xd4   : > { %2334 = vmatmul.mubr.bf16.gmra.mxu0 %v8917_v33  ;;  %v7779_v33 = vld [vmem:[%s11469_s2 + $0x44c] ss:$16 sps:$4 sm:$0xff]  }
  0xd5   : > { %2447 = vmatmul.mubr.bf16.gmra.mxu1 %v8919_v34  ;;  %2522 = vmatpush1.bf16.msra.mxu0 %v7768_v59  ;;  %v7777_v34 = vld [vmem:[%s11469_s2 + $0x448] ss:$16 sps:$4 sm:$0xff]  }
  0xd6   : > { %2343 = vmatprep.mubr.bf16.mxu0 %v8924_v36  ;;  %2523 = vmatprep.subr.bf16.mxu0 %v7773_v15  ;;  %v7782_v36 = vld [vmem:[%s11469_s2 + $0x42c] ss:$16 sps:$4 sm:$0xff]  }
  0xd7   : > { %2456 = vmatprep.mubr.bf16.mxu1 %v8929_v38  ;;  %v7780_v38 = vld [vmem:[%s11469_s2 + $0x428] ss:$16 sps:$4 sm:$0xff]  }
  0xd9   : > { %2524 = vmatpush1.bf16.msra.mxu0 %v7771_v16  ;;  %v7815_v16 = vld [vmem:[%s11471_s4 + $0x28] sm:$0xff]  }
  0xda   : > { %2525 = vmatprep.subr.bf16.mxu0 %v7776_v21  ;;  %v7816_v21 = vld [vmem:[%s11471_s4 + $0x60] sm:$0xff]  }
  0xdc   : > { %2344 = vmatmul.mubr.bf16.gmra.mxu0 %v8949_v49  ;;  %v7785_v49 = vld [vmem:[%s11469_s2 + $0x40c] ss:$16 sps:$4 sm:$0xff]  }
  0xdd   : > { %2457 = vmatmul.mubr.bf16.gmra.mxu1 %v8951_v50  ;;  %2526 = vmatpush1.bf16.msra.mxu0 %v7774_v23  ;;  %v7783_v50 = vld [vmem:[%s11469_s2 + $0x408] ss:$16 sps:$4 sm:$0xff]  }
  0xde   : > { %2353 = vmatprep.mubr.bf16.mxu0 %v8956_v52  ;;  %2527 = vmatprep.subr.bf16.mxu0 %v7779_v33  ;;  %v7788_v52 = vld [vmem:[%s11469_s2 + $0x5ec] ss:$16 sps:$4 sm:$0xff]  }
  0xdf   : > { %2466 = vmatprep.mubr.bf16.mxu1 %v8961_v56  ;;  %v7786_v56 = vld [vmem:[%s11469_s2 + $0x5e8] ss:$16 sps:$4 sm:$0xff]  }
  0xe1   : > { %2528 = vmatpush1.bf16.msra.mxu0 %v7777_v34 }
  0xe2   : > { %2529 = vmatprep.subr.bf16.mxu0 %v7782_v36 }
  0xe4   : > { %2354 = vmatmul.mubr.bf16.gmra.mxu0 %v8981_v3  ;;  %v7791_v3 = vld [vmem:[%s11469_s2 + $0x5cc] ss:$16 sps:$4 sm:$0xff]  }
  0xe5   : > { %2467 = vmatmul.mubr.bf16.gmra.mxu1 %v8983_v4  ;;  %2530 = vmatpush1.bf16.msra.mxu0 %v7780_v38  ;;  %v7789_v4 = vld [vmem:[%s11469_s2 + $0x5c8] ss:$16 sps:$4 sm:$0xff]  }
  0xe6   : > { %2363 = vmatprep.mubr.bf16.mxu0 %v8988_v6  ;;  %2531 = vmatprep.subr.bf16.mxu0 %v7785_v49  ;;  %v7794_v6 = vld [vmem:[%s11469_s2 + $0x5ac] ss:$16 sps:$4 sm:$0xff]   ;;  %v7817_v49 = vld [vmem:[%s11471_s4 + $0x20] sm:$0xff]  }
  0xe7   : > { %2476 = vmatprep.mubr.bf16.mxu1 %v8993_v8  ;;  %v7792_v8 = vld [vmem:[%s11469_s2 + $0x5a8] ss:$16 sps:$4 sm:$0xff]  }
  0xe9   : > { %2532 = vmatpush1.bf16.msra.mxu0 %v7783_v50 }
  0xea   : > { %2533 = vmatprep.subr.bf16.mxu0 %v7788_v52 }
  0xec   : > { %2364 = vmatmul.mubr.bf16.gmra.mxu0 %v9016_v24  ;;  %v7797_v24 = vld [vmem:[%s11469_s2 + $0x58c] ss:$16 sps:$4 sm:$0xff]  }
  0xed   : > { %2477 = vmatmul.mubr.bf16.gmra.mxu1 %v9018_v25  ;;  %2534 = vmatpush2.bf16.msra.mxu0 %v7786_v56  ;;  %v814_v25 = vlaneseq }
  0xee   : > { %2373 = vmatprep.mubr.bf16.mxu0 %v9023_v27  ;;  %2535 = vmatprep.subr.bf16.mxu0 %v7791_v3  ;;  %v7800_v27 = vld [vmem:[%s11469_s2 + $0x56c] ss:$16 sps:$4 sm:$0xff]  }
  0xef   : > { %2486 = vmatprep.mubr.bf16.mxu1 %v9028_v29  ;;  %v9556_v29 = vshrl.u32 %v814_v25, 7 }
  0xf1   : > { %2536 = vmatpush2.bf16.msra.mxu0 %v7789_v4  ;;  %11508 = vst [vmem:[#allocation8_spill] sm:$0xff] %v9556_v29 }
  0xf2   : > { %2537 = vmatprep.subr.bf16.mxu0 %v7794_v6  ;;  %v7819_v6 = vld [vmem:[%s11471_s4 + $0x18] sm:$0xff]  }
  0xf4   : > { %2374 = vmatmul.mubr.bf16.gmra.mxu0 %v9048_v44  ;;  %v7803_v44 = vld [vmem:[%s11469_s2 + $0x54c] ss:$16 sps:$4 sm:$0xff]  }
  0xf5   : > { %2487 = vmatmul.mubr.bf16.gmra.mxu1 %v9050_v45  ;;  %2538 = vmatpush2.bf16.msra.mxu0 %v7792_v8  ;;  %v9565_v45 = vsub.s32 0, %v9556_v29  ;;  %v7820_v8 = vld [vmem:[%s11471_s4 + $0x50] sm:$0xff]  }
  0xf6   : > { %2383 = vmatprep.mubr.bf16.mxu0 %v9055_v47  ;;  %2539 = vmatprep.subr.bf16.mxu0 %v7797_v24  ;;  %v9568_v47 = vsub.s32 1, %v9556_v29 }
  0xf7   : > { %2496 = vmatprep.mubr.bf16.mxu1 %v9060_v51  ;;  %11509 = vst [vmem:[#allocation9_spill] sm:$0xff] %v9565_v45  ;;  %v7801_v51 = vld [vmem:[%s11469_s2 + $0x548] ss:$16 sps:$4 sm:$0xff]  }
  0xf8   : > { %11510 = vst [vmem:[#allocation10_spill] sm:$0xff] %v9568_v47 }
  0xf9   : > { %2540 = vmatpush2.bf16.msra.mxu0 %v7795_v14 }
  0xfa   : > { %2541 = vmatprep.subr.bf16.mxu0 %v7800_v27 }
  0xfc   : > { %2384 = vmatmul.mubr.bf16.gmra.mxu0 %v9080_v2  ;;  %v7809_v2 = vld [vmem:[%s11469_s2 + $0x50c] ss:$16 sps:$4 sm:$0xff]  }
  0xfd   : > { %2497 = vmatmul.mubr.bf16.gmra.mxu1 %v9082_v5  ;;  %2542 = vmatpush2.bf16.msra.mxu0 %v7798_v20  ;;  %v7807_v5 = vld [vmem:[%s11469_s2 + $0x508] ss:$16 sps:$4 sm:$0xff]  }
  0xfe   : > { %2393 = vmatprep.mubr.bf16.mxu0 %v9087_v9  ;;  %2543 = vmatprep.subr.bf16.mxu0 %v7803_v44  ;;  %v9594_v9 = vld [vmem:[%s11470_s3] sm:$0xf]  ;;  %v7821_v44 = vld [vmem:[%s11471_s4 + $0x10] sm:$0xff]  }
  0xff   : > { %2506 = vmatprep.mubr.bf16.mxu1 %v9092_v11  ;;  %11511 = vst [vmem:[#allocation11_spill] sm:$0xff] %v9594_v9  ;;  %v7810_v11 = vld [vmem:[%s11471_s4 + $0x78] sm:$0xff]   ;;  %v9610_v12 = vrot.slane %v9594_v9, %v9568_v47 }
 0x101   : > { %2544 = vmatpush2.bf16.msra.mxu0 %v7801_v51 }
 0x102   : > { %2545 = vmatprep.subr.bf16.mxu0 %v7806_v48 }
 0x104   : > { %2394 = vmatmul.mubr.bf16.gmra.mxu0 %v9110_v26  ;;  %v9603_v26 = vrot.slane %v9594_v9, %v9565_v45 }
 0x105   : > { %2507 = vmatmul.mubr.bf16.gmra.mxu1 %v9112_v28  ;;  %2546 = vmatpush2.bf16.msra.mxu0 %v7804_v58  ;;  %v7811_v28 = vld [vmem:[%s11471_s4 + $0x38] sm:$0xff]  }
 0x106   : > { %2549 = vmatprep.mubr.bf16.mxu0 %v9117_v31  ;;  %2547 = vmatprep.subr.bf16.mxu0 %v7809_v2  ;;  %v7812_v31 = vld [vmem:[%s11471_s4 + $0x70] sm:$0xff]  }
 0x107   : > { %2662 = vmatprep.mubr.bf16.mxu1 %v11506_v32 }
 0x109   : > { %2548 = vmatpush2.bf16.msra.mxu0 %v7807_v5 }
 0x10a   : > { %7377 = vmatprep.subr.bf16.mxu0 %v7810_v11 }
 0x10c   : > { %v1873_v41 = vpop.f32.mrf.mxu0  ;;  %2550 = vmatmul.mubr.bf16.vlgmr.msra.gmra.mxu0 %v9142_v55 }
 0x10d   : > { %v1986_v60 = vpop.f32.mrf.mxu1  ;;  %6988 = vmatmul.mubr.msk.bf16.vlgmr.msra.gmra.mxu1 %vm1814_vm0, %v9144_v57  ;;  %v1874_v37 = vadd.f32 %v1873_v41, %v9603_v26  ;;  %2559 = vmatprep.mubr.bf16.mxu0 %v9157_v63  ;;  %v7814_v57 = vld [vmem:[%s11471_s4 + $0x68] sm:$0xff]  }
 0x10e   : > { %2672 = vmatprep.mubr.bf16.mxu1 %v11506_v32  ;;  %v1875_v61 = vpop.f32.mrf.mxu0  ;;  %7378 = vmatpush3.bf16.msra.mxu0 %v7811_v28  ;;  %v7823_v28 = vld [vmem:[%s11471_s4 + $0x8] sm:$0xff]  }
 0x10f   : > { %v1988_v13 = vpop.f32.mrf.mxu1  ;;  %v9624_v10 = vadd.f32 %v1986_v60, %v1874_v37  ;;  %v1876_v55 = vadd.f32 %v1875_v61, %v9610_v12  ;;  %7379 = vmatprep.subr.bf16.mxu0 %v7812_v31  ;;  %v7824_v31 = vld [vmem:[%s11471_s4 + $0x40] sm:$0xff]  }
 0x110   : > { %v9630_v53 = vpop.f32.mrf.mxu0 }
 0x111   : > { %v9632_v63 = vpop.f32.mrf.mxu1  ;;  %v9634_v54 = vadd.f32 %v1988_v13, %v1876_v55 }
 0x112   : > { %v9636_v59 = vpop.f32.mrf.mxu0  ;;  %7380 = vmatpush3.bf16.msra.mxu0 %v7813_v1  ;;  %v7825_v1 = vld [vmem:[%s11471_s4] sm:$0xff]  }
 0x113   : > { %v9638_v15 = vpop.f32.mrf.mxu1  ;;  %7381 = vmatprep.subr.bf16.mxu0 %v7814_v57 }
 0x114   : > { %v1883_v23 = vpop.f32.mrf.mxu0  ;;  %2560 = vmatmul.mubr.bf16.gmra.mxu0 %v9178_v18 }
 0x115   : > { %v1996_v33 = vpop.f32.mrf.mxu1  ;;  %6989 = vmatmul.mubr.msk.bf16.gmra.mxu1 %vm1814_vm0, %v9180_v19  ;;  %v1884_v34 = vadd.f32 %v1883_v23, %v9603_v26  ;;  %2569 = vmatprep.mubr.bf16.mxu0 %v9201_v40  ;;  %v7818_v19 = vld [vmem:[%s11471_s4 + $0x58] sm:$0xff]  }
 0x116   : > { %2682 = vmatprep.mubr.bf16.mxu1 %v11506_v32  ;;  %v1885_v36 = vpop.f32.mrf.mxu0  ;;  %7382 = vmatpush3.bf16.msra.mxu0 %v7815_v16 }
 0x117   : > { %v1998_v38 = vpop.f32.mrf.mxu1  ;;  %v9655_v50 = vadd.f32 %v1996_v33, %v1884_v34  ;;  %v1886_v18 = vadd.f32 %v1885_v36, %v9610_v12  ;;  %7383 = vmatprep.subr.bf16.mxu0 %v7816_v21  ;;  %v11512_v36 = vld [vmem:[#allocation2_spill] sm:$0xff] }
 0x118   : > { %v9661_v52 = vpop.f32.mrf.mxu0 }
 0x119   : > { %v9663_v40 = vpop.f32.mrf.mxu1  ;;  %v9665_v56 = vadd.f32 %v1998_v38, %v1886_v18 }
 0x11a   : > { %v9667_v3 = vpop.f32.mrf.mxu0  ;;  %7384 = vmatpush3.bf16.msra.mxu0 %v7817_v49  ;;  %v11513_v49 = vld [vmem:[#allocation3_spill] sm:$0xff] }
 0x11b   : > { %v9669_v4 = vpop.f32.mrf.mxu1  ;;  %7385 = vmatprep.subr.bf16.mxu0 %v7818_v19 }
 0x11c   : > { %v1893_v24 = vpop.f32.mrf.mxu0  ;;  %2570 = vmatmul.mubr.bf16.gmra.mxu0 %v9224_v62 }
 0x11d   : > { %v2006_v25 = vpop.f32.mrf.mxu1  ;;  %6990 = vmatmul.mubr.msk.bf16.gmra.mxu1 %vm1814_vm0, %v9226_v0  ;;  %v1894_v14 = vadd.f32 %v1893_v24, %v9603_v26  ;;  %2579 = vmatprep.mubr.bf16.mxu0 %v9242_v17  ;;  %v7822_v0 = vld [vmem:[%s11471_s4 + $0x48] sm:$0xff]   ;;  %v7826_v17 = vld [vmem:[%s11471_s4 + $0xb8] sm:$0xff]  }
 0x11e   : > { %2692 = vmatprep.mubr.bf16.mxu1 %v11506_v32  ;;  %v1895_v27 = vpop.f32.mrf.mxu0  ;;  %7386 = vmatpush3.bf16.msra.mxu0 %v7819_v6  ;;  %v7828_v24 = vld [vmem:[%s11471_s4 + $0xa8] sm:$0xff]  }
 0x11f   : > { %v2008_v20 = vpop.f32.mrf.mxu1  ;;  %v9686_v51 = vadd.f32 %v2006_v25, %v1894_v14  ;;  %v1896_v62 = vadd.f32 %v1895_v27, %v9610_v12  ;;  %7387 = vmatprep.subr.bf16.mxu0 %v7820_v8  ;;  %3168 = vmatpush1.bf16.msra.mxu1 %v7826_v17  ;;  %v11515_v17 = vld [vmem:[#allocation5_spill] sm:$0xff] }
 0x120   : > { %v9695_v48 = vpop.f32.mrf.mxu0  ;;  %3169 = vmatprep.subr.bf16.mxu1 %v11506_v32 }
 0x121   : > { %v9697_v58 = vpop.f32.mrf.mxu1  ;;  %v9699_v2 = vadd.f32 %v2008_v20, %v1896_v62 }
 0x122   : > { %v9701_v5 = vpop.f32.mrf.mxu0  ;;  %7388 = vmatpush3.bf16.msra.mxu0 %v7821_v44 }
 0x123   : > { %v9703_v11 = vpop.f32.mrf.mxu1  ;;  %7389 = vmatprep.subr.bf16.mxu0 %v7822_v0  ;;  %v11514_v0 = vld [vmem:[#allocation4_spill] sm:$0xff] }
 0x124   : > { %v1903_v41 = vpop.f32.mrf.mxu0  ;;  %2580 = vmatmul.mubr.bf16.gmra.mxu0 %v9265_v43 }
 0x125   : > { %v2016_v60 = vpop.f32.mrf.mxu1  ;;  %6991 = vmatmul.mubr.msk.bf16.gmra.mxu1 %vm1814_vm0, %v9267_v46  ;;  %v1904_v37 = vadd.f32 %v1903_v41, %v9603_v26  ;;  %2589 = vmatprep.mubr.bf16.mxu0 %v9283_v7  ;;  %v7827_v46 = vld [vmem:[%s11471_s4 + $0xb0] sm:$0xff]   ;;  %v7829_v41 = vld [vmem:[%s11471_s4 + $0xa0] sm:$0xff]  }
 0x126   : > { %2702 = vmatprep.mubr.bf16.mxu1 %v11506_v32  ;;  %v1905_v61 = vpop.f32.mrf.mxu0  ;;  %7390 = vmatpush3.bf16.msra.mxu0 %v7823_v28 }
 0x127   : > { %v2018_v13 = vpop.f32.mrf.mxu1  ;;  %v9721_v55 = vadd.f32 %v2016_v60, %v1904_v37  ;;  %v1906_v43 = vadd.f32 %v1905_v61, %v9610_v12  ;;  %7391 = vmatprep.subr.bf16.mxu0 %v7824_v31  ;;  %3170 = vmatpush1.bf16.msra.mxu1 %v7827_v46  ;;  %v11516_v31 = vld [vmem:[#allocation6_spill] sm:$0xff] }
 0x128   : > { %v9727_v57 = vpop.f32.mrf.mxu0  ;;  %3171 = vmatprep.subr.bf16.mxu1 %v11506_v32 }
 0x129   : > { %v9729_v7 = vpop.f32.mrf.mxu1  ;;  %v9731_v16 = vadd.f32 %v2018_v13, %v1906_v43 }
 0x12a   : > { %v9733_v21 = vpop.f32.mrf.mxu0  ;;  %7392 = vmatpush3.bf16.msra.mxu0 %v7825_v1 }
 0x12b   : > { %v9735_v23 = vpop.f32.mrf.mxu1  ;;  %3172 = vmatpush1.bf16.msra.mxu1 %v7828_v24 }
 0x12c   : > { %v1913_v33 = vpop.f32.mrf.mxu0  ;;  %2590 = vmatmul.mubr.bf16.gmra.mxu0 %v9306_v35  ;;  %3173 = vmatprep.subr.bf16.mxu1 %v11506_v32 }
 0x12d   : > { %v2026_v34 = vpop.f32.mrf.mxu1  ;;  %6992 = vmatmul.mubr.msk.bf16.gmra.mxu1 %vm1814_vm0, %v11512_v36  ;;  %v1914_v38 = vadd.f32 %v1913_v33, %v9603_v26  ;;  %2599 = vmatprep.mubr.bf16.mxu0 %v11513_v49 }
 0x12e   : > { %2712 = vmatprep.mubr.bf16.mxu1 %v11506_v32  ;;  %v1915_v18 = vpop.f32.mrf.mxu0 }
 0x12f   : > { %v2028_v19 = vpop.f32.mrf.mxu1  ;;  %v9744_v6 = vadd.f32 %v2026_v34, %v1914_v38  ;;  %v1916_v8 = vadd.f32 %v1915_v18, %v9610_v12  ;;  %3174 = vmatpush1.bf16.msra.mxu1 %v7829_v41  ;;  %v11517_v18 = vld [vmem:[#allocation7_spill] sm:$0xff] }
 0x130   : > { %v9750_v35 = vpop.f32.mrf.mxu0  ;;  %3175 = vmatprep.subr.bf16.mxu1 %v11506_v32 }
 0x131   : > { %v9752_v25 = vpop.f32.mrf.mxu1  ;;  %v9754_v14 = vadd.f32 %v2028_v19, %v1916_v8  ;;  %v7830_v19 = vld [vmem:[%s11471_s4 + $0x98] sm:$0xff]  }
 0x132   : > { %v9756_v27 = vpop.f32.mrf.mxu0 }
 0x133   : > { %v9758_v20 = vpop.f32.mrf.mxu1  ;;  %3176 = vmatpush1.bf16.msra.mxu1 %v7830_v19 }
 0x134   : > { %v1923_v44 = vpop.f32.mrf.mxu0  ;;  %2600 = vmatmul.mubr.bf16.gmra.mxu0 %v11514_v0  ;;  %3177 = vmatprep.subr.bf16.mxu1 %v11506_v32 }
 0x135   : > { %v2036_v62 = vpop.f32.mrf.mxu1  ;;  %6993 = vmatmul.mubr.msk.bf16.gmra.mxu1 %vm1814_vm0, %v11515_v17  ;;  %v1924_v28 = vadd.f32 %v1923_v44, %v9603_v26  ;;  %2609 = vmatprep.mubr.bf16.mxu0 %v11516_v31  ;;  %v7831_v31 = vld [vmem:[%s11471_s4 + $0x90] sm:$0xff]  }
 0x136   : > { %2722 = vmatprep.mubr.bf16.mxu1 %v11506_v32  ;;  %v1925_v60 = vpop.f32.mrf.mxu0 }
 0x137   : > { %v2038_v37 = vpop.f32.mrf.mxu1  ;;  %v9770_v61 = vadd.f32 %v2036_v62, %v1924_v28  ;;  %v1926_v13 = vadd.f32 %v1925_v60, %v9610_v12  ;;  %3178 = vmatpush1.bf16.msra.mxu1 %v7831_v31 }
 0x138   : > { %v9773_v1 = vpop.f32.mrf.mxu0  ;;  %3179 = vmatprep.subr.bf16.mxu1 %v11506_v32 }
 0x139   : > { %v9775_v43 = vpop.f32.mrf.mxu1  ;;  %v9778_v46 = vadd.f32 %v2038_v37, %v1926_v13 }
 0x13a   : > { %v9780_v33 = vpop.f32.mrf.mxu0 }
 0x13b   : > { %v9782_v34 = vpop.f32.mrf.mxu1 }
 0x13c   : > { %v1933_v36 = vpop.f32.mrf.mxu0  ;;  %2610 = vmatmul.mubr.bf16.gmra.mxu0 %v9390_v30 }
 0x13d   : > { %v2046_v38 = vpop.f32.mrf.mxu1  ;;  %6994 = vmatmul.mubr.msk.bf16.gmra.mxu1 %vm1814_vm0, %v9392_v42  ;;  %v1934_v49 = vadd.f32 %v1933_v36, %v9603_v26  ;;  %2619 = vmatprep.mubr.bf16.mxu0 %v11517_v18 }
 0x13e   : > { %2732 = vmatprep.mubr.bf16.mxu1 %v11506_v32  ;;  %v1935_v8 = vpop.f32.mrf.mxu0 }
 0x13f   : > { %v2048_v24 = vpop.f32.mrf.mxu1  ;;  %v9793_v44 = vadd.f32 %v2046_v38, %v1934_v49  ;;  %v1936_v62 = vadd.f32 %v1935_v8, %v9610_v12 }
 0x140   : > { %v9796_v30 = vpop.f32.mrf.mxu0 }
 0x141   : > { %v9798_v42 = vpop.f32.mrf.mxu1  ;;  %v9801_v0 = vadd.f32 %v2048_v24, %v1936_v62  ;;  %v1878_v24 = vadd.f32 %v9630_v53, %v9603_v26  ;;  %v7832_v62 = vld [vmem:[%s11471_s4 + $0x88] sm:$0xff]  }
 0x142   : > { %v9803_v17 = vpop.f32.mrf.mxu0  ;;  %3180 = vmatpush1.bf16.msra.mxu1 %v7832_v62 }
 0x143   : > { %v9805_v28 = vpop.f32.mrf.mxu1  ;;  %3181 = vmatprep.subr.bf16.mxu1 %v11506_v32 }
 0x144   : > { %v1943_v41 = vpop.f32.mrf.mxu0  ;;  %2620 = vmatmul.mubr.bf16.gmra.mxu0 %v9429_v39 }
 0x145   : > { %v2056_v60 = vpop.f32.mrf.mxu1  ;;  %6995 = vmatmul.mubr.msk.bf16.gmra.mxu1 %vm1814_vm0, %v9431_v22  ;;  %v1944_v37 = vadd.f32 %v1943_v41, %v9603_v26 }
 0x146   : > { %v1945_v13 = vpop.f32.mrf.mxu0 }
 0x147   : > { %v2058_v36 = vpop.f32.mrf.mxu1  ;;  %v9815_v38 = vadd.f32 %v2056_v60, %v1944_v37  ;;  %v1946_v49 = vadd.f32 %v1945_v13, %v9610_v12  ;;  %v1880_v60 = vadd.f32 %v9636_v59, %v9610_v12  ;;  %v1888_v59 = vadd.f32 %v9661_v52, %v9603_v26 }
 0x148   : > { %v9818_v18 = vpop.f32.mrf.mxu0 }
 0x149   : > { %11518 = vst [vmem:[#allocation2_spill] sm:$0xff] %v9815_v38  ;;  %v9820_v19 = vpop.f32.mrf.mxu1  ;;  %v9822_v8 = vadd.f32 %v2058_v36, %v1946_v49  ;;  %v1991_v36 = vadd.f32 %v9632_v63, %v1878_v24  ;;  %v1993_v9 = vadd.f32 %v9638_v15, %v1880_v60  ;;  %v7833_v63 = vld [vmem:[%s11471_s4 + $0x80] sm:$0xff]  }
 0x14a   : > { %11519 = vst [vmem:[#allocation3_spill] sm:$0xff] %v9820_v19  ;;  %v9824_v39 = vpop.f32.mrf.mxu0  ;;  %3182 = vmatpush1.bf16.msra.mxu1 %v7833_v63 }
 0x14b   : > { %11520 = vst [vmem:[#allocation4_spill] sm:$0xff] %v9822_v8  ;;  %v9826_v22 = vpop.f32.mrf.mxu1  ;;  %3197 = vmatprep.subr.bf16.mxu1 %v11506_v32 }
 0x14c   : > { %11521 = vst [vmem:[#allocation5_spill] sm:$0xff] %v9826_v22  ;;  %v2099_v31 = vpop.f32.mrf.mxu0 }
 0x14d   : > { %v2212_v41 = vpop.f32.mrf.mxu1  ;;  %v2100_v53 = vadd.f32 %v2099_v31, %v9624_v10  ;;  %v1890_v31 = vadd.f32 %v9667_v3, %v9610_v12 }
 0x14e   : > { %v2101_v37 = vpop.f32.mrf.mxu0 }
 0x14f   : > { %v2214_v13 = vpop.f32.mrf.mxu1  ;;  %v2102_v49 = vadd.f32 %v2101_v37, %v9634_v54  ;;  %v2213_v54 = vadd.f32 %v2212_v41, %v2100_v53 }
 0x150   : > { %v2103_v45 = vpop.f32.mrf.mxu0 }
 0x151   : > { %v2216_v47 = vpop.f32.mrf.mxu1  ;;  %v2104_v22 = vadd.f32 %v2103_v45, %v1991_v36  ;;  %v2215_v62 = vadd.f32 %v2214_v13, %v2102_v49  ;;  %v2743_v41 = vmax.f32 %v2213_v54, 0.0 }
 0x152   : > { %v2105_v38 = vpop.f32.mrf.mxu0 }
 0x153   : > { %v2218_v8 = vpop.f32.mrf.mxu1  ;;  %v2217_v19 = vadd.f32 %v2216_v47, %v2104_v22  ;;  %v2106_v29 = vadd.f32 %v2105_v38, %v1993_v9  ;;  %v2001_v47 = vadd.f32 %v9663_v40, %v1888_v59  ;;  %v2744_v9 = vmax.f32 %v2215_v62, 0.0  ;;  %v7834_v22 = vld [vmem:[%s11471_s4 + $0xc0] sm:$0xff]  }
 0x154   : > { %v2109_v24 = vpop.f32.mrf.mxu0  ;;  %3198 = vmatpush2.bf16.msra.mxu1 %v7834_v22 }
 0x155   : > { %v2222_v10 = vpop.f32.mrf.mxu1  ;;  %v2219_v15 = vadd.f32 %v2218_v8, %v2106_v29  ;;  %v2747_v45 = vmax.f32 %v2217_v19, 0.0  ;;  %v2110_v3 = vadd.f32 %v2109_v24, %v9655_v50  ;;  %v2003_v19 = vadd.f32 %v9669_v4, %v1890_v31 }
 0x156   : > { %v2111_v60 = vpop.f32.mrf.mxu0  ;;  %v1900_v4 = vadd.f32 %v9701_v5, %v9610_v12 }
 0x157   : > { %v2224_v37 = vpop.f32.mrf.mxu1  ;;  %v2748_v52 = vmax.f32 %v2219_v15, 0.0  ;;  %v2112_v38 = vadd.f32 %v2111_v60, %v9665_v56  ;;  %v2807_v49 = vpack.c.bf16 %v2747_v45, %v2743_v41  ;;  %v1898_v56 = vadd.f32 %v9695_v48, %v9603_v26 }
 0x158   : > { %v2113_v29 = vpop.f32.mrf.mxu0  ;;  %v2223_v54 = vadd.f32 %v2222_v10, %v2110_v3  ;;  %v2013_v41 = vadd.f32 %v9703_v11, %v1900_v4 }
 0x159   : > { %v2226_v8 = vpop.f32.mrf.mxu1  ;;  %v2114_v13 = vadd.f32 %v2113_v29, %v2001_v47  ;;  %v2808_v36 = vpack.c.bf16 %v2748_v52, %v2744_v9  ;;  %v2225_v59 = vadd.f32 %v2224_v37, %v2112_v38  ;;  %v2011_v47 = vadd.f32 %v9697_v58, %v1898_v56 }
 0x15a   : > { %v2115_v40 = vpop.f32.mrf.mxu0  ;;  %v2751_v37 = vmax.f32 %v2223_v54, 0.0 }
 0x15b   : > { %v2228_v53 = vpop.f32.mrf.mxu1  ;;  %v2227_v62 = vadd.f32 %v2226_v8, %v2114_v13  ;;  %v2116_v63 = vadd.f32 %v2115_v40, %v2003_v19  ;;  %3102 = vmatprep.mubr.bf16.mxu0 %v2808_v36  ;;  %v2752_v9 = vmax.f32 %v2225_v59, 0.0  ;;  %v1908_v13 = vadd.f32 %v9727_v57, %v9603_v26 }
 0x15c   : > { %v2119_v15 = vpop.f32.mrf.mxu0  ;;  %3103 = vmatmul.mubr.bf16.vlgmr.msra.gmra.mxu0 %v2807_v49 }
 0x15d   : > { %v2232_v50 = vpop.f32.mrf.mxu1  ;;  %v2229_v24 = vadd.f32 %v2228_v53, %v2116_v63  ;;  %v2755_v31 = vmax.f32 %v2227_v62, 0.0  ;;  %v2120_v38 = vadd.f32 %v2119_v15, %v9686_v51  ;;  %v1910_v51 = vadd.f32 %v9733_v21, %v9610_v12 }
 0x15e   : > { %v2121_v60 = vpop.f32.mrf.mxu0  ;;  %v2021_v63 = vadd.f32 %v9729_v7, %v1908_v13 }
 0x15f   : > { %v2234_v45 = vpop.f32.mrf.mxu1  ;;  %v2756_v52 = vmax.f32 %v2229_v24, 0.0  ;;  %v2122_v48 = vadd.f32 %v2121_v60, %v9699_v2  ;;  %v2811_v5 = vpack.c.bf16 %v2755_v31, %v2751_v37  ;;  %v2233_v2 = vadd.f32 %v2232_v50, %v2120_v38 }
 0x160   : > { %v2123_v10 = vpop.f32.mrf.mxu0  ;;  %v2023_v60 = vadd.f32 %v9735_v23, %v1910_v51 }
 0x161   : > { %v2236_v22 = vpop.f32.mrf.mxu1  ;;  %v2124_v3 = vadd.f32 %v2123_v10, %v2011_v47  ;;  %v2812_v29 = vpack.c.bf16 %v2756_v52, %v2752_v9  ;;  %v2235_v58 = vadd.f32 %v2234_v45, %v2122_v48  ;;  %v2759_v4 = vmax.f32 %v2233_v2, 0.0 }
 0x162   : > { %v2125_v8 = vpop.f32.mrf.mxu0  ;;  %v1918_v48 = vadd.f32 %v9750_v35, %v9603_v26 }
 0x163   : > { %v2238_v19 = vpop.f32.mrf.mxu1  ;;  %v2237_v36 = vadd.f32 %v2236_v22, %v2124_v3  ;;  %v2126_v49 = vadd.f32 %v2125_v8, %v2013_v41  ;;  %3110 = vmatprep.mubr.bf16.mxu0 %v2812_v29  ;;  %v2760_v54 = vmax.f32 %v2235_v58, 0.0 }
 0x164   : > { %v2129_v40 = vpop.f32.mrf.mxu0  ;;  %3111 = vmatmul.mubr.bf16.gmra.mxu0 %v2811_v5  ;;  %v2031_v5 = vadd.f32 %v9752_v25, %v1918_v48 }
 0x165   : > { %v2242_v53 = vpop.f32.mrf.mxu1  ;;  %v2239_v11 = vadd.f32 %v2238_v19, %v2126_v49  ;;  %v2763_v56 = vmax.f32 %v2237_v36, 0.0  ;;  %v2130_v24 = vadd.f32 %v2129_v40, %v9721_v55  ;;  %v1920_v55 = vadd.f32 %v9756_v27, %v9610_v12 }
 0x166   : > { %v2131_v59 = vpop.f32.mrf.mxu0 }
 0x167   : > { %v2244_v62 = vpop.f32.mrf.mxu1  ;;  %v2764_v15 = vmax.f32 %v2239_v11, 0.0  ;;  %v2132_v57 = vadd.f32 %v2131_v59, %v9731_v16  ;;  %v2815_v21 = vpack.c.bf16 %v2763_v56, %v2759_v4  ;;  %v2243_v16 = vadd.f32 %v2242_v53, %v2130_v24 }
 0x168   : > { %v2133_v50 = vpop.f32.mrf.mxu0  ;;  %v2033_v2 = vadd.f32 %v9758_v20, %v1920_v55  ;;  %v1928_v56 = vadd.f32 %v9773_v1, %v9603_v26 }
 0x169   : > { %v2246_v31 = vpop.f32.mrf.mxu1  ;;  %v2134_v45 = vadd.f32 %v2133_v50, %v2021_v63  ;;  %v2816_v47 = vpack.c.bf16 %v2764_v15, %v2760_v54  ;;  %v2245_v7 = vadd.f32 %v2244_v62, %v2132_v57  ;;  %v2767_v13 = vmax.f32 %v2243_v16, 0.0 }
 0x16a   : > { %v2135_v9 = vpop.f32.mrf.mxu0  ;;  %v2041_v24 = vadd.f32 %v9775_v43, %v1928_v56 }
 0x16b   : > { %v2248_v52 = vpop.f32.mrf.mxu1  ;;  %v2247_v37 = vadd.f32 %v2246_v31, %v2134_v45  ;;  %v2136_v38 = vadd.f32 %v2135_v9, %v2023_v60  ;;  %3118 = vmatprep.mubr.bf16.mxu0 %v2816_v47  ;;  %v2768_v8 = vmax.f32 %v2245_v7, 0.0 }
 0x16c   : > { %v2139_v10 = vpop.f32.mrf.mxu0  ;;  %3119 = vmatmul.mubr.bf16.gmra.mxu0 %v2815_v21 }
 0x16d   : > { %v2252_v22 = vpop.f32.mrf.mxu1  ;;  %v2249_v23 = vadd.f32 %v2248_v52, %v2136_v38  ;;  %v2771_v41 = vmax.f32 %v2247_v37, 0.0  ;;  %v2140_v58 = vadd.f32 %v2139_v10, %v9744_v6  ;;  %v1930_v6 = vadd.f32 %v9780_v33, %v9610_v12 }
 0x16e   : > { %v2141_v3 = vpop.f32.mrf.mxu0  ;;  %v1938_v38 = vadd.f32 %v9796_v30, %v9603_v26 }
 0x16f   : > { %v2254_v29 = vpop.f32.mrf.mxu1  ;;  %v2772_v19 = vmax.f32 %v2249_v23, 0.0  ;;  %v2142_v35 = vadd.f32 %v2141_v3, %v9754_v14  ;;  %v2819_v27 = vpack.c.bf16 %v2771_v41, %v2767_v13  ;;  %v2253_v14 = vadd.f32 %v2252_v22, %v2140_v58 }
 0x170   : > { %v2143_v36 = vpop.f32.mrf.mxu0  ;;  %v2043_v9 = vadd.f32 %v9782_v34, %v1930_v6 }
 0x171   : > { %v2256_v49 = vpop.f32.mrf.mxu1  ;;  %v2144_v40 = vadd.f32 %v2143_v36, %v2031_v5  ;;  %v2820_v53 = vpack.c.bf16 %v2772_v19, %v2768_v8  ;;  %v2255_v25 = vadd.f32 %v2254_v29, %v2142_v35  ;;  %v2775_v60 = vmax.f32 %v2253_v14, 0.0 }
 0x172   : > { %v2145_v51 = vpop.f32.mrf.mxu0  ;;  %v2051_v29 = vadd.f32 %v9798_v42, %v1938_v38 }
 0x173   : > { %v2258_v11 = vpop.f32.mrf.mxu1  ;;  %v2257_v59 = vadd.f32 %v2256_v49, %v2144_v40  ;;  %v2146_v62 = vadd.f32 %v2145_v51, %v2033_v2  ;;  %3126 = vmatprep.mubr.bf16.mxu0 %v2820_v53  ;;  %v2776_v50 = vmax.f32 %v2255_v25, 0.0 }
 0x174   : > { %v2149_v63 = vpop.f32.mrf.mxu0  ;;  %3127 = vmatmul.mubr.bf16.gmra.mxu0 %v2819_v27  ;;  %v1948_v27 = vadd.f32 %v9818_v18, %v9603_v26  ;;  %v11525_v18 = vld [vmem:[#allocation3_spill] sm:$0xff] }
 0x175   : > { %v2262_v54 = vpop.f32.mrf.mxu1  ;;  %v2259_v20 = vadd.f32 %v2258_v11, %v2146_v62  ;;  %v2779_v15 = vmax.f32 %v2257_v59, 0.0  ;;  %v2150_v45 = vadd.f32 %v2149_v63, %v9770_v61  ;;  %v1940_v61 = vadd.f32 %v9803_v17, %v9610_v12  ;;  %v11522_v59 = vld [vmem:[#allocation8_spill] sm:$0xff] }
 0x176   : > { %v2151_v57 = vpop.f32.mrf.mxu0  ;;  %v9900_v62 = vsub.s32 2, %v11522_v59  ;;  %v9903_v26 = vsub.s32 3, %v11522_v59  ;;  %v2061_v6 = vadd.f32 %v11525_v18, %v1948_v27 }
 0x177   : > { %v2264_v4 = vpop.f32.mrf.mxu1  ;;  %v2780_v31 = vmax.f32 %v2259_v20, 0.0  ;;  %v2152_v1 = vadd.f32 %v2151_v57, %v9778_v46  ;;  %v2823_v33 = vpack.c.bf16 %v2779_v15, %v2775_v60  ;;  %v2263_v46 = vadd.f32 %v2262_v54, %v2150_v45  ;;  %v11526_v57 = vld [vmem:[#allocation4_spill] sm:$0xff] }
 0x178   : > { %v2153_v47 = vpop.f32.mrf.mxu0  ;;  %v2053_v36 = vadd.f32 %v9805_v28, %v1940_v61  ;;  %11523 = vst [vmem:[#allocation6_spill] sm:$0xff] %v9900_v62  ;;  %11524 = vst [vmem:[#allocation7_spill] sm:$0xff] %v9903_v26 }
 0x179   : > { %v2266_v21 = vpop.f32.mrf.mxu1  ;;  %v2154_v52 = vadd.f32 %v2153_v47, %v2041_v24  ;;  %v2824_v48 = vpack.c.bf16 %v2780_v31, %v2776_v50  ;;  %v2265_v43 = vadd.f32 %v2264_v4, %v2152_v1  ;;  %v2783_v19 = vmax.f32 %v2263_v46, 0.0  ;;  %v11527_v50 = vld [vmem:[#allocation2_spill] sm:$0xff]  ;;  %v11528_v1 = vld [vmem:[#allocation5_spill] sm:$0xff] }
 0x17a   : > { %v2155_v7 = vpop.f32.mrf.mxu0 }
 0x17b   : > { %v2268_v37 = vpop.f32.mrf.mxu1  ;;  %v2267_v16 = vadd.f32 %v2266_v21, %v2154_v52  ;;  %v2156_v10 = vadd.f32 %v2155_v7, %v2043_v9  ;;  %3134 = vmatprep.mubr.bf16.mxu0 %v2824_v48  ;;  %v2784_v5 = vmax.f32 %v2265_v43, 0.0  ;;  %v11529_v21 = vld [vmem:[#allocation11_spill] sm:$0xff] }
 0x17c   : > { %v2159_v22 = vpop.f32.mrf.mxu0  ;;  %3135 = vmatmul.mubr.bf16.gmra.mxu0 %v2823_v33  ;;  %v9911_v9 = vrot.slane %v11529_v21, %v9900_v62  ;;  %v9915_v43 = vrot.slane %v11529_v21, %v9903_v26 }
 0x17d   : > { %v2272_v55 = vpop.f32.mrf.mxu1  ;;  %v2269_v34 = vadd.f32 %v2268_v37, %v2156_v10  ;;  %v2787_v23 = vmax.f32 %v2267_v16, 0.0  ;;  %v2160_v35 = vadd.f32 %v2159_v22, %v9793_v44  ;;  %v1950_v44 = vadd.f32 %v9824_v39, %v9610_v12 }
 0x17e   : > { %v2161_v41 = vpop.f32.mrf.mxu0 }
 0x17f   : > { %v2274_v3 = vpop.f32.mrf.mxu1  ;;  %v2788_v8 = vmax.f32 %v2269_v34, 0.0  ;;  %v2162_v30 = vadd.f32 %v2161_v41, %v9801_v0  ;;  %v2827_v17 = vpack.c.bf16 %v2787_v23, %v2783_v19  ;;  %v2273_v0 = vadd.f32 %v2272_v55, %v2160_v35 }
 0x180   : > { %v2163_v13 = vpop.f32.mrf.mxu0  ;;  %v2063_v60 = vadd.f32 %v11528_v1, %v1950_v44 }
 0x181   : > { %v2276_v58 = vpop.f32.mrf.mxu1  ;;  %v2164_v49 = vadd.f32 %v2163_v13, %v2051_v29  ;;  %v2828_v2 = vpack.c.bf16 %v2788_v8, %v2784_v5  ;;  %v2275_v42 = vadd.f32 %v2274_v3, %v2162_v30  ;;  %v2791_v24 = vmax.f32 %v2273_v0, 0.0 }
 0x182   : > { %v2165_v40 = vpop.f32.mrf.mxu0 }
 0x183   : > { %v2278_v53 = vpop.f32.mrf.mxu1  ;;  %v2277_v51 = vadd.f32 %v2276_v58, %v2164_v49  ;;  %v2166_v11 = vadd.f32 %v2165_v40, %v2053_v36  ;;  %3142 = vmatprep.mubr.bf16.mxu0 %v2828_v2  ;;  %v2792_v20 = vmax.f32 %v2275_v42, 0.0 }
 0x184   : > { %v2169_v56 = vpop.f32.mrf.mxu0  ;;  %3143 = vmatmul.mubr.bf16.gmra.mxu0 %v2827_v17 }
 0x185   : > { %v2282_v25 = vpop.f32.mrf.mxu1  ;;  %v2279_v28 = vadd.f32 %v2278_v53, %v2166_v11  ;;  %v2795_v14 = vmax.f32 %v2277_v51, 0.0  ;;  %v2170_v31 = vadd.f32 %v2169_v56, %v11527_v50 }
 0x186   : > { %v2171_v63 = vpop.f32.mrf.mxu0 }
 0x187   : > { %v2284_v54 = vpop.f32.mrf.mxu1  ;;  %v2796_v15 = vmax.f32 %v2279_v28, 0.0  ;;  %v2172_v4 = vadd.f32 %v2171_v63, %v11526_v57  ;;  %v2831_v52 = vpack.c.bf16 %v2795_v14, %v2791_v24  ;;  %v2283_v16 = vadd.f32 %v2282_v25, %v2170_v31 }
 0x188   : > { %v2173_v12 = vpop.f32.mrf.mxu0 }
 0x189   : > { %v2286_v39 = vpop.f32.mrf.mxu1  ;;  %v2174_v45 = vadd.f32 %v2173_v12, %v2061_v6  ;;  %v2832_v47 = vpack.c.bf16 %v2796_v15, %v2792_v20  ;;  %v2285_v7 = vadd.f32 %v2284_v54, %v2172_v4  ;;  %v2799_v8 = vmax.f32 %v2283_v16, 0.0 }
 0x18a   : > { %v2175_v48 = vpop.f32.mrf.mxu0 }
 0x18b   : > { %v2288_v33 = vpop.f32.mrf.mxu1  ;;  %v2287_v37 = vadd.f32 %v2286_v39, %v2174_v45  ;;  %v2176_v38 = vadd.f32 %v2175_v48, %v2063_v60  ;;  %3150 = vmatprep.mubr.bf16.mxu0 %v2832_v47  ;;  %v2800_v41 = vmax.f32 %v2285_v7, 0.0 }
 0x18c   : > { %v2325_v10 = vpop.f32.mrf.mxu0  ;;  %3151 = vmatmul.mubr.bf16.gmra.mxu0 %v2831_v52 }
 0x18d   : > { %v2438_v46 = vpop.f32.mrf.mxu1  ;;  %v2289_v22 = vadd.f32 %v2288_v33, %v2176_v38  ;;  %v2326_v55 = vadd.f32 %v2325_v10, %v9911_v9  ;;  %v2803_v61 = vmax.f32 %v2287_v37, 0.0 }
 0x18e   : > { %v2327_v34 = vpop.f32.mrf.mxu0 }
 0x18f   : > { %v2440_v23 = vpop.f32.mrf.mxu1  ;;  %v2804_v3 = vmax.f32 %v2289_v22, 0.0  ;;  %v9918_v29 = vadd.f32 %v2438_v46, %v2326_v55  ;;  %v2328_v5 = vadd.f32 %v2327_v34, %v9915_v43  ;;  %v2835_v58 = vpack.c.bf16 %v2803_v61, %v2799_v8 }
 0x190   : > { %v9921_v30 = vpop.f32.mrf.mxu0 }
 0x191   : > { %v9923_v19 = vpop.f32.mrf.mxu1  ;;  %v9925_v35 = vadd.f32 %v2440_v23, %v2328_v5  ;;  %v2836_v13 = vpack.c.bf16 %v2804_v3, %v2800_v41 }
 0x192   : > { %v9927_v36 = vpop.f32.mrf.mxu0 }
 0x193   : > { %v9929_v49 = vpop.f32.mrf.mxu1  ;;  %3158 = vmatprep.mubr.bf16.mxu0 %v2836_v13 }
 0x194   : > { %v2335_v2 = vpop.f32.mrf.mxu0  ;;  %3159 = vmatmul.mubr.bf16.gmra.mxu0 %v2835_v58 }
 0x195   : > { %v2448_v17 = vpop.f32.mrf.mxu1  ;;  %v2336_v40 = vadd.f32 %v2335_v2, %v9911_v9  ;;  %3560 = vmatprep.mubr.bf16.mxu0 %v11506_v32 }
 0x196   : > { %v2337_v53 = vpop.f32.mrf.mxu0 }
 0x197   : > { %v2450_v27 = vpop.f32.mrf.mxu1  ;;  %v9933_v42 = vadd.f32 %v2448_v17, %v2336_v40  ;;  %v2338_v51 = vadd.f32 %v2337_v53, %v9915_v43 }
 0x198   : > { %v9936_v11 = vpop.f32.mrf.mxu0 }
 0x199   : > { %v9938_v0 = vpop.f32.mrf.mxu1  ;;  %v9940_v56 = vadd.f32 %v2450_v27, %v2338_v51 }
 0x19a   : > { %v9942_v25 = vpop.f32.mrf.mxu0 }
 0x19b   : > { %v9944_v44 = vpop.f32.mrf.mxu1 }
 0x19c   : > { %v2345_v28 = vpop.f32.mrf.mxu0 }
 0x19d   : > { %v2458_v14 = vpop.f32.mrf.mxu1  ;;  %v2346_v63 = vadd.f32 %v2345_v28, %v9911_v9 }
 0x19e   : > { %v2347_v54 = vpop.f32.mrf.mxu0 }
 0x19f   : > { %v2460_v18 = vpop.f32.mrf.mxu1  ;;  %v9947_v6 = vadd.f32 %v2458_v14, %v2346_v63  ;;  %v2348_v20 = vadd.f32 %v2347_v54, %v9915_v43 }
 0x1a0   : > { %v9950_v15 = vpop.f32.mrf.mxu0 }
 0x1a1   : > { %v9952_v57 = vpop.f32.mrf.mxu1  ;;  %v9954_v4 = vadd.f32 %v2460_v18, %v2348_v20 }
 0x1a2   : > { %v9956_v24 = vpop.f32.mrf.mxu0 }
 0x1a3   : > { %v9958_v50 = vpop.f32.mrf.mxu1 }
 0x1a4   : > { %v2355_v31 = vpop.f32.mrf.mxu0 }
 0x1a5   : > { %v2468_v12 = vpop.f32.mrf.mxu1  ;;  %v2356_v39 = vadd.f32 %v2355_v31, %v9911_v9 }
 0x1a6   : > { %v2357_v1 = vpop.f32.mrf.mxu0 }
 0x1a7   : > { %v2470_v60 = vpop.f32.mrf.mxu1  ;;  %v9961_v45 = vadd.f32 %v2468_v12, %v2356_v39  ;;  %v2358_v47 = vadd.f32 %v2357_v1, %v9915_v43 }
 0x1a8   : > { %v9964_v21 = vpop.f32.mrf.mxu0 }
 0x1a9   : > { %v9966_v52 = vpop.f32.mrf.mxu1  ;;  %v9968_v48 = vadd.f32 %v2470_v60, %v2358_v47 }
 0x1aa   : > { %v9970_v33 = vpop.f32.mrf.mxu0 }
 0x1ab   : > { %v9972_v7 = vpop.f32.mrf.mxu1 }
 0x1ac   : > { %v2365_v37 = vpop.f32.mrf.mxu0 }
 0x1ad   : > { %v2478_v38 = vpop.f32.mrf.mxu1  ;;  %v2366_v16 = vadd.f32 %v2365_v37, %v9911_v9 }
 0x1ae   : > { %v2367_v10 = vpop.f32.mrf.mxu0 }
 0x1af   : > { %v2480_v46 = vpop.f32.mrf.mxu1  ;;  %v9975_v22 = vadd.f32 %v2478_v38, %v2366_v16  ;;  %v2368_v55 = vadd.f32 %v2367_v10, %v9915_v43 }
 0x1b0   : > { %v9978_v61 = vpop.f32.mrf.mxu0 }
 0x1b1   : > { %v9980_v34 = vpop.f32.mrf.mxu1  ;;  %v9982_v23 = vadd.f32 %v2480_v46, %v2368_v55 }
 0x1b2   : > { %v9984_v41 = vpop.f32.mrf.mxu0 }
 0x1b3   : > { %v9986_v3 = vpop.f32.mrf.mxu1 }
 0x1b4   : > { %v2375_v5 = vpop.f32.mrf.mxu0 }
 0x1b5   : > { %v2488_v8 = vpop.f32.mrf.mxu1  ;;  %v2376_v13 = vadd.f32 %v2375_v5, %v9911_v9 }
 0x1b6   : > { %v2377_v58 = vpop.f32.mrf.mxu0 }
 0x1b7   : > { %v2490_v2 = vpop.f32.mrf.mxu1  ;;  %v9989_v17 = vadd.f32 %v2488_v8, %v2376_v13  ;;  %v2378_v40 = vadd.f32 %v2377_v58, %v9915_v43 }
 0x1b8   : > { %v9992_v53 = vpop.f32.mrf.mxu0 }
 0x1b9   : > { %v9994_v27 = vpop.f32.mrf.mxu1  ;;  %v9996_v51 = vadd.f32 %v2490_v2, %v2378_v40 }
 0x1ba   : > { %v9998_v28 = vpop.f32.mrf.mxu0 }
 0x1bb   : > { %v10000_v14 = vpop.f32.mrf.mxu1 }
 0x1bc   : > { %v2385_v63 = vpop.f32.mrf.mxu0 }
 0x1bd   : > { %v2498_v54 = vpop.f32.mrf.mxu1  ;;  %v2386_v18 = vadd.f32 %v2385_v63, %v9911_v9 }
 0x1be   : > { %v2387_v20 = vpop.f32.mrf.mxu0 }
 0x1bf   : > { %v2500_v31 = vpop.f32.mrf.mxu1  ;;  %v10003_v12 = vadd.f32 %v2498_v54, %v2386_v18  ;;  %v2388_v39 = vadd.f32 %v2387_v20, %v9915_v43  ;;  %v2330_v18 = vadd.f32 %v9921_v30, %v9911_v9 }
 0x1c0   : > { %v10006_v1 = vpop.f32.mrf.mxu0 }
 0x1c1   : > { %v10008_v60 = vpop.f32.mrf.mxu1  ;;  %v10010_v47 = vadd.f32 %v2500_v31, %v2388_v39  ;;  %v2332_v39 = vadd.f32 %v9927_v36, %v9915_v43 }
 0x1c2   : > { %v10012_v37 = vpop.f32.mrf.mxu0 }
 0x1c3   : > { %v10014_v38 = vpop.f32.mrf.mxu1  ;;  %v2445_v62 = vadd.f32 %v9929_v49, %v2332_v39 }
 0x1c4   : > { %v2395_v16 = vpop.f32.mrf.mxu0 }
 0x1c5   : > { %v2508_v10 = vpop.f32.mrf.mxu1  ;;  %v2396_v46 = vadd.f32 %v2395_v16, %v9911_v9 }
 0x1c6   : > { %v2397_v55 = vpop.f32.mrf.mxu0 }
 0x1c7   : > { %v2510_v5 = vpop.f32.mrf.mxu1  ;;  %v10017_v8 = vadd.f32 %v2508_v10, %v2396_v46  ;;  %v2398_v13 = vadd.f32 %v2397_v55, %v9915_v43  ;;  %v2443_v46 = vadd.f32 %v9923_v19, %v2330_v18 }
 0x1c8   : > { %v10020_v58 = vpop.f32.mrf.mxu0 }
 0x1c9   : > { %11530 = vst [vmem:[#allocation3_spill] sm:$0xff] %v10017_v8  ;;  %v10022_v2 = vpop.f32.mrf.mxu1  ;;  %v10024_v40 = vadd.f32 %v2510_v5, %v2398_v13 }
 0x1ca   : > { %11531 = vst [vmem:[#allocation4_spill] sm:$0xff] %v10022_v2  ;;  %v10026_v63 = vpop.f32.mrf.mxu0 }
 0x1cb   : > { %11532 = vst [vmem:[#allocation2_spill] sm:$0xff] %v10024_v40  ;;  %11533 = vst [vmem:[#allocation5_spill] sm:$0xff] %v10026_v63  ;;  %v10028_v54 = vpop.f32.mrf.mxu1 }
 0x1cc   : > { %11534 = vst [vmem:[#allocation11_spill] sm:$0xff] %v10028_v54  ;;  %v2551_v20 = vpop.f32.mrf.mxu0  ;;  %v2340_v54 = vadd.f32 %v9936_v11, %v9911_v9 }
 0x1cd   : > { %v2664_v31 = vpop.f32.mrf.mxu1  ;;  %v2552_v5 = vadd.f32 %v2551_v20, %v9918_v29 }
 0x1ce   : > { %v2553_v16 = vpop.f32.mrf.mxu0  ;;  %v2453_v49 = vadd.f32 %v9938_v0, %v2340_v54 }
 0x1cf   : > { %v2666_v10 = vpop.f32.mrf.mxu1  ;;  %v2554_v55 = vadd.f32 %v2553_v16, %v9925_v35  ;;  %v2665_v2 = vadd.f32 %v2664_v31, %v2552_v5  ;;  %v2342_v35 = vadd.f32 %v9942_v25, %v9915_v43  ;;  %v2350_v5 = vadd.f32 %v9950_v15, %v9911_v9 }
 0x1d0   : > { %v2555_v13 = vpop.f32.mrf.mxu0 }
 0x1d1   : > { %v2668_v59 = vpop.f32.mrf.mxu1  ;;  %v2556_v26 = vadd.f32 %v2555_v13, %v2443_v46  ;;  %v2667_v8 = vadd.f32 %v2666_v10, %v2554_v55  ;;  %v2745_v11 = vmax.f32 %v2665_v2, 0.0 }
 0x1d2   : > { %v2557_v32 = vpop.f32.mrf.mxu0 }
 0x1d3   : > { %v2670_v30 = vpop.f32.mrf.mxu1  ;;  %v2669_v36 = vadd.f32 %v2668_v59, %v2556_v26  ;;  %v2558_v40 = vadd.f32 %v2557_v32, %v2445_v62  ;;  %v2746_v39 = vmax.f32 %v2667_v8, 0.0  ;;  %v2455_v26 = vadd.f32 %v9944_v44, %v2342_v35 }
 0x1d4   : > { %v2561_v63 = vpop.f32.mrf.mxu0  ;;  %v2352_v44 = vadd.f32 %v9956_v24, %v9915_v43 }
 0x1d5   : > { %v2674_v19 = vpop.f32.mrf.mxu1  ;;  %v2671_v29 = vadd.f32 %v2670_v30, %v2558_v40  ;;  %v2749_v18 = vmax.f32 %v2669_v36, 0.0  ;;  %v2562_v59 = vadd.f32 %v2561_v63, %v9933_v42 }
 0x1d6   : > { %v2563_v20 = vpop.f32.mrf.mxu0 }
 0x1d7   : > { %v2676_v16 = vpop.f32.mrf.mxu1  ;;  %v2750_v46 = vmax.f32 %v2671_v29, 0.0  ;;  %v2564_v13 = vadd.f32 %v2563_v20, %v9940_v56  ;;  %v2809_v25 = vpack.c.bf16 %v2749_v18, %v2745_v11  ;;  %v2675_v56 = vadd.f32 %v2674_v19, %v2562_v59 }
 0x1d8   : > { %v2565_v32 = vpop.f32.mrf.mxu0  ;;  %v2463_v29 = vadd.f32 %v9952_v57, %v2350_v5 }
 0x1d9   : > { %v2678_v62 = vpop.f32.mrf.mxu1  ;;  %v2810_v31 = vpack.c.bf16 %v2750_v46, %v2746_v39  ;;  %v2566_v10 = vadd.f32 %v2565_v32, %v2453_v49  ;;  %v2677_v0 = vadd.f32 %v2676_v16, %v2564_v13  ;;  %v2753_v16 = vmax.f32 %v2675_v56, 0.0 }
 0x1da   : > { %v2567_v40 = vpop.f32.mrf.mxu0  ;;  %v2465_v46 = vadd.f32 %v9958_v50, %v2352_v44  ;;  %v2362_v50 = vadd.f32 %v9970_v33, %v9915_v43 }
 0x1db   : > { %v2680_v55 = vpop.f32.mrf.mxu1  ;;  %v2679_v8 = vadd.f32 %v2678_v62, %v2566_v10  ;;  %v2568_v54 = vadd.f32 %v2567_v40, %v2455_v26  ;;  %7022 = vmatprep.mubr.msk.bf16.mxu1 %vm1814_vm0, %v2810_v31  ;;  %v2754_v18 = vmax.f32 %v2677_v0, 0.0  ;;  %v2360_v62 = vadd.f32 %v9964_v21, %v9911_v9 }
 0x1dc   : > { %v2571_v2 = vpop.f32.mrf.mxu0  ;;  %3200 = vmatmul.mubr.bf16.vlgmr.msra.gmra.mxu1 %v2809_v25 }
 0x1dd   : > { %v2684_v42 = vpop.f32.mrf.mxu1  ;;  %v2681_v63 = vadd.f32 %v2680_v55, %v2568_v54  ;;  %v2757_v30 = vmax.f32 %v2679_v8, 0.0  ;;  %v2572_v49 = vadd.f32 %v2571_v2, %v9947_v6  ;;  %v2473_v0 = vadd.f32 %v9966_v52, %v2360_v62 }
 0x1de   : > { %v2573_v36 = vpop.f32.mrf.mxu0 }
 0x1df   : > { %v2686_v35 = vpop.f32.mrf.mxu1  ;;  %v2758_v15 = vmax.f32 %v2681_v63, 0.0  ;;  %v2574_v20 = vadd.f32 %v2573_v36, %v9954_v4  ;;  %v2813_v24 = vpack.c.bf16 %v2757_v30, %v2753_v16  ;;  %v2685_v4 = vadd.f32 %v2684_v42, %v2572_v49 }
 0x1e0   : > { %v2575_v19 = vpop.f32.mrf.mxu0  ;;  %v2475_v63 = vadd.f32 %v9972_v7, %v2362_v50  ;;  %v2372_v7 = vadd.f32 %v9984_v41, %v9915_v43  ;;  %v2380_v50 = vadd.f32 %v9992_v53, %v9911_v9 }
 0x1e1   : > { %v2688_v39 = vpop.f32.mrf.mxu1  ;;  %v2814_v13 = vpack.c.bf16 %v2758_v15, %v2754_v18  ;;  %v2576_v11 = vadd.f32 %v2575_v19, %v2463_v29  ;;  %v2687_v57 = vadd.f32 %v2686_v35, %v2574_v20  ;;  %v2761_v56 = vmax.f32 %v2685_v4, 0.0 }
 0x1e2   : > { %v2577_v59 = vpop.f32.mrf.mxu0  ;;  %v2370_v18 = vadd.f32 %v9978_v61, %v9911_v9 }
 0x1e3   : > { %v2690_v32 = vpop.f32.mrf.mxu1  ;;  %v2689_v26 = vadd.f32 %v2688_v39, %v2576_v11  ;;  %v2578_v31 = vadd.f32 %v2577_v59, %v2465_v46  ;;  %7023 = vmatprep.mubr.msk.bf16.mxu1 %vm1814_vm0, %v2814_v13  ;;  %v2762_v8 = vmax.f32 %v2687_v57, 0.0 }
 0x1e4   : > { %v2581_v10 = vpop.f32.mrf.mxu0  ;;  %3208 = vmatmul.mubr.bf16.gmra.mxu1 %v2813_v24  ;;  %v2483_v13 = vadd.f32 %v9980_v34, %v2370_v18 }
 0x1e5   : > { %v2694_v6 = vpop.f32.mrf.mxu1  ;;  %v2691_v25 = vadd.f32 %v2690_v32, %v2578_v31  ;;  %v2765_v40 = vmax.f32 %v2689_v26, 0.0  ;;  %v2582_v2 = vadd.f32 %v2581_v10, %v9961_v45  ;;  %v2485_v26 = vadd.f32 %v9986_v3, %v2372_v7 }
 0x1e6   : > { %v2583_v55 = vpop.f32.mrf.mxu0  ;;  %v2382_v3 = vadd.f32 %v9998_v28, %v9915_v43 }
 0x1e7   : > { %v2696_v5 = vpop.f32.mrf.mxu1  ;;  %v2766_v21 = vmax.f32 %v2691_v25, 0.0  ;;  %v2584_v54 = vadd.f32 %v2583_v55, %v9968_v48  ;;  %v2817_v33 = vpack.c.bf16 %v2765_v40, %v2761_v56  ;;  %v2695_v48 = vadd.f32 %v2694_v6, %v2582_v2 }
 0x1e8   : > { %v2585_v42 = vpop.f32.mrf.mxu0 }
 0x1e9   : > { %v2698_v44 = vpop.f32.mrf.mxu1  ;;  %v2818_v30 = vpack.c.bf16 %v2766_v21, %v2762_v8  ;;  %v2586_v36 = vadd.f32 %v2585_v42, %v2473_v0  ;;  %v2697_v52 = vadd.f32 %v2696_v5, %v2584_v54  ;;  %v2769_v59 = vmax.f32 %v2695_v48, 0.0 }
 0x1ea   : > { %v2587_v35 = vpop.f32.mrf.mxu0  ;;  %v2493_v54 = vadd.f32 %v9994_v27, %v2380_v50 }
 0x1eb   : > { %v2700_v29 = vpop.f32.mrf.mxu1  ;;  %v2699_v15 = vadd.f32 %v2698_v44, %v2586_v36  ;;  %v2588_v20 = vadd.f32 %v2587_v35, %v2475_v63  ;;  %7024 = vmatprep.mubr.msk.bf16.mxu1 %vm1814_vm0, %v2818_v30  ;;  %v2770_v11 = vmax.f32 %v2697_v52, 0.0  ;;  %v2495_v36 = vadd.f32 %v10000_v14, %v2382_v3 }
 0x1ec   : > { %v2591_v16 = vpop.f32.mrf.mxu0  ;;  %3216 = vmatmul.mubr.bf16.gmra.mxu1 %v2817_v33  ;;  %v2390_v52 = vadd.f32 %v10006_v1, %v9911_v9  ;;  %v2392_v14 = vadd.f32 %v10012_v37, %v9915_v43 }
 0x1ed   : > { %v2704_v45 = vpop.f32.mrf.mxu1  ;;  %v2701_v49 = vadd.f32 %v2700_v29, %v2588_v20  ;;  %v2773_v19 = vmax.f32 %v2699_v15, 0.0  ;;  %v2592_v32 = vadd.f32 %v2591_v16, %v9975_v22 }
 0x1ee   : > { %v2593_v39 = vpop.f32.mrf.mxu0 }
 0x1ef   : > { %v2706_v46 = vpop.f32.mrf.mxu1  ;;  %v2774_v61 = vmax.f32 %v2701_v49, 0.0  ;;  %v2594_v24 = vadd.f32 %v2593_v39, %v9982_v23  ;;  %v2821_v41 = vpack.c.bf16 %v2773_v19, %v2769_v59  ;;  %v2705_v23 = vadd.f32 %v2704_v45, %v2592_v32 }
 0x1f0   : > { %v2595_v62 = vpop.f32.mrf.mxu0  ;;  %v2503_v19 = vadd.f32 %v10008_v60, %v2390_v52  ;;  %v2505_v59 = vadd.f32 %v10014_v38, %v2392_v14 }
 0x1f1   : > { %v2708_v57 = vpop.f32.mrf.mxu1  ;;  %v2822_v31 = vpack.c.bf16 %v2774_v61, %v2770_v11  ;;  %v2596_v4 = vadd.f32 %v2595_v62, %v2483_v13  ;;  %v2707_v34 = vadd.f32 %v2706_v46, %v2594_v24  ;;  %v2777_v42 = vmax.f32 %v2705_v23, 0.0  ;;  %v11536_v23 = vld [vmem:[#allocation4_spill] sm:$0xff] }
 0x1f2   : > { %v2597_v10 = vpop.f32.mrf.mxu0 }
 0x1f3   : > { %v2710_v6 = vpop.f32.mrf.mxu1  ;;  %v2709_v25 = vadd.f32 %v2708_v57, %v2596_v4  ;;  %v2598_v40 = vadd.f32 %v2597_v10, %v2485_v26  ;;  %7025 = vmatprep.mubr.msk.bf16.mxu1 %vm1814_vm0, %v2822_v31  ;;  %v2778_v56 = vmax.f32 %v2707_v34, 0.0  ;;  %v2400_v31 = vadd.f32 %v10020_v58, %v9911_v9  ;;  %v11537_v58 = vld [vmem:[#allocation2_spill] sm:$0xff] }
 0x1f4   : > { %v2601_v55 = vpop.f32.mrf.mxu0  ;;  %3224 = vmatmul.mubr.bf16.gmra.mxu1 %v2821_v41 }
 0x1f5   : > { %v2714_v22 = vpop.f32.mrf.mxu1  ;;  %v2711_v5 = vadd.f32 %v2710_v6, %v2598_v40  ;;  %v2781_v0 = vmax.f32 %v2709_v25, 0.0  ;;  %v2602_v44 = vadd.f32 %v2601_v55, %v9989_v17  ;;  %v11535_v6 = vld [vmem:[#allocation5_spill] sm:$0xff]  ;;  %v2513_v55 = vadd.f32 %v11536_v23, %v2400_v31 }
 0x1f6   : > { %v2603_v8 = vpop.f32.mrf.mxu0  ;;  %v2402_v38 = vadd.f32 %v11535_v6, %v9915_v43 }
 0x1f7   : > { %v2716_v21 = vpop.f32.mrf.mxu1  ;;  %v2782_v53 = vmax.f32 %v2711_v5, 0.0  ;;  %v2604_v2 = vadd.f32 %v2603_v8, %v9996_v51  ;;  %v2825_v28 = vpack.c.bf16 %v2781_v0, %v2777_v42  ;;  %v2715_v51 = vadd.f32 %v2714_v22, %v2602_v44  ;;  %v11538_v0 = vld [vmem:[#allocation3_spill] sm:$0xff] }
 0x1f8   : > { %v2605_v63 = vpop.f32.mrf.mxu0 }
 0x1f9   : > { %v2718_v30 = vpop.f32.mrf.mxu1  ;;  %v2826_v33 = vpack.c.bf16 %v2782_v53, %v2778_v56  ;;  %v2606_v35 = vadd.f32 %v2605_v63, %v2493_v54  ;;  %v2717_v27 = vadd.f32 %v2716_v21, %v2604_v2  ;;  %v2785_v13 = vmax.f32 %v2715_v51, 0.0  ;;  %v11539_v56 = vld [vmem:[#allocation11_spill] sm:$0xff] }
 0x1fa   : > { %v2607_v29 = vpop.f32.mrf.mxu0  ;;  %v2515_v53 = vadd.f32 %v11539_v56, %v2402_v38  ;;  %v11540_v51 = vmov 0  }
 0x1fb   : > { %v2720_v18 = vpop.f32.mrf.mxu1  ;;  %v2719_v15 = vadd.f32 %v2718_v30, %v2606_v35  ;;  %v2608_v20 = vadd.f32 %v2607_v29, %v2495_v36  ;;  %7026 = vmatprep.mubr.msk.bf16.mxu1 %vm1814_vm0, %v2826_v33  ;;  %v2786_v39 = vmax.f32 %v2717_v27, 0.0 }
 0x1fc   : > { %v2611_v48 = vpop.f32.mrf.mxu0  ;;  %3232 = vmatmul.mubr.bf16.gmra.mxu1 %v2825_v28 }
 0x1fd   : > { %v2724_v17 = vpop.f32.mrf.mxu1  ;;  %v2721_v16 = vadd.f32 %v2720_v18, %v2608_v20  ;;  %v2789_v45 = vmax.f32 %v2719_v15, 0.0  ;;  %v2612_v11 = vadd.f32 %v2611_v48, %v10003_v12 }
 0x1fe   : > { %v2613_v7 = vpop.f32.mrf.mxu0 }
 0x1ff   : > { %v2726_v49 = vpop.f32.mrf.mxu1  ;;  %v2790_v1 = vmax.f32 %v2721_v16, 0.0  ;;  %v2614_v46 = vadd.f32 %v2613_v7, %v10010_v47  ;;  %v2829_v37 = vpack.c.bf16 %v2789_v45, %v2785_v13  ;;  %v2725_v47 = vadd.f32 %v2724_v17, %v2612_v11 }
 0x200   : > { %v2615_v61 = vpop.f32.mrf.mxu0 }
 0x201   : > { %v2728_v24 = vpop.f32.mrf.mxu1  ;;  %v2830_v32 = vpack.c.bf16 %v2790_v1, %v2786_v39  ;;  %v2616_v62 = vadd.f32 %v2615_v61, %v2503_v19  ;;  %v2727_v60 = vadd.f32 %v2726_v49, %v2614_v46  ;;  %v2793_v5 = vmax.f32 %v2725_v47, 0.0  ;;  %v3436_v19 = vld [vmem:[%s11473_s6 + $0x20] sm:$0x33]  ;;  %v3437_v39 = vld [vmem:[%s11473_s6 + $0x28] sm:$0x33] }
 0x202   : > { %v2617_v57 = vpop.f32.mrf.mxu0  ;;  %v7035_v1 = vcombine.high %v3436_v19, %v3436_v19  ;;  %v7034_v46 = vcombine.low %v3436_v19, %v3436_v19  ;;  %v7037_v13 = vcombine.high %v3437_v39, %v3437_v39  ;;  %v7036_v11 = vcombine.low %v3437_v39, %v3437_v39  ;;  %v7841_v61 = vld [vmem:[%s11473_s6 + $0x4] ss:$16 sps:$4 sm:$0xff]  }
 0x203   : > { %v2730_v26 = vpop.f32.mrf.mxu1  ;;  %v2729_v4 = vadd.f32 %v2728_v24, %v2616_v62  ;;  %v2618_v41 = vadd.f32 %v2617_v57, %v2505_v59  ;;  %7027 = vmatprep.mubr.msk.bf16.mxu1 %vm1814_vm0, %v2830_v32  ;;  %v2794_v22 = vmax.f32 %v2727_v60, 0.0  ;;  %v7844_v24 = vld [vmem:[%s11473_s6 + $0xc] ss:$16 sps:$4 sm:$0xff]   ;;  %v7842_v57 = vld [vmem:[%s11473_s6 + $0x8] ss:$16 sps:$4 sm:$0xff]  }
 0x204   : > { %v2621_v10 = vpop.f32.mrf.mxu0  ;;  %3240 = vmatmul.mubr.bf16.gmra.mxu1 %v2829_v37  ;;  %7038 = vmatprep.subr.msk.bf16.mxu0 %vm3515_vm1, %v7035_v1  ;;  %v3517_v32 = vsel %vm3515_vm1, %v7034_v46, 0  ;;  %v3523_v62 = vsel %vm3515_vm1, %v7036_v11, 0  ;;  %v7839_v37 = vld [vmem:[%s11473_s6] ss:$16 sps:$4 sm:$0xff]  }
 0x205   : > { %v2734_v12 = vpop.f32.mrf.mxu1  ;;  %v2731_v50 = vadd.f32 %v2730_v26, %v2618_v41  ;;  %v2797_v34 = vmax.f32 %v2729_v4, 0.0  ;;  %v2622_v8 = vadd.f32 %v2621_v10, %v11538_v0  ;;  %7047 = vmatprep.subr.msk.bf16.mxu1 %vm3515_vm1, %v7037_v13  ;;  %3541 = vmatpush1.bf16.msra.mxu0 %v3517_v32 }
 0x206   : > { %v2623_v25 = vpop.f32.mrf.mxu0  ;;  %3654 = vmatpush1.bf16.msra.mxu1 %v3523_v62  ;;  %3542 = vmatprep.subr.bf16.mxu0 %v7841_v61 }
 0x207   : > { %v2736_v40 = vpop.f32.mrf.mxu1  ;;  %v2798_v9 = vmax.f32 %v2731_v50, 0.0  ;;  %v2624_v3 = vadd.f32 %v2623_v25, %v11537_v58  ;;  %v2833_v43 = vpack.c.bf16 %v2797_v34, %v2793_v5  ;;  %v2735_v33 = vadd.f32 %v2734_v12, %v2622_v8  ;;  %3655 = vmatprep.subr.bf16.mxu1 %v7844_v24  ;;  %v10132_v34 = vld [vmem:[%s11472_s5] ss:$0 sm:$0xff] }
 0x208   : > { %v2625_v21 = vpop.f32.mrf.mxu0 }
 0x209   : > { %v2738_v54 = vpop.f32.mrf.mxu1  ;;  %v2834_v2 = vpack.c.bf16 %v2798_v9, %v2794_v22  ;;  %v2626_v42 = vadd.f32 %v2625_v21, %v2513_v55  ;;  %v2737_v63 = vadd.f32 %v2736_v40, %v2624_v3  ;;  %v2801_v27 = vmax.f32 %v2735_v33, 0.0  ;;  %3543 = vmatpush1.bf16.msra.mxu0 %v7839_v37 }
 0x20a   : > { %v2627_v44 = vpop.f32.mrf.mxu0  ;;  %3656 = vmatpush1.bf16.msra.mxu1 %v7842_v57 }
 0x20b   : > { %v2739_v30 = vadd.f32 %v2738_v54, %v2626_v42  ;;  %v2628_v36 = vadd.f32 %v2627_v44, %v2515_v53  ;;  %7028 = vmatprep.mubr.msk.bf16.mxu1 %vm1814_vm0, %v2834_v2  ;;  %v2740_v35 = vpop.f32.mrf.mxu1  ;;  %v2802_v18 = vmax.f32 %v2737_v63, 0.0 }
 0x20c   : > { %3248 = vmatmul.mubr.bf16.gmra.mxu1 %v2833_v43 }
 0x20d   : > { %v2741_v28 = vadd.f32 %v2740_v35, %v2628_v36  ;;  %v2805_v29 = vmax.f32 %v2739_v30, 0.0 }
 0x20f   : > { %v2806_v52 = vmax.f32 %v2741_v28, 0.0  ;;  %v2837_v20 = vpack.c.bf16 %v2805_v29, %v2801_v27 }
 0x211   : > { %v2838_v15 = vpack.c.bf16 %v2806_v52, %v2802_v18 }
 0x213   : > { %7029 = vmatprep.mubr.msk.bf16.mxu1 %vm1814_vm0, %v2838_v15 }
 0x214   : > { %3256 = vmatmul.mubr.bf16.gmra.mxu1 %v2837_v20 }
 0x215   : > { %3673 = vmatprep.mubr.bf16.mxu1 %v11540_v51 }
 0x21c   : > { %v7393_v48 = vpop.f32.mrf.mxu0 }
 0x21e   : > { %v7394_v17 = vpop.f32.mrf.mxu0 }
 0x21f   : > { %v7395_v38 = vadd.f32 %v7394_v17, %v7393_v48 }
 0x220   : > { %v7396_v14 = vpop.f32.mrf.mxu0 }
 0x221   : > { %v3105_v40 = vadd.f32 %v7395_v38, %v10132_v34 }
 0x222   : > { %v7397_v16 = vpop.f32.mrf.mxu0 }
 0x223   : > { %v7398_v25 = vadd.f32 %v7397_v16, %v7396_v14 }
 0x224   : > { %v7399_v45 = vpop.f32.mrf.mxu0 }
 0x225   : > { %v3108_v5 = vadd.f32 %v7398_v25, %v10132_v34 }
 0x226   : > { %v7400_v7 = vpop.f32.mrf.mxu0 }
 0x227   : > { %v7401_v58 = vadd.f32 %v7400_v7, %v7399_v45 }
 0x228   : > { %v7402_v49 = vpop.f32.mrf.mxu0 }
 0x229   : > { %v3113_v42 = vadd.f32 %v7401_v58, %v10132_v34 }
 0x22a   : > { %v7403_v59 = vpop.f32.mrf.mxu0 }
 0x22b   : > { %v7404_v53 = vadd.f32 %v7403_v59, %v7402_v49 }
 0x22c   : > { %v7405_v26 = vpop.f32.mrf.mxu0 }
 0x22d   : > { %v3116_v28 = vadd.f32 %v7404_v53, %v10132_v34 }
 0x22e   : > { %v7406_v31 = vpop.f32.mrf.mxu0 }
 0x22f   : > { %v7407_v33 = vadd.f32 %v7406_v31, %v7405_v26 }
 0x230   : > { %v7408_v60 = vpop.f32.mrf.mxu0 }
 0x231   : > { %v3121_v17 = vadd.f32 %v7407_v33, %v10132_v34 }
 0x232   : > { %v7409_v4 = vpop.f32.mrf.mxu0 }
 0x233   : > { %v7410_v20 = vadd.f32 %v7409_v4, %v7408_v60 }
 0x234   : > { %v7411_v41 = vpop.f32.mrf.mxu0 }
 0x235   : > { %v3124_v1 = vadd.f32 %v7410_v20, %v10132_v34 }
 0x236   : > { %v7412_v47 = vpop.f32.mrf.mxu0 }
 0x237   : > { %v7413_v19 = vadd.f32 %v7412_v47, %v7411_v41 }
 0x238   : > { %v10121_v10 = vpop.f32.mrf.mxu0 }
 0x239   : > { %v3129_v37 = vadd.f32 %v7413_v19, %v10132_v34 }
 0x23a   : > { %v10123_v12 = vpop.f32.mrf.mxu0 }
 0x23b   : > { %v7416_v32 = vadd.f32 %v10123_v12, %v10121_v10 }
 0x23c   : > { %v10125_v6 = vpop.f32.mrf.mxu0 }
 0x23d   : > { %v3132_v12 = vadd.f32 %v7416_v32, %v10132_v34 }
 0x23e   : > { %v10127_v50 = vpop.f32.mrf.mxu0 }
 0x23f   : > { %v7419_v47 = vadd.f32 %v10127_v50, %v10125_v6 }
 0x240   : > { %v10136_v23 = vpop.f32.mrf.mxu0 }
 0x242   : > { %v10151_v0 = vpop.f32.mrf.mxu0 }
 0x243   : > { %v7422_v6 = vadd.f32 %v10151_v0, %v10136_v23 }
 0x244   : > { %v10159_v43 = vpop.f32.mrf.mxu0 }
 0x246   : > { %v10167_v29 = vpop.f32.mrf.mxu0 }
 0x247   : > { %v7425_v23 = vadd.f32 %v10167_v29, %v10159_v43 }
 0x248   : > { %v10175_v14 = vpop.f32.mrf.mxu0 }
 0x249   : > { %v3145_v29 = vadd.f32 %v7425_v23, %v10132_v34 }
 0x24a   : > { %v7427_v13 = vpop.f32.mrf.mxu0 }
 0x24c   : > { %v7429_v26 = vpop.f32.mrf.mxu0 }
 0x24e   : > { %v7430_v25 = vpop.f32.mrf.mxu0 }
 0x29c   : > { %v3201_v55 = vpop.f32.mrf.mxu1 }
 0x29d   : > { %v10145_v22 = vadd.f32 %v3201_v55, %v3105_v40 }
 0x29e   : > { %v3203_v9 = vpop.f32.mrf.mxu1 }
 0x29f   : > { %3264 = vst [vmem:[%s10143_s12] sm:$0xff] %v10145_v22  ;;  %v3280_v3 = vmul.f32 0.5, %v10145_v22 }
 0x2a0   : > { %v3204_v8 = vpop.f32.mrf.mxu1 }
 0x2a1   : > { %v3296_v21 = vmul.f32 1.442695, %v3280_v3  ;;  %v10153_v54 = vadd.f32 %v3204_v8, %v3108_v5  ;;  %v3137_v3 = vadd.f32 %v7419_v47, %v10132_v34  ;;  %v7432_v8 = vpop.f32.mrf.mxu0 }
 0x2a2   : > { %v3206_v56 = vpop.f32.mrf.mxu1 }
 0x2a3   : > { %8095 = vpow2.f32 %v3296_v21  ;;  %3265 = vst [vmem:[%s10143_s12 + $0x8] sm:$0xff] %v10153_v54  ;;  %v3281_v2 = vmul.f32 0.5, %v10153_v54 }
 0x2a4   : > { %v3209_v44 = vpop.f32.mrf.mxu1 }
 0x2a5   : > { %v3298_v63 = vmul.f32 1.442695, %v3281_v2  ;;  %v10161_v30 = vadd.f32 %v3209_v44, %v3113_v42  ;;  %v3140_v42 = vadd.f32 %v7422_v6, %v10132_v34 }
 0x2a6   : > { %v3211_v36 = vpop.f32.mrf.mxu1 }
 0x2a7   : > { %8097 = vpow2.f32 %v3298_v63  ;;  %3266 = vst [vmem:[%s10143_s12 + $0x10] sm:$0xff] %v10161_v30  ;;  %v3282_v35 = vmul.f32 0.5, %v10161_v30  ;;  %v7433_v63 = vpop.f32.mrf.mxu0 }
 0x2a8   : > { %v3212_v18 = vpop.f32.mrf.mxu1 }
 0x2a9   : > { %v3300_v52 = vmul.f32 1.442695, %v3282_v35  ;;  %v10169_v27 = vadd.f32 %v3212_v18, %v3116_v28  ;;  %v7428_v18 = vadd.f32 %v7427_v13, %v10175_v14 }
 0x2aa   : > { %v3214_v15 = vpop.f32.mrf.mxu1 }
 0x2ab   : > { %8099 = vpow2.f32 %v3300_v52  ;;  %3267 = vst [vmem:[%s10143_s12 + $0x18] sm:$0xff] %v10169_v27  ;;  %v3283_v48 = vmul.f32 0.5, %v10169_v27  ;;  %v7435_v15 = vpop.f32.mrf.mxu0 }
 0x2ac   : > { %v3217_v16 = vpop.f32.mrf.mxu1 }
 0x2ad   : > { %v3302_v45 = vmul.f32 1.442695, %v3283_v48  ;;  %v10177_v7 = vadd.f32 %v3217_v16, %v3121_v17 }
 0x2ae   : > { %v3219_v49 = vpop.f32.mrf.mxu1 }
 0x2af   : > { %8101 = vpow2.f32 %v3302_v45  ;;  %3268 = vst [vmem:[%s10143_s12 + $0x20] sm:$0xff] %v10177_v7  ;;  %v3284_v39 = vmul.f32 0.5, %v10177_v7  ;;  %v7431_v45 = vadd.f32 %v7430_v25, %v7429_v26  ;;  %v3148_v49 = vadd.f32 %v7428_v18, %v10132_v34 }
 0x2b0   : > { %v8096_v46 = vpop.eup %8095  ;;  %v3220_v11 = vpop.f32.mrf.mxu1 }
 0x2b1   : > { %v3304_v61 = vmul.f32 1.442695, %v3284_v39  ;;  %v10183_v24 = vadd.f32 %v3220_v11, %v3124_v1  ;;  %3344 = vrot.lane.b32.xlu0 %v8096_v46, %s8585_s13  ;;  %v7436_v39 = vpop.f32.mrf.mxu0  ;;  %v3153_v32 = vadd.f32 %v7431_v45, %v10132_v34 }
 0x2b2   : > { %v3222_v59 = vpop.f32.mrf.mxu1 }
 0x2b3   : > { %8103 = vpow2.f32 %v3304_v61  ;;  %3269 = vst [vmem:[%s10143_s12 + $0x28] sm:$0xff] %v10183_v24  ;;  %v3285_v62 = vmul.f32 0.5, %v10183_v24  ;;  %v7434_v61 = vadd.f32 %v7433_v63, %v7432_v8 }
 0x2b4   : > { %v8098_v57 = vpop.eup %8097  ;;  %v3225_v31 = vpop.f32.mrf.mxu1 }
 0x2b5   : > { %v3306_v60 = vmul.f32 1.442695, %v3285_v62  ;;  %v10192_v4 = vadd.f32 %v3225_v31, %v3129_v37  ;;  %3346 = vrot.lane.b32.xlu0 %v8098_v57, %s8585_s13  ;;  %v7438_v37 = vpop.f32.mrf.mxu0 }
 0x2b6   : > { %v3227_v41 = vpop.f32.mrf.mxu1 }
 0x2b7   : > { %8105 = vpow2.f32 %v3306_v60  ;;  %3270 = vst [vmem:[%s10143_s12 + $0x30] sm:$0xff] %v10192_v4  ;;  %v3286_v10 = vmul.f32 0.5, %v10192_v4  ;;  %v7437_v41 = vadd.f32 %v7436_v39, %v7435_v15  ;;  %v7853_v15 = vld [vmem:[%s11475_s8 + $0x50c] ss:$28 sps:$4 sm:$0xff]  }
 0x2b8   : > { %v8100_v38 = vpop.eup %8099  ;;  %v3228_v40 = vpop.f32.mrf.mxu1  ;;  %5124 = vmatprep.subr.bf16.mxu1 %v7853_v15 }
 0x2b9   : > { %v3308_v55 = vmul.f32 1.442695, %v3286_v10  ;;  %v10201_v9 = vadd.f32 %v3228_v40, %v3132_v12  ;;  %3348 = vrot.lane.b32.xlu1 %v8100_v38, %s8585_s13  ;;  %v3156_v10 = vadd.f32 %v7434_v61, %v10132_v34  ;;  %v7439_v38 = vpop.f32.mrf.mxu0 }
 0x2ba   : > { %v3230_v58 = vpop.f32.mrf.mxu1  ;;  %v7440_v6 = vadd.f32 %v7439_v38, %v7438_v37  ;;  %v547_v37 = vld [vmem:[%s10284_s21 + $0x18] sm:$0xff] }
 0x2bb   : > { %8107 = vpow2.f32 %v3308_v55  ;;  %3271 = vst [vmem:[%s10143_s12 + $0x38] sm:$0xff] %v10201_v9  ;;  %v3287_v50 = vmul.f32 0.5, %v10201_v9 }
 0x2bc   : > { %v8102_v5 = vpop.eup %8101  ;;  %v3233_v21 = vpop.f32.mrf.mxu1 }
 0x2bd   : > { %v3310_v56 = vmul.f32 1.442695, %v3287_v50  ;;  %v10210_v53 = vadd.f32 %v3233_v21, %v3137_v3  ;;  %3350 = vrot.lane.b32.xlu1 %v8102_v5, %s8585_s13  ;;  %v3161_v3 = vadd.f32 %v7437_v41, %v10132_v34  ;;  %v7848_v41 = vld [vmem:[%s11475_s8 + $0x150] ss:$28 sps:$4 sm:$0xff]  }
 0x2be   : > { %v3235_v2 = vpop.f32.mrf.mxu1 }
 0x2bf   : > { %8109 = vpow2.f32 %v3310_v56  ;;  %3272 = vst [vmem:[%s10143_s12 + $0x40] sm:$0xff] %v10210_v53  ;;  %v3288_v0 = vmul.f32 0.5, %v10210_v53 }
 0x2c0   : > { %v8104_v44 = vpop.eup %8103  ;;  %v3236_v36 = vpop.f32.mrf.mxu1 }
 0x2c1   : > { %v3312_v33 = vmul.f32 1.442695, %v3288_v0  ;;  %v10219_v35 = vadd.f32 %v3236_v36, %v3140_v42  ;;  %3352 = vrot.lane.b32.xlu0 %v8104_v44, %s8585_s13  ;;  %v3164_v0 = vadd.f32 %v7440_v6, %v10132_v34 }
 0x2c2   : > { %v3238_v28 = vpop.f32.mrf.mxu1 }
 0x2c3   : > { %8111 = vpow2.f32 %v3312_v33  ;;  %3273 = vst [vmem:[%s10143_s12 + $0x48] sm:$0xff] %v10219_v35  ;;  %v3289_v43 = vmul.f32 0.5, %v10219_v35 }
 0x2c4   : > { %v8106_v52 = vpop.eup %8105  ;;  %v3241_v20 = vpop.f32.mrf.mxu1 }
 0x2c5   : > { %v3314_v48 = vmul.f32 1.442695, %v3289_v43  ;;  %v10227_v17 = vadd.f32 %v3241_v20, %v3145_v29  ;;  %3354 = vrot.lane.b32.xlu1 %v8106_v52, %s8585_s13  ;;  %v7847_v52 = vld [vmem:[%s11475_s8 + $0x18c] ss:$28 sps:$4 sm:$0xff]  }
 0x2c6   : > { %v3243_v16 = vpop.f32.mrf.mxu1  ;;  %5011 = vmatprep.subr.bf16.mxu0 %v7847_v52  ;;  %v551_v52 = vld [vmem:[%s10284_s21 + $0x38] sm:$0xff] }
 0x2c7   : > { %8113 = vpow2.f32 %v3314_v48  ;;  %3274 = vst [vmem:[%s10143_s12 + $0x50] sm:$0xff] %v10227_v17  ;;  %v3290_v14 = vmul.f32 0.5, %v10227_v17  ;;  %v544_v16 = vld [vmem:[%s10284_s21] sm:$0xff] }
 0x2c8   : > { %v8108_v19 = vpop.eup %8107  ;;  %v3244_v1 = vpop.f32.mrf.mxu1 }
 0x2c9   : > { %v3316_v46 = vmul.f32 1.442695, %v3290_v14  ;;  %v10234_v13 = vadd.f32 %v3244_v1, %v3148_v49  ;;  %3356 = vrot.lane.b32.xlu0 %v8108_v19, %s8585_s13  ;;  %v545_v14 = vld [vmem:[%s10284_s21 + $0x8] sm:$0xff] }
 0x2ca   : > { %v3246_v11 = vpop.f32.mrf.mxu1 }
 0x2cb   : > { %8115 = vpow2.f32 %v3316_v46  ;;  %3275 = vst [vmem:[%s10143_s12 + $0x58] sm:$0xff] %v10234_v13  ;;  %v3291_v59 = vmul.f32 0.5, %v10234_v13  ;;  %v546_v11 = vld [vmem:[%s10284_s21 + $0x10] sm:$0xff] }
 0x2cc   : > { %v8110_v62 = vpop.eup %8109  ;;  %v3249_v57 = vpop.f32.mrf.mxu1 }
 0x2cd   : > { %v3318_v26 = vmul.f32 1.442695, %v3291_v59  ;;  %v10241_v31 = vadd.f32 %v3249_v57, %v3153_v32  ;;  %3358 = vrot.lane.b32.xlu1 %v8110_v62, %s8585_s13  ;;  %v7845_v32 = vld [vmem:[%s11475_s8 + $0x188] ss:$28 sps:$4 sm:$0xff]   ;;  %v7850_v57 = vld [vmem:[%s11475_s8 + $0x154] ss:$28 sps:$4 sm:$0xff]  }
 0x2ce   : > { %v3251_v60 = vpop.f32.mrf.mxu1  ;;  %v7851_v62 = vld [vmem:[%s11475_s8 + $0x508] ss:$28 sps:$4 sm:$0xff]  }
 0x2cf   : > { %8117 = vpow2.f32 %v3318_v26  ;;  %3276 = vst [vmem:[%s10143_s12 + $0x60] sm:$0xff] %v10241_v31  ;;  %v3292_v47 = vmul.f32 0.5, %v10241_v31 }
 0x2d0   : > { %v8112_v12 = vpop.eup %8111  ;;  %v3252_v25 = vpop.f32.mrf.mxu1 }
 0x2d1   : > { %v3320_v40 = vmul.f32 1.442695, %v3292_v47  ;;  %v10248_v55 = vadd.f32 %v3252_v25, %v3156_v10  ;;  %3360 = vrot.lane.b32.xlu0 %v8112_v12, %s8585_s13  ;;  %v7860_v47 = vld [vmem:[%s11475_s8 + $0x4d0] ss:$28 sps:$4 sm:$0xff]   ;;  %v7856_v10 = vld [vmem:[%s11475_s8 + $0x11c] ss:$28 sps:$4 sm:$0xff]  }
 0x2d2   : > { %v3254_v58 = vpop.f32.mrf.mxu1  ;;  %v7871_v12 = vld [vmem:[%s11475_s8 + $0x49c] ss:$28 sps:$4 sm:$0xff]  }
 0x2d3   : > { %8119 = vpow2.f32 %v3320_v40  ;;  %3277 = vst [vmem:[%s10143_s12 + $0x68] sm:$0xff] %v10248_v55  ;;  %v3293_v50 = vmul.f32 0.5, %v10248_v55  ;;  %v548_v40 = vld [vmem:[%s10284_s21 + $0x20] sm:$0xff] }
 0x2d4   : > { %v8114_v5 = vpop.eup %8113  ;;  %v3257_v8 = vpop.f32.mrf.mxu1 }
 0x2d5   : > { %v3322_v21 = vmul.f32 1.442695, %v3293_v50  ;;  %v10255_v56 = vadd.f32 %v3257_v8, %v3161_v3  ;;  %3362 = vrot.lane.b32.xlu1 %v8114_v5, %s8585_s13  ;;  %v7854_v50 = vld [vmem:[%s11475_s8 + $0x118] ss:$28 sps:$4 sm:$0xff]   ;;  %v549_v5 = vld [vmem:[%s10284_s21 + $0x28] sm:$0xff] }
 0x2d6   : > { %v3259_v2 = vpop.f32.mrf.mxu1  ;;  %v7869_v3 = vld [vmem:[%s11475_s8 + $0x498] ss:$28 sps:$4 sm:$0xff]  }
 0x2d7   : > { %8121 = vpow2.f32 %v3322_v21  ;;  %3278 = vst [vmem:[%s10143_s12 + $0x70] sm:$0xff] %v10255_v56  ;;  %v3294_v23 = vmul.f32 0.5, %v10255_v56 }
 0x2d8   : > { %v8116_v42 = vpop.eup %8115  ;;  %v3260_v44 = vpop.f32.mrf.mxu1 }
 0x2d9   : > { %v3324_v63 = vmul.f32 1.442695, %v3294_v23  ;;  %v10262_v36 = vadd.f32 %v3260_v44, %v3164_v0  ;;  %3364 = vrot.lane.b32.xlu0 %v8116_v42, %s8585_s13  ;;  %v7857_v23 = vld [vmem:[%s11475_s8 + $0xe0] ss:$28 sps:$4 sm:$0xff]   ;;  %v7865_v42 = vld [vmem:[%s11475_s8 + $0xac] ss:$28 sps:$4 sm:$0xff]  }
 0x2da   : > { %v3262_v33 = vpop.f32.mrf.mxu1  ;;  %v7878_v0 = vld [vmem:[%s11475_s8 + $0x460] ss:$28 sps:$4 sm:$0xff]   ;;  %v7886_v44 = vld [vmem:[%s11475_s8 + $0x42c] ss:$28 sps:$4 sm:$0xff]  }
 0x2db   : > { %8123 = vpow2.f32 %v3324_v63  ;;  %3279 = vst [vmem:[%s10143_s12 + $0x78] sm:$0xff] %v10262_v36  ;;  %v3295_v28 = vmul.f32 0.5, %v10262_v36 }
 0x2dc   : > { %v8118_v18 = vpop.eup %8117 }
 0x2dd   : > { %v3326_v43 = vmul.f32 1.442695, %v3295_v28  ;;  %3366 = vrot.lane.b32.xlu1 %v8118_v18, %s8585_s13  ;;  %v550_v28 = vld [vmem:[%s10284_s21 + $0x30] sm:$0xff] }
 0x2df   : > { %8125 = vpow2.f32 %v3326_v43 }
 0x2e0   : > { %v8120_v34 = vpop.eup %8119 }
 0x2e1   : > { %3368 = vrot.lane.b32.xlu0 %v8120_v34, %s8585_s13  ;;  %v7863_v34 = vld [vmem:[%s11475_s8 + $0xa8] ss:$28 sps:$4 sm:$0xff]  }
 0x2e4   : > { %v8122_v29 = vpop.eup %8121 }
 0x2e5   : > { %3370 = vrot.lane.b32.xlu1 %v8122_v29, %s8585_s13  ;;  %v7884_v29 = vld [vmem:[%s11475_s8 + $0x428] ss:$28 sps:$4 sm:$0xff]  }
 0x2e8   : > { %v8124_v20 = vpop.eup %8123 }
 0x2e9   : > { %3372 = vrot.lane.b32.xlu0 %v8124_v20, %s8585_s13 }
 0x2ec   : > { %v8126_v48 = vpop.eup %8125 }
 0x2ed   : > { %3374 = vrot.lane.b32.xlu1 %v8126_v48, %s8585_s13 }
 0x323   : > { %v3345_v45 = vpop.permute.xlu0 %3344 }
 0x324   : > { %v3392_v49 = vmul.f32 %v3345_v45, %v544_v16  ;;  %v7866_v16 = vld [vmem:[%s11475_s8 + $0x70] ss:$28 sps:$4 sm:$0xff]  }
 0x325   : > { %v7893_v45 = vld [vmem:[%s11475_s8 + $0x3f0] ss:$28 sps:$4 sm:$0xff]  }
 0x326   : > { %v3408_v1 = vadd.f32 %v3392_v49, %v10145_v22  ;;  %v7862_v22 = vld [vmem:[%s11475_s8 + $0x4d4] ss:$28 sps:$4 sm:$0xff]   ;;  %v7904_v49 = vld [vmem:[%s11475_s8 + $0x3bc] ss:$28 sps:$4 sm:$0xff]  }
 0x327   : > { %v3347_v19 = vpop.permute.xlu0 %3346 }
 0x328   : > { %v3393_v39 = vmul.f32 %v3347_v19, %v545_v14  ;;  %v7874_v14 = vld [vmem:[%s11475_s8 + $0x3c] ss:$28 sps:$4 sm:$0xff]  }
 0x32a   : > { %v3409_v46 = vadd.f32 %v3393_v39, %v10153_v54 }
 0x32b   : > { %v3349_v61 = vpop.permute.xlu1 %3348 }
 0x32c   : > { %v3424_v59 = vpack.c.bf16 %v3409_v46, %v3408_v1  ;;  %v3394_v54 = vmul.f32 %v3349_v61, %v546_v11  ;;  %v552_v1 = vld [vmem:[%s10284_s21 + $0x40] sm:$0xff]  ;;  %v7872_v61 = vld [vmem:[%s11475_s8 + $0x38] ss:$28 sps:$4 sm:$0xff]  }
 0x32e   : > { %7039 = vmatmul.mubr.msk.bf16.vlgmr.msra.gmra.mxu0 %vm3490_vm2, %v3424_v59  ;;  %7048 = vmatmul.mubr.msk.bf16.vlgmr.msra.gmra.mxu1 %vm3490_vm2, %v3424_v59  ;;  %v3410_v38 = vadd.f32 %v3394_v54, %v10161_v30  ;;  %v7859_v30 = vld [vmem:[%s11475_s8 + $0xe4] ss:$28 sps:$4 sm:$0xff]   ;;  %v7902_v59 = vld [vmem:[%s11475_s8 + $0x3b8] ss:$28 sps:$4 sm:$0xff]  }
 0x32f   : > { %v3351_v26 = vpop.permute.xlu1 %3350  ;;  %3570 = vmatprep.mubr.bf16.mxu0 %v11540_v51  ;;  %3683 = vmatprep.mubr.bf16.mxu1 %v11540_v51 }
 0x330   : > { %v3395_v60 = vmul.f32 %v3351_v26, %v547_v37  ;;  %5012 = vmatpush1.bf16.msra.mxu0 %v7845_v32  ;;  %5125 = vmatpush1.bf16.msra.mxu1 %v7851_v62  ;;  %v553_v32 = vld [vmem:[%s10284_s21 + $0x48] sm:$0xff] }
 0x331   : > { %5013 = vmatprep.subr.bf16.mxu0 %v7850_v57  ;;  %5126 = vmatprep.subr.bf16.mxu1 %v7862_v22  ;;  %v7875_v57 = vld [vmem:[%s11475_s8] ss:$28 sps:$4 sm:$0xff]   ;;  %v7883_v22 = vld [vmem:[%s11475_s8 + $0x34c] ss:$28 sps:$4 sm:$0xff]  }
 0x332   : > { %v3411_v25 = vadd.f32 %v3395_v60, %v10169_v27  ;;  %v7880_v27 = vld [vmem:[%s11475_s8 + $0x464] ss:$28 sps:$4 sm:$0xff]   ;;  %v554_v60 = vld [vmem:[%s10284_s21 + $0x50] sm:$0xff] }
 0x333   : > { %v3353_v58 = vpop.permute.xlu0 %3352 }
 0x334   : > { %v3425_v6 = vpack.c.bf16 %v3411_v25, %v3410_v38  ;;  %5014 = vmatpush1.bf16.msra.mxu0 %v7848_v41  ;;  %5127 = vmatpush1.bf16.msra.mxu1 %v7860_v47  ;;  %v3396_v8 = vmul.f32 %v3353_v58, %v548_v40  ;;  %v7889_v38 = vld [vmem:[%s11475_s8 + $0x314] ss:$28 sps:$4 sm:$0xff]   ;;  %v7892_v58 = vld [vmem:[%s11475_s8 + $0x2dc] ss:$28 sps:$4 sm:$0xff]  }
 0x335   : > { %5015 = vmatprep.subr.bf16.mxu0 %v7856_v10  ;;  %5128 = vmatprep.subr.bf16.mxu1 %v7871_v12  ;;  %v7881_v10 = vld [vmem:[%s11475_s8 + $0x348] ss:$28 sps:$4 sm:$0xff]   ;;  %v555_v12 = vld [vmem:[%s10284_s21 + $0x58] sm:$0xff]  ;;  %v7887_v40 = vld [vmem:[%s11475_s8 + $0x310] ss:$28 sps:$4 sm:$0xff]  }
 0x336   : > { %7040 = vmatmul.mubr.msk.bf16.gmra.mxu0 %vm3490_vm2, %v3425_v6  ;;  %7049 = vmatmul.mubr.msk.bf16.gmra.mxu1 %vm3490_vm2, %v3425_v6  ;;  %v3412_v63 = vadd.f32 %v3396_v8, %v10177_v7  ;;  %v7868_v7 = vld [vmem:[%s11475_s8 + $0x74] ss:$28 sps:$4 sm:$0xff]   ;;  %v557_v8 = vld [vmem:[%s10284_s21 + $0x68] sm:$0xff] }
 0x337   : > { %v3355_v21 = vpop.permute.xlu1 %3354  ;;  %3580 = vmatprep.mubr.bf16.mxu0 %v11540_v51  ;;  %3693 = vmatprep.mubr.bf16.mxu1 %v11540_v51 }
 0x338   : > { %v3397_v2 = vmul.f32 %v3355_v21, %v549_v5  ;;  %5016 = vmatpush1.bf16.msra.mxu0 %v7854_v50  ;;  %5129 = vmatpush1.bf16.msra.mxu1 %v7869_v3  ;;  %v556_v3 = vld [vmem:[%s10284_s21 + $0x60] sm:$0xff] }
 0x339   : > { %5017 = vmatprep.subr.bf16.mxu0 %v7859_v30  ;;  %5130 = vmatprep.subr.bf16.mxu1 %v7880_v27  ;;  %v7890_v27 = vld [vmem:[%s11475_s8 + $0x2d8] ss:$28 sps:$4 sm:$0xff]   ;;  %v7898_v21 = vld [vmem:[%s11475_s8 + $0x2a4] ss:$28 sps:$4 sm:$0xff]  }
 0x33a   : > { %v3413_v33 = vadd.f32 %v3397_v2, %v10183_v24  ;;  %v7895_v24 = vld [vmem:[%s11475_s8 + $0x3f4] ss:$28 sps:$4 sm:$0xff]  }
 0x33b   : > { %v3357_v18 = vpop.permute.xlu0 %3356 }
 0x33c   : > { %v3426_v43 = vpack.c.bf16 %v3413_v33, %v3412_v63  ;;  %5018 = vmatpush1.bf16.msra.mxu0 %v7857_v23  ;;  %5131 = vmatpush1.bf16.msra.mxu1 %v7878_v0  ;;  %v3398_v15 = vmul.f32 %v3357_v18, %v550_v28  ;;  %v7896_v23 = vld [vmem:[%s11475_s8 + $0x2a0] ss:$28 sps:$4 sm:$0xff]   ;;  %v7901_v0 = vld [vmem:[%s11475_s8 + $0x26c] ss:$28 sps:$4 sm:$0xff]   ;;  %v558_v63 = vld [vmem:[%s10284_s21 + $0x70] sm:$0xff] }
 0x33d   : > { %5019 = vmatprep.subr.bf16.mxu0 %v7865_v42  ;;  %5132 = vmatprep.subr.bf16.mxu1 %v7886_v44  ;;  %v7899_v18 = vld [vmem:[%s11475_s8 + $0x268] ss:$28 sps:$4 sm:$0xff]  }
 0x33e   : > { %7041 = vmatmul.mubr.msk.bf16.gmra.mxu0 %vm3490_vm2, %v3426_v43  ;;  %7050 = vmatmul.mubr.msk.bf16.gmra.mxu1 %vm3490_vm2, %v3426_v43  ;;  %v3414_v19 = vadd.f32 %v3398_v15, %v10192_v4  ;;  %v7877_v4 = vld [vmem:[%s11475_s8 + $0x4] ss:$28 sps:$4 sm:$0xff]   ;;  %v559_v43 = vld [vmem:[%s10284_s21 + $0x78] sm:$0xff]  ;;  %v7905_v15 = vld [vmem:[%s11475_s8 + $0x230] ss:$28 sps:$4 sm:$0xff]  }
 0x33f   : > { %v3359_v20 = vpop.permute.xlu1 %3358  ;;  %3590 = vmatprep.mubr.bf16.mxu0 %v11540_v51  ;;  %3703 = vmatprep.mubr.bf16.mxu1 %v11540_v51 }
 0x340   : > { %v3399_v48 = vmul.f32 %v3359_v20, %v551_v52  ;;  %5020 = vmatpush1.bf16.msra.mxu0 %v7863_v34  ;;  %5133 = vmatpush1.bf16.msra.mxu1 %v7884_v29  ;;  %v7908_v20 = vld [vmem:[%s11475_s8 + $0x1f8] ss:$28 sps:$4 sm:$0xff]  }
 0x341   : > { %5021 = vmatprep.subr.bf16.mxu0 %v7868_v7  ;;  %5134 = vmatprep.subr.bf16.mxu1 %v7895_v24  ;;  %v7907_v24 = vld [vmem:[%s11475_s8 + $0x234] ss:$28 sps:$4 sm:$0xff]  }
 0x342   : > { %v3415_v39 = vadd.f32 %v3399_v48, %v10201_v9  ;;  %v7911_v48 = vld [vmem:[%s11475_s8 + $0x380] ss:$28 sps:$4 sm:$0xff]  }
 0x343   : > { %v3361_v46 = vpop.permute.xlu0 %3360 }
 0x344   : > { %v3427_v11 = vpack.c.bf16 %v3415_v39, %v3414_v19  ;;  %5022 = vmatpush1.bf16.msra.mxu0 %v7866_v16  ;;  %5135 = vmatpush1.bf16.msra.mxu1 %v7893_v45  ;;  %v3400_v9 = vmul.f32 %v3361_v46, %v552_v1  ;;  %v7916_v16 = vld [vmem:[%s11475_s8 + $0x1c4] ss:$28 sps:$4 sm:$0xff]   ;;  %v7922_v19 = vld [vmem:[%s11475_s8 + $0x194] ss:$28 sps:$4 sm:$0xff]  }
 0x345   : > { %5023 = vmatprep.subr.bf16.mxu0 %v7874_v14  ;;  %5136 = vmatprep.subr.bf16.mxu1 %v7904_v49  ;;  %v7919_v45 = vld [vmem:[%s11475_s8 + $0x544] ss:$28 sps:$4 sm:$0xff]   ;;  %v7928_v39 = vld [vmem:[%s11475_s8 + $0x514] ss:$28 sps:$4 sm:$0xff]  }
 0x346   : > { %7042 = vmatmul.mubr.msk.bf16.gmra.mxu0 %vm3490_vm2, %v3427_v11  ;;  %7051 = vmatmul.mubr.msk.bf16.gmra.mxu1 %vm3490_vm2, %v3427_v11  ;;  %v3416_v54 = vadd.f32 %v3400_v9, %v10210_v53  ;;  %v7914_v14 = vld [vmem:[%s11475_s8 + $0x1c0] ss:$28 sps:$4 sm:$0xff]  }
 0x347   : > { %v3363_v62 = vpop.permute.xlu1 %3362  ;;  %3600 = vmatprep.mubr.bf16.mxu0 %v11540_v51  ;;  %3713 = vmatprep.mubr.bf16.mxu1 %v11540_v51  ;;  %v7917_v49 = vld [vmem:[%s11475_s8 + $0x540] ss:$28 sps:$4 sm:$0xff]  }
 0x348   : > { %v3401_v37 = vmul.f32 %v3363_v62, %v553_v32  ;;  %5024 = vmatpush1.bf16.msra.mxu0 %v7872_v61  ;;  %5137 = vmatpush1.bf16.msra.mxu1 %v7902_v59  ;;  %v3438_v1 = vld [vmem:[%s11474_s7] sm:$0xf]  ;;  %v11542_v32 = vld [vmem:[#allocation7_spill] sm:$0xff]  ;;  %v11543_v9 = vld [vmem:[#allocation9_spill] sm:$0xff] }
 0x349   : > { %5025 = vmatprep.subr.bf16.mxu0 %v7877_v4  ;;  %v11541_v61 = vld [vmem:[#allocation10_spill] sm:$0xff]  ;;  %v10505_v4 = vrot.slane %v3438_v1, %v11542_v32  ;;  %v10508_v62 = vrot.slane %v3438_v1, %v11543_v9 }
 0x34a   : > { %v3417_v26 = vadd.f32 %v3401_v37, %v10219_v35  ;;  %v10502_v59 = vrot.slane %v3438_v1, %v11541_v61  ;;  %v11544_v37 = vld [vmem:[#allocation6_spill] sm:$0xff] }
 0x34b   : > { %v3365_v41 = vpop.permute.xlu0 %3364 }
 0x34c   : > { %v3428_v47 = vpack.c.bf16 %v3417_v26, %v3416_v54  ;;  %5026 = vmatpush1.bf16.msra.mxu0 %v7875_v57  ;;  %v3402_v25 = vmul.f32 %v3365_v41, %v554_v60  ;;  %v10511_v57 = vrot.slane %v3438_v1, %v11544_v37  ;;  %v7935_v1 = vld [vmem:[%s11475_s8 + $0x4d8] ss:$28 sps:$4 sm:$0xff]  }
 0x34d   : > { %5027 = vmatprep.subr.bf16.mxu0 %v7883_v22 }
 0x34e   : > { %7043 = vmatmul.mubr.msk.bf16.gmra.mxu0 %vm3490_vm2, %v3428_v47  ;;  %7052 = vmatmul.mubr.msk.bf16.gmra.mxu1 %vm3490_vm2, %v3428_v47  ;;  %v3418_v6 = vadd.f32 %v3402_v25, %v10227_v17 }
 0x34f   : > { %v3367_v53 = vpop.permute.xlu1 %3366  ;;  %3610 = vmatprep.mubr.bf16.mxu0 %v11540_v51  ;;  %3723 = vmatprep.mubr.bf16.mxu1 %v11540_v51 }
 0x350   : > { %v3403_v35 = vmul.f32 %v3367_v53, %v555_v12  ;;  %5028 = vmatpush2.bf16.msra.mxu0 %v7881_v10 }
 0x351   : > { %5029 = vmatprep.subr.bf16.mxu0 %v7889_v38 }
 0x352   : > { %v3419_v50 = vadd.f32 %v3403_v35, %v10234_v13 }
 0x353   : > { %v3369_v5 = vpop.permute.xlu0 %3368 }
 0x354   : > { %v3429_v30 = vpack.c.bf16 %v3419_v50, %v3418_v6  ;;  %5030 = vmatpush2.bf16.msra.mxu0 %v7887_v40  ;;  %v3404_v2 = vmul.f32 %v3369_v5, %v556_v3 }
 0x355   : > { %5031 = vmatprep.subr.bf16.mxu0 %v7892_v58 }
 0x356   : > { %7044 = vmatmul.mubr.msk.bf16.gmra.mxu0 %vm3490_vm2, %v3429_v30  ;;  %7053 = vmatmul.mubr.msk.bf16.gmra.mxu1 %vm3490_vm2, %v3429_v30  ;;  %v3420_v42 = vadd.f32 %v3404_v2, %v10241_v31 }
 0x357   : > { %v3371_v17 = vpop.permute.xlu1 %3370  ;;  %3620 = vmatprep.mubr.bf16.mxu0 %v11540_v51  ;;  %3733 = vmatprep.mubr.bf16.mxu1 %v11540_v51 }
 0x358   : > { %v3405_v13 = vmul.f32 %v3371_v17, %v557_v8  ;;  %5032 = vmatpush2.bf16.msra.mxu0 %v7890_v27 }
 0x359   : > { %5033 = vmatprep.subr.bf16.mxu0 %v7898_v21 }
 0x35a   : > { %v3421_v44 = vadd.f32 %v3405_v13, %v10248_v55 }
 0x35b   : > { %v3373_v33 = vpop.permute.xlu0 %3372 }
 0x35c   : > { %v3430_v28 = vpack.c.bf16 %v3421_v44, %v3420_v42  ;;  %5034 = vmatpush2.bf16.msra.mxu0 %v7896_v23  ;;  %v3406_v34 = vmul.f32 %v3373_v33, %v558_v63  ;;  %v7920_v44 = vld [vmem:[%s11475_s8 + $0x190] ss:$28 sps:$4 sm:$0xff]  }
 0x35d   : > { %5035 = vmatprep.subr.bf16.mxu0 %v7901_v0  ;;  %v7926_v63 = vld [vmem:[%s11475_s8 + $0x510] ss:$28 sps:$4 sm:$0xff]  }
 0x35e   : > { %7045 = vmatmul.mubr.msk.bf16.gmra.mxu0 %vm3490_vm2, %v3430_v28  ;;  %7054 = vmatmul.mubr.msk.bf16.gmra.mxu1 %vm3490_vm2, %v3430_v28  ;;  %v3422_v55 = vadd.f32 %v3406_v34, %v10255_v56  ;;  %v7910_v56 = vld [vmem:[%s11475_s8 + $0x1fc] ss:$28 sps:$4 sm:$0xff]  }
 0x35f   : > { %v3375_v29 = vpop.permute.xlu1 %3374  ;;  %3630 = vmatprep.mubr.bf16.mxu0 %v11540_v51  ;;  %3743 = vmatprep.mubr.bf16.mxu1 %v11540_v51 }
 0x360   : > { %v3407_v31 = vmul.f32 %v3375_v29, %v559_v43  ;;  %5036 = vmatpush2.bf16.msra.mxu0 %v7899_v18  ;;  %v7925_v29 = vld [vmem:[%s11475_s8 + $0x15c] ss:$28 sps:$4 sm:$0xff]  }
 0x361   : > { %5037 = vmatprep.subr.bf16.mxu0 %v7907_v24 }
 0x362   : > { %v3423_v52 = vadd.f32 %v3407_v31, %v10262_v36  ;;  %v7913_v36 = vld [vmem:[%s11475_s8 + $0x384] ss:$28 sps:$4 sm:$0xff]   ;;  %v7937_v31 = vld [vmem:[%s11475_s8 + $0x4dc] ss:$28 sps:$4 sm:$0xff]  }
 0x363   : > { %5138 = vmatprep.subr.bf16.mxu1 %v7913_v36 }
 0x364   : > { %v3431_v7 = vpack.c.bf16 %v3423_v52, %v3422_v55  ;;  %5038 = vmatpush2.bf16.msra.mxu0 %v7905_v15  ;;  %5139 = vmatpush1.bf16.msra.mxu1 %v7911_v48 }
 0x365   : > { %5039 = vmatprep.subr.bf16.mxu0 %v7910_v56  ;;  %5154 = vmatprep.subr.bf16.mxu1 %v7919_v45 }
 0x366   : > { %7046 = vmatmul.mubr.msk.bf16.gmra.mxu0 %vm3490_vm2, %v3431_v7  ;;  %7055 = vmatmul.mubr.msk.bf16.gmra.mxu1 %vm3490_vm2, %v3431_v7 }
 0x368   : > { %5040 = vmatpush2.bf16.msra.mxu0 %v7908_v20  ;;  %5155 = vmatpush2.bf16.msra.mxu1 %v7917_v49 }
 0x369   : > { %5041 = vmatprep.subr.bf16.mxu0 %v7916_v16  ;;  %5350 = vmatprep.subr.bf16.mxu1 %v7928_v39  ;;  %v7923_v16 = vld [vmem:[%s11475_s8 + $0x158] ss:$28 sps:$4 sm:$0xff]   ;;  %v7931_v39 = vld [vmem:[%s11475_s8 + $0x124] ss:$28 sps:$4 sm:$0xff]  }
 0x36c   : > { %5042 = vmatpush2.bf16.msra.mxu0 %v7914_v14 }
 0x36d   : > { %5237 = vmatprep.subr.bf16.mxu0 %v7922_v19 }
 0x3ee   : > { %v3562_v46 = vpop.f32.mrf.mxu0  ;;  %v3675_v11 = vpop.f32.mrf.mxu1 }
 0x3ef   : > { %v3563_v38 = vadd.f32 %v3562_v46, %v10508_v62  ;;  %v3676_v25 = vadd.f32 %v3675_v11, %v10511_v57 }
 0x3f0   : > { %v3564_v22 = vpop.f32.mrf.mxu0  ;;  %v3677_v54 = vpop.f32.mrf.mxu1 }
 0x3f1   : > { %v3565_v41 = vadd.f32 %v3564_v22, %v10502_v59  ;;  %v3678_v47 = vadd.f32 %v3677_v54, %v10505_v4  ;;  %v3754_v2 = vmax.f32 %v3563_v38, 0.0  ;;  %v3756_v17 = vmax.f32 %v3676_v25, 0.0  ;;  %v7929_v38 = vld [vmem:[%s11475_s8 + $0x120] ss:$28 sps:$4 sm:$0xff]  }
 0x3f2   : > { %v3566_v26 = vpop.f32.mrf.mxu0  ;;  %v3679_v60 = vpop.f32.mrf.mxu1  ;;  %v7946_v25 = vld [vmem:[%s11475_s8 + $0x4a4] ss:$28 sps:$4 sm:$0xff]  }
 0x3f3   : > { %v3567_v10 = vadd.f32 %v3566_v26, %v10508_v62  ;;  %v3680_v12 = vadd.f32 %v3679_v60, %v10511_v57  ;;  %v3755_v30 = vmax.f32 %v3565_v41, 0.0  ;;  %v3757_v27 = vmax.f32 %v3678_v47, 0.0 }
 0x3f4   : > { %v3568_v53 = vpop.f32.mrf.mxu0  ;;  %v3681_v35 = vpop.f32.mrf.mxu1 }
 0x3f5   : > { %v3569_v40 = vadd.f32 %v3568_v53, %v10502_v59  ;;  %v3682_v58 = vadd.f32 %v3681_v35, %v10505_v4  ;;  %v3758_v6 = vmax.f32 %v3567_v10, 0.0  ;;  %v3760_v50 = vmax.f32 %v3680_v12, 0.0 }
 0x3f6   : > { %v3572_v3 = vpop.f32.mrf.mxu0  ;;  %v3685_v5 = vpop.f32.mrf.mxu1 }
 0x3f7   : > { %v3759_v8 = vmax.f32 %v3569_v40, 0.0  ;;  %v3761_v21 = vmax.f32 %v3682_v58, 0.0  ;;  %v10531_v33 = vpack.c.bf16 %v3758_v6, %v3754_v2  ;;  %v10533_v28 = vpack.c.bf16 %v3760_v50, %v3756_v17  ;;  %v7934_v50 = vld [vmem:[%s11475_s8 + $0xec] ss:$28 sps:$4 sm:$0xff]  }
 0x3f8   : > { %v3574_v13 = vpop.f32.mrf.mxu0  ;;  %v3687_v23 = vpop.f32.mrf.mxu1  ;;  %v3573_v24 = vadd.f32 %v3572_v3, %v10508_v62  ;;  %v3686_v15 = vadd.f32 %v3685_v5, %v10511_v57  ;;  %v7944_v3 = vld [vmem:[%s11475_s8 + $0x4a0] ss:$28 sps:$4 sm:$0xff]  }
 0x3f9   : > { %v10521_v0 = vpack.c.bf16 %v3759_v8, %v3755_v30  ;;  %v10523_v42 = vpack.c.bf16 %v3761_v21, %v3757_v27  ;;  %v3575_v18 = vadd.f32 %v3574_v13, %v10502_v59  ;;  %v3688_v55 = vadd.f32 %v3687_v23, %v10505_v4  ;;  %v7955_v8 = vld [vmem:[%s11475_s8 + $0x46c] ss:$28 sps:$4 sm:$0xff]  }
 0x3fa   : > { %v3576_v43 = vpop.f32.mrf.mxu0  ;;  %v3689_v34 = vpop.f32.mrf.mxu1  ;;  %v3762_v26 = vmax.f32 %v3573_v24, 0.0  ;;  %v3764_v60 = vmax.f32 %v3686_v15, 0.0 }
 0x3fb   : > { %v3577_v52 = vadd.f32 %v3576_v43, %v10508_v62  ;;  %v3690_v7 = vadd.f32 %v3689_v34, %v10511_v57  ;;  %5043 = vmatprep.mubr.bf16.mxu0 %v10521_v0  ;;  %7231 = vmatprep.mubr.msk.bf16.mxu1 %vm1814_vm0, %v10523_v42  ;;  %v3763_v46 = vmax.f32 %v3575_v18, 0.0  ;;  %v3765_v11 = vmax.f32 %v3688_v55, 0.0  ;;  %v7953_v55 = vld [vmem:[%s11475_s8 + $0x468] ss:$28 sps:$4 sm:$0xff]  }
 0x3fc   : > { %v3578_v56 = vpop.f32.mrf.mxu0  ;;  %v3691_v36 = vpop.f32.mrf.mxu1  ;;  %5044 = vmatmul.mubr.bf16.vlgmr.msra.gmra.mxu0 %v10531_v33  ;;  %5157 = vmatmul.mubr.bf16.vlgmr.msra.gmra.mxu1 %v10533_v28 }
 0x3fd   : > { %v3579_v20 = vadd.f32 %v3578_v56, %v10502_v59  ;;  %v3692_v48 = vadd.f32 %v3691_v36, %v10505_v4  ;;  %5238 = vmatpush1.bf16.msra.mxu0 %v7920_v44  ;;  %5351 = vmatpush1.bf16.msra.mxu1 %v7926_v63  ;;  %v3766_v45 = vmax.f32 %v3577_v52, 0.0  ;;  %v3768_v14 = vmax.f32 %v3690_v7, 0.0  ;;  %v7932_v63 = vld [vmem:[%s11475_s8 + $0xe8] ss:$28 sps:$4 sm:$0xff]  }
 0x3fe   : > { %v3582_v49 = vpop.f32.mrf.mxu0  ;;  %v3695_v19 = vpop.f32.mrf.mxu1  ;;  %5239 = vmatprep.subr.bf16.mxu0 %v7925_v29  ;;  %5352 = vmatprep.subr.bf16.mxu1 %v7937_v31  ;;  %v7940_v31 = vld [vmem:[%s11475_s8 + $0xb4] ss:$28 sps:$4 sm:$0xff]  }
 0x3ff   : > { %v3767_v22 = vmax.f32 %v3579_v20, 0.0  ;;  %v3769_v54 = vmax.f32 %v3692_v48, 0.0  ;;  %v10573_v53 = vpack.c.bf16 %v3766_v45, %v3762_v26  ;;  %v10575_v35 = vpack.c.bf16 %v3768_v14, %v3764_v60  ;;  %v7938_v14 = vld [vmem:[%s11475_s8 + $0xb0] ss:$28 sps:$4 sm:$0xff]  }
 0x400   : > { %v3584_v41 = vpop.f32.mrf.mxu0  ;;  %v3697_v47 = vpop.f32.mrf.mxu1  ;;  %v3583_v21 = vadd.f32 %v3582_v49, %v10508_v62  ;;  %v3696_v2 = vadd.f32 %v3695_v19, %v10511_v57  ;;  %v7961_v49 = vld [vmem:[%s11475_s8 + $0x434] ss:$28 sps:$4 sm:$0xff]  }
 0x401   : > { %v10563_v10 = vpack.c.bf16 %v3767_v22, %v3763_v46  ;;  %v10565_v12 = vpack.c.bf16 %v3769_v54, %v3765_v11  ;;  %5240 = vmatpush1.bf16.msra.mxu0 %v7923_v16  ;;  %v3585_v40 = vadd.f32 %v3584_v41, %v10502_v59  ;;  %5353 = vmatpush1.bf16.msra.mxu1 %v7935_v1  ;;  %v7943_v22 = vld [vmem:[%s11475_s8 + $0x7c] ss:$28 sps:$4 sm:$0xff]   ;;  %v7959_v54 = vld [vmem:[%s11475_s8 + $0x430] ss:$28 sps:$4 sm:$0xff]  }
 0x402   : > { %v3586_v58 = vpop.f32.mrf.mxu0  ;;  %v3699_v6 = vpop.f32.mrf.mxu1  ;;  %5241 = vmatprep.subr.bf16.mxu0 %v7931_v39  ;;  %v3698_v5 = vadd.f32 %v3697_v47, %v10505_v4  ;;  %5354 = vmatprep.subr.bf16.mxu1 %v7946_v25  ;;  %v3770_v56 = vmax.f32 %v3583_v21, 0.0  ;;  %v3772_v36 = vmax.f32 %v3696_v2, 0.0  ;;  %v7970_v47 = vld [vmem:[%s11475_s8 + $0x3fc] ss:$28 sps:$4 sm:$0xff]   ;;  %v7949_v21 = vld [vmem:[%s11475_s8 + $0x44] ss:$28 sps:$4 sm:$0xff]  }
 0x403   : > { %v3587_v30 = vadd.f32 %v3586_v58, %v10508_v62  ;;  %v3700_v27 = vadd.f32 %v3699_v6, %v10511_v57  ;;  %5053 = vmatprep.mubr.bf16.mxu0 %v10563_v10  ;;  %7232 = vmatprep.mubr.msk.bf16.mxu1 %vm1814_vm0, %v10565_v12  ;;  %v3771_v52 = vmax.f32 %v3585_v40, 0.0  ;;  %v7968_v2 = vld [vmem:[%s11475_s8 + $0x3f8] ss:$28 sps:$4 sm:$0xff]  }
 0x404   : > { %v3588_v17 = vpop.f32.mrf.mxu0  ;;  %v3701_v13 = vpop.f32.mrf.mxu1  ;;  %5054 = vmatmul.mubr.bf16.gmra.mxu0 %v10573_v53  ;;  %5167 = vmatmul.mubr.bf16.gmra.mxu1 %v10575_v35  ;;  %v3773_v7 = vmax.f32 %v3698_v5, 0.0 }
 0x405   : > { %v3589_v23 = vadd.f32 %v3588_v17, %v10502_v59  ;;  %v3702_v44 = vadd.f32 %v3701_v13, %v10505_v4  ;;  %5242 = vmatpush1.bf16.msra.mxu0 %v7929_v38  ;;  %v3774_v18 = vmax.f32 %v3587_v30, 0.0  ;;  %v3776_v43 = vmax.f32 %v3700_v27, 0.0  ;;  %5355 = vmatpush1.bf16.msra.mxu1 %v7944_v3  ;;  %v7941_v3 = vld [vmem:[%s11475_s8 + $0x78] ss:$28 sps:$4 sm:$0xff]  }
 0x406   : > { %v3592_v34 = vpop.f32.mrf.mxu0  ;;  %v3705_v29 = vpop.f32.mrf.mxu1  ;;  %5243 = vmatprep.subr.bf16.mxu0 %v7934_v50  ;;  %5356 = vmatprep.subr.bf16.mxu1 %v7955_v8 }
 0x407   : > { %v3775_v24 = vmax.f32 %v3589_v23, 0.0  ;;  %v3777_v15 = vmax.f32 %v3702_v44, 0.0  ;;  %v10618_v19 = vpack.c.bf16 %v3774_v18, %v3770_v56  ;;  %v10620_v39 = vpack.c.bf16 %v3776_v43, %v3772_v36 }
 0x408   : > { %v3594_v20 = vpop.f32.mrf.mxu0  ;;  %v3707_v48 = vpop.f32.mrf.mxu1  ;;  %v3593_v38 = vadd.f32 %v3592_v34, %v10508_v62  ;;  %v3706_v25 = vadd.f32 %v3705_v29, %v10511_v57 }
 0x409   : > { %v10608_v16 = vpack.c.bf16 %v3775_v24, %v3771_v52  ;;  %v10610_v45 = vpack.c.bf16 %v3777_v15, %v3773_v7  ;;  %5244 = vmatpush1.bf16.msra.mxu0 %v7932_v63  ;;  %v3595_v1 = vadd.f32 %v3594_v20, %v10502_v59  ;;  %5357 = vmatpush1.bf16.msra.mxu1 %v7953_v55  ;;  %v7947_v55 = vld [vmem:[%s11475_s8 + $0x40] ss:$28 sps:$4 sm:$0xff]   ;;  %v7952_v20 = vld [vmem:[%s11475_s8 + $0xc] ss:$28 sps:$4 sm:$0xff]  }
 0x40a   : > { %v3596_v46 = vpop.f32.mrf.mxu0  ;;  %v3709_v11 = vpop.f32.mrf.mxu1  ;;  %5245 = vmatprep.subr.bf16.mxu0 %v7940_v31  ;;  %v3708_v26 = vadd.f32 %v3707_v48, %v10505_v4  ;;  %5358 = vmatprep.subr.bf16.mxu1 %v7961_v49  ;;  %v3778_v63 = vmax.f32 %v3593_v38, 0.0  ;;  %v3780_v18 = vmax.f32 %v3706_v25, 0.0  ;;  %v7979_v52 = vld [vmem:[%s11475_s8 + $0x3c4] ss:$28 sps:$4 sm:$0xff]  }
 0x40b   : > { %v3597_v60 = vadd.f32 %v3596_v46, %v10508_v62  ;;  %v3710_v41 = vadd.f32 %v3709_v11, %v10511_v57  ;;  %5063 = vmatprep.mubr.bf16.mxu0 %v10608_v16  ;;  %7233 = vmatprep.mubr.msk.bf16.mxu1 %vm1814_vm0, %v10610_v45  ;;  %v3779_v17 = vmax.f32 %v3595_v1, 0.0  ;;  %v7977_v48 = vld [vmem:[%s11475_s8 + $0x3c0] ss:$28 sps:$4 sm:$0xff]   ;;  %v7988_v46 = vld [vmem:[%s11475_s8 + $0x38c] ss:$28 sps:$4 sm:$0xff]  }
 0x40c   : > { %v3598_v40 = vpop.f32.mrf.mxu0  ;;  %v3711_v58 = vpop.f32.mrf.mxu1  ;;  %5064 = vmatmul.mubr.bf16.gmra.mxu0 %v10618_v19  ;;  %5177 = vmatmul.mubr.bf16.gmra.mxu1 %v10620_v39  ;;  %v3781_v13 = vmax.f32 %v3708_v26, 0.0 }
 0x40d   : > { %v3599_v6 = vadd.f32 %v3598_v40, %v10502_v59  ;;  %v3712_v50 = vadd.f32 %v3711_v58, %v10505_v4  ;;  %5246 = vmatpush1.bf16.msra.mxu0 %v7938_v14  ;;  %v3782_v5 = vmax.f32 %v3597_v60, 0.0  ;;  %v3784_v30 = vmax.f32 %v3710_v41, 0.0  ;;  %5359 = vmatpush1.bf16.msra.mxu1 %v7959_v54 }
 0x40e   : > { %v3602_v27 = vpop.f32.mrf.mxu0  ;;  %v3715_v8 = vpop.f32.mrf.mxu1  ;;  %5247 = vmatprep.subr.bf16.mxu0 %v7943_v22  ;;  %5360 = vmatprep.subr.bf16.mxu1 %v7970_v47  ;;  %v7950_v47 = vld [vmem:[%s11475_s8 + $0x8] ss:$28 sps:$4 sm:$0xff]  }
 0x40f   : > { %v3783_v23 = vmax.f32 %v3599_v6, 0.0  ;;  %v3785_v44 = vmax.f32 %v3712_v50, 0.0  ;;  %v10663_v7 = vpack.c.bf16 %v3782_v5, %v3778_v63  ;;  %v10665_v24 = vpack.c.bf16 %v3784_v30, %v3780_v18  ;;  %v7958_v6 = vld [vmem:[%s11475_s8 + $0x354] ss:$28 sps:$4 sm:$0xff]   ;;  %v7986_v50 = vld [vmem:[%s11475_s8 + $0x388] ss:$28 sps:$4 sm:$0xff]  }
 0x410   : > { %v3604_v43 = vpop.f32.mrf.mxu0  ;;  %v3717_v34 = vpop.f32.mrf.mxu1  ;;  %v3603_v11 = vadd.f32 %v3602_v27, %v10508_v62  ;;  %v3716_v22 = vadd.f32 %v3715_v8, %v10511_v57  ;;  %v7994_v63 = vld [vmem:[%s11475_s8 + $0x54c] ss:$28 sps:$4 sm:$0xff]  }
 0x411   : > { %v10653_v29 = vpack.c.bf16 %v3783_v23, %v3779_v17  ;;  %v10655_v31 = vpack.c.bf16 %v3785_v44, %v3781_v13  ;;  %5248 = vmatpush1.bf16.msra.mxu0 %v7941_v3  ;;  %v3605_v15 = vadd.f32 %v3604_v43, %v10502_v59  ;;  %5361 = vmatpush1.bf16.msra.mxu1 %v7968_v2  ;;  %v7956_v44 = vld [vmem:[%s11475_s8 + $0x350] ss:$28 sps:$4 sm:$0xff]  }
 0x412   : > { %v3606_v56 = vpop.f32.mrf.mxu0  ;;  %v3719_v36 = vpop.f32.mrf.mxu1  ;;  %5249 = vmatprep.subr.bf16.mxu0 %v7949_v21  ;;  %v3718_v14 = vadd.f32 %v3717_v34, %v10505_v4  ;;  %5362 = vmatprep.subr.bf16.mxu1 %v7979_v52  ;;  %v3786_v8 = vmax.f32 %v3603_v11, 0.0  ;;  %v3788_v21 = vmax.f32 %v3716_v22, 0.0 }
 0x413   : > { %v3607_v49 = vadd.f32 %v3606_v56, %v10508_v62  ;;  %v3720_v1 = vadd.f32 %v3719_v36, %v10511_v57  ;;  %5073 = vmatprep.mubr.bf16.mxu0 %v10653_v29  ;;  %7234 = vmatprep.mubr.msk.bf16.mxu1 %vm1814_vm0, %v10655_v31  ;;  %v3787_v3 = vmax.f32 %v3605_v15, 0.0  ;;  %v7964_v15 = vld [vmem:[%s11475_s8 + $0x31c] ss:$28 sps:$4 sm:$0xff]   ;;  %v7992_v56 = vld [vmem:[%s11475_s8 + $0x548] ss:$28 sps:$4 sm:$0xff]  }
 0x414   : > { %v3608_v54 = vpop.f32.mrf.mxu0  ;;  %v3721_v26 = vpop.f32.mrf.mxu1  ;;  %5074 = vmatmul.mubr.bf16.gmra.mxu0 %v10663_v7  ;;  %5187 = vmatmul.mubr.bf16.gmra.mxu1 %v10665_v24  ;;  %v3789_v5 = vmax.f32 %v3718_v14, 0.0  ;;  %v8003_v14 = vld [vmem:[%s11475_s8 + $0x51c] ss:$28 sps:$4 sm:$0xff]  }
 0x415   : > { %v3609_v60 = vadd.f32 %v3608_v54, %v10502_v59  ;;  %v3722_v41 = vadd.f32 %v3721_v26, %v10505_v4  ;;  %5250 = vmatpush1.bf16.msra.mxu0 %v7947_v55  ;;  %v3790_v38 = vmax.f32 %v3607_v49, 0.0  ;;  %v3792_v25 = vmax.f32 %v3720_v1, 0.0  ;;  %5363 = vmatpush1.bf16.msra.mxu1 %v7977_v48  ;;  %v7962_v26 = vld [vmem:[%s11475_s8 + $0x318] ss:$28 sps:$4 sm:$0xff]  }
 0x416   : > { %v3612_v40 = vpop.f32.mrf.mxu0  ;;  %v3725_v58 = vpop.f32.mrf.mxu1  ;;  %5251 = vmatprep.subr.bf16.mxu0 %v7952_v20  ;;  %5364 = vmatprep.subr.bf16.mxu1 %v7988_v46 }
 0x417   : > { %v3791_v30 = vmax.f32 %v3609_v60, 0.0  ;;  %v3793_v27 = vmax.f32 %v3722_v41, 0.0  ;;  %v10708_v18 = vpack.c.bf16 %v3790_v38, %v3786_v8  ;;  %v10710_v43 = vpack.c.bf16 %v3792_v25, %v3788_v21  ;;  %v7967_v25 = vld [vmem:[%s11475_s8 + $0x2e4] ss:$28 sps:$4 sm:$0xff]  }
 0x418   : > { %v3614_v2 = vpop.f32.mrf.mxu0  ;;  %v3727_v17 = vpop.f32.mrf.mxu1  ;;  %v3613_v49 = vadd.f32 %v3612_v40, %v10508_v62  ;;  %v3726_v1 = vadd.f32 %v3725_v58, %v10511_v57 }
 0x419   : > { %v10698_v13 = vpack.c.bf16 %v3791_v30, %v3787_v3  ;;  %v10700_v23 = vpack.c.bf16 %v3793_v27, %v3789_v5  ;;  %5252 = vmatpush1.bf16.msra.mxu0 %v7950_v47  ;;  %v3615_v34 = vadd.f32 %v3614_v2, %v10502_v59  ;;  %5365 = vmatpush1.bf16.msra.mxu1 %v7986_v50  ;;  %v7965_v2 = vld [vmem:[%s11475_s8 + $0x2e0] ss:$28 sps:$4 sm:$0xff]  }
 0x41a   : > { %v3616_v55 = vpop.f32.mrf.mxu0  ;;  %v3729_v52 = vpop.f32.mrf.mxu1  ;;  %5253 = vmatprep.subr.bf16.mxu0 %v7958_v6  ;;  %v3728_v36 = vadd.f32 %v3727_v17, %v10505_v4  ;;  %5380 = vmatprep.subr.bf16.mxu1 %v7994_v63  ;;  %v3794_v3 = vmax.f32 %v3613_v49, 0.0  ;;  %v3796_v5 = vmax.f32 %v3726_v1, 0.0 }
 0x41b   : > { %v3617_v20 = vadd.f32 %v3616_v55, %v10508_v62  ;;  %v3730_v48 = vadd.f32 %v3729_v52, %v10511_v57  ;;  %5083 = vmatprep.mubr.bf16.mxu0 %v10698_v13  ;;  %7235 = vmatprep.mubr.msk.bf16.mxu1 %vm1814_vm0, %v10700_v23  ;;  %v3795_v40 = vmax.f32 %v3615_v34, 0.0  ;;  %v7973_v52 = vld [vmem:[%s11475_s8 + $0x2ac] ss:$28 sps:$4 sm:$0xff]  }
 0x41c   : > { %v3618_v46 = vpop.f32.mrf.mxu0  ;;  %v3731_v11 = vpop.f32.mrf.mxu1  ;;  %5084 = vmatmul.mubr.bf16.gmra.mxu0 %v10708_v18  ;;  %5197 = vmatmul.mubr.bf16.gmra.mxu1 %v10710_v43  ;;  %v3797_v58 = vmax.f32 %v3728_v36, 0.0 }
 0x41d   : > { %v3619_v22 = vadd.f32 %v3618_v46, %v10502_v59  ;;  %v3732_v54 = vadd.f32 %v3731_v11, %v10505_v4  ;;  %5254 = vmatpush2.bf16.msra.mxu0 %v7956_v44  ;;  %v3798_v60 = vmax.f32 %v3617_v20, 0.0  ;;  %v3800_v41 = vmax.f32 %v3730_v48, 0.0  ;;  %5381 = vmatpush2.bf16.msra.mxu1 %v7992_v56  ;;  %v7971_v11 = vld [vmem:[%s11475_s8 + $0x2a8] ss:$28 sps:$4 sm:$0xff]  }
 0x41e   : > { %v3622_v47 = vpop.f32.mrf.mxu0  ;;  %v3735_v38 = vpop.f32.mrf.mxu1  ;;  %5255 = vmatprep.subr.bf16.mxu0 %v7964_v15  ;;  %5576 = vmatprep.subr.bf16.mxu1 %v8003_v14 }
 0x41f   : > { %v3799_v6 = vmax.f32 %v3619_v22, 0.0  ;;  %v3801_v50 = vmax.f32 %v3732_v54, 0.0  ;;  %v10747_v17 = vpack.c.bf16 %v3798_v60, %v3794_v3  ;;  %v10749_v44 = vpack.c.bf16 %v3800_v41, %v3796_v5  ;;  %v7976_v41 = vld [vmem:[%s11475_s8 + $0x274] ss:$28 sps:$4 sm:$0xff]  }
 0x420   : > { %v3624_v30 = vpop.f32.mrf.mxu0  ;;  %v3737_v27 = vpop.f32.mrf.mxu1  ;;  %v3623_v20 = vadd.f32 %v3622_v47, %v10508_v62  ;;  %v3736_v48 = vadd.f32 %v3735_v38, %v10511_v57 }
 0x421   : > { %v10740_v8 = vpack.c.bf16 %v3799_v6, %v3795_v40  ;;  %v10742_v21 = vpack.c.bf16 %v3801_v50, %v3797_v58  ;;  %5256 = vmatpush2.bf16.msra.mxu0 %v7962_v26  ;;  %v3625_v63 = vadd.f32 %v3624_v30, %v10502_v59  ;;  %v3738_v15 = vadd.f32 %v3737_v27, %v10505_v4  ;;  %v7974_v27 = vld [vmem:[%s11475_s8 + $0x270] ss:$28 sps:$4 sm:$0xff]  }
 0x422   : > { %v3626_v34 = vpop.f32.mrf.mxu0  ;;  %v3739_v55 = vpop.f32.mrf.mxu1  ;;  %5257 = vmatprep.subr.bf16.mxu0 %v7967_v25  ;;  %v3802_v58 = vmax.f32 %v3623_v20, 0.0  ;;  %v3804_v6 = vmax.f32 %v3736_v48, 0.0 }
 0x423   : > { %v3627_v56 = vadd.f32 %v3626_v34, %v10508_v62  ;;  %v3740_v36 = vadd.f32 %v3739_v55, %v10511_v57  ;;  %5093 = vmatprep.mubr.bf16.mxu0 %v10740_v8  ;;  %7236 = vmatprep.mubr.msk.bf16.mxu1 %vm1814_vm0, %v10742_v21  ;;  %v3803_v47 = vmax.f32 %v3625_v63, 0.0  ;;  %v3805_v38 = vmax.f32 %v3738_v15, 0.0  ;;  %v7982_v15 = vld [vmem:[%s11475_s8 + $0x23c] ss:$28 sps:$4 sm:$0xff]  }
 0x424   : > { %v3628_v14 = vpop.f32.mrf.mxu0  ;;  %v3741_v49 = vpop.f32.mrf.mxu1  ;;  %5094 = vmatmul.mubr.bf16.gmra.mxu0 %v10747_v17  ;;  %5207 = vmatmul.mubr.bf16.gmra.mxu1 %v10749_v44 }
 0x425   : > { %v3629_v1 = vadd.f32 %v3628_v14, %v10502_v59  ;;  %v3742_v46 = vadd.f32 %v3741_v49, %v10505_v4  ;;  %5258 = vmatpush2.bf16.msra.mxu0 %v7965_v2  ;;  %v3806_v22 = vmax.f32 %v3627_v56, 0.0  ;;  %v3808_v54 = vmax.f32 %v3740_v36, 0.0 }
 0x426   : > { %v3632_v26 = vpop.f32.mrf.mxu0  ;;  %v3745_v60 = vpop.f32.mrf.mxu1  ;;  %5259 = vmatprep.subr.bf16.mxu0 %v7973_v52 }
 0x427   : > { %v3807_v25 = vmax.f32 %v3629_v1, 0.0  ;;  %v3809_v40 = vmax.f32 %v3742_v46, 0.0  ;;  %v10780_v2 = vpack.c.bf16 %v3806_v22, %v3802_v58  ;;  %v10782_v34 = vpack.c.bf16 %v3808_v54, %v3804_v6  ;;  %v7980_v22 = vld [vmem:[%s11475_s8 + $0x238] ss:$28 sps:$4 sm:$0xff]  }
 0x428   : > { %v3634_v50 = vpop.f32.mrf.mxu0  ;;  %v3747_v3 = vpop.f32.mrf.mxu1  ;;  %v3633_v48 = vadd.f32 %v3632_v26, %v10508_v62  ;;  %v3746_v14 = vadd.f32 %v3745_v60, %v10511_v57 }
 0x429   : > { %v10773_v5 = vpack.c.bf16 %v3807_v25, %v3803_v47  ;;  %v10775_v30 = vpack.c.bf16 %v3809_v40, %v3805_v38  ;;  %5260 = vmatpush2.bf16.msra.mxu0 %v7971_v11  ;;  %v3635_v63 = vadd.f32 %v3634_v50, %v10502_v59  ;;  %v3748_v56 = vadd.f32 %v3747_v3, %v10505_v4  ;;  %v7983_v40 = vld [vmem:[%s11475_s8 + $0x200] ss:$28 sps:$4 sm:$0xff]   ;;  %v7991_v50 = vld [vmem:[%s11475_s8 + $0x1cc] ss:$28 sps:$4 sm:$0xff]  }
 0x42a   : > { %v3636_v55 = vpop.f32.mrf.mxu0  ;;  %v3749_v52 = vpop.f32.mrf.mxu1  ;;  %5261 = vmatprep.subr.bf16.mxu0 %v7976_v41  ;;  %v3810_v38 = vmax.f32 %v3633_v48, 0.0  ;;  %v7989_v3 = vld [vmem:[%s11475_s8 + $0x1c8] ss:$28 sps:$4 sm:$0xff]  }
 0x42b   : > { %v3637_v36 = vadd.f32 %v3636_v55, %v10508_v62  ;;  %v3750_v20 = vadd.f32 %v3749_v52, %v10511_v57  ;;  %5103 = vmatprep.mubr.bf16.mxu0 %v10773_v5  ;;  %7237 = vmatprep.mubr.msk.bf16.mxu1 %vm1814_vm0, %v10775_v30  ;;  %v7985_v62 = vld [vmem:[%s11475_s8 + $0x204] ss:$28 sps:$4 sm:$0xff]   ;;  %v3811_v57 = vmax.f32 %v3635_v63, 0.0  ;;  %v3813_v26 = vmax.f32 %v3748_v56, 0.0  ;;  %v7995_v63 = vld [vmem:[%s11475_s8 + $0x198] ss:$28 sps:$4 sm:$0xff]  }
 0x42c   : > { %v3638_v49 = vpop.f32.mrf.mxu0  ;;  %v3751_v1 = vpop.f32.mrf.mxu1  ;;  %5104 = vmatmul.mubr.bf16.gmra.mxu0 %v10780_v2  ;;  %5217 = vmatmul.mubr.bf16.gmra.mxu1 %v10782_v34  ;;  %v8001_v55 = vld [vmem:[%s11475_s8 + $0x518] ss:$28 sps:$4 sm:$0xff]   ;;  %v8000_v52 = vld [vmem:[%s11475_s8 + $0x164] ss:$28 sps:$4 sm:$0xff]   ;;  %v8021_v48 = vld [vmem:[%s11475_s8 + $0x4ac] ss:$28 sps:$4 sm:$0xff]  }
 0x42d   : > { %v3639_v46 = vadd.f32 %v3638_v49, %v10502_v59  ;;  %v3752_v11 = vadd.f32 %v3751_v1, %v10505_v4  ;;  %5262 = vmatpush2.bf16.msra.mxu0 %v7974_v27  ;;  %v3814_v54 = vmax.f32 %v3637_v36, 0.0  ;;  %v3816_v41 = vmax.f32 %v3750_v20, 0.0  ;;  %v7997_v27 = vld [vmem:[%s11475_s8 + $0x19c] ss:$28 sps:$4 sm:$0xff]   ;;  %v8006_v20 = vld [vmem:[%s11475_s8 + $0x12c] ss:$28 sps:$4 sm:$0xff]  }
 0x42e   : > { %5263 = vmatprep.subr.bf16.mxu0 %v7982_v15  ;;  %v3812_v59 = vmax.f32 %v3746_v14, 0.0  ;;  %v8012_v15 = vld [vmem:[%s11475_s8 + $0x4e4] ss:$28 sps:$4 sm:$0xff]   ;;  %v8009_v1 = vld [vmem:[%s11475_s8 + $0xf4] ss:$28 sps:$4 sm:$0xff]  }
 0x42f   : > { %v3815_v60 = vmax.f32 %v3639_v46, 0.0  ;;  %v3817_v47 = vmax.f32 %v3752_v11, 0.0  ;;  %v10813_v58 = vpack.c.bf16 %v3814_v54, %v3810_v38  ;;  %v7998_v56 = vld [vmem:[%s11475_s8 + $0x160] ss:$28 sps:$4 sm:$0xff]   ;;  %v8004_v14 = vld [vmem:[%s11475_s8 + $0x128] ss:$28 sps:$4 sm:$0xff]  }
 0x430   : > { %v10815_v6 = vpack.c.bf16 %v3816_v41, %v3812_v59  ;;  %v8010_v36 = vld [vmem:[%s11475_s8 + $0x4e0] ss:$28 sps:$4 sm:$0xff]   ;;  %v8019_v49 = vld [vmem:[%s11475_s8 + $0x4a8] ss:$28 sps:$4 sm:$0xff]   ;;  %v8030_v46 = vld [vmem:[%s11475_s8 + $0x474] ss:$28 sps:$4 sm:$0xff]  }
 0x431   : > { %v10806_v25 = vpack.c.bf16 %v3815_v60, %v3811_v57  ;;  %v10808_v4 = vpack.c.bf16 %v3817_v47, %v3813_v26  ;;  %5264 = vmatpush2.bf16.msra.mxu0 %v7980_v22  ;;  %v8007_v11 = vld [vmem:[%s11475_s8 + $0xf0] ss:$28 sps:$4 sm:$0xff]   ;;  %v8015_v54 = vld [vmem:[%s11475_s8 + $0xbc] ss:$28 sps:$4 sm:$0xff]   ;;  %v8018_v26 = vld [vmem:[%s11475_s8 + $0x84] ss:$28 sps:$4 sm:$0xff]  }
 0x432   : > { %5265 = vmatprep.subr.bf16.mxu0 %v7985_v62  ;;  %v8028_v22 = vld [vmem:[%s11475_s8 + $0x470] ss:$28 sps:$4 sm:$0xff]   ;;  %v8036_v41 = vld [vmem:[%s11475_s8 + $0x43c] ss:$28 sps:$4 sm:$0xff]   ;;  %v8045_v60 = vld [vmem:[%s11475_s8 + $0x404] ss:$28 sps:$4 sm:$0xff]  }
 0x433   : > { %5113 = vmatprep.mubr.bf16.mxu0 %v10806_v25  ;;  %7238 = vmatprep.mubr.msk.bf16.mxu1 %vm1814_vm0, %v10808_v4  ;;  %v8013_v62 = vld [vmem:[%s11475_s8 + $0xb8] ss:$28 sps:$4 sm:$0xff]   ;;  %v8016_v47 = vld [vmem:[%s11475_s8 + $0x80] ss:$28 sps:$4 sm:$0xff]   ;;  %v8024_v59 = vld [vmem:[%s11475_s8 + $0x4c] ss:$28 sps:$4 sm:$0xff]  }
 0x434   : > { %5114 = vmatmul.mubr.bf16.gmra.mxu0 %v10813_v58  ;;  %5227 = vmatmul.mubr.bf16.gmra.mxu1 %v10815_v6  ;;  %v8034_v57 = vld [vmem:[%s11475_s8 + $0x438] ss:$28 sps:$4 sm:$0xff]   ;;  %v8043_v38 = vld [vmem:[%s11475_s8 + $0x400] ss:$28 sps:$4 sm:$0xff]  }
 0x435   : > { %5266 = vmatpush2.bf16.msra.mxu0 %v7983_v40  ;;  %5269 = vmatprep.mubr.bf16.mxu0 %v10521_v0  ;;  %v8054_v40 = vld [vmem:[%s11475_s8 + $0x3cc] ss:$28 sps:$4 sm:$0xff]  }
 0x436   : > { %7239 = vmatprep.mubr.msk.bf16.mxu1 %vm1814_vm0, %v10523_v42  ;;  %5267 = vmatprep.subr.bf16.mxu0 %v7991_v50  ;;  %v8022_v50 = vld [vmem:[%s11475_s8 + $0x48] ss:$28 sps:$4 sm:$0xff]  }
 0x439   : > { %5268 = vmatpush2.bf16.msra.mxu0 %v7989_v3  ;;  %v8052_v3 = vld [vmem:[%s11475_s8 + $0x3c8] ss:$28 sps:$4 sm:$0xff]  }
 0x43a   : > { %5463 = vmatprep.subr.bf16.mxu0 %v7997_v27  ;;  %v8027_v27 = vld [vmem:[%s11475_s8 + $0x14] ss:$28 sps:$4 sm:$0xff]  }
 0x43c   : > { %5270 = vmatmul.mubr.bf16.vlgmr.msra.gmra.mxu0 %v10531_v33  ;;  %5383 = vmatmul.mubr.bf16.vlgmr.msra.gmra.mxu1 %v10533_v28 }
 0x43d   : > { %5279 = vmatprep.mubr.bf16.mxu0 %v10563_v10  ;;  %7240 = vmatprep.mubr.msk.bf16.mxu1 %vm1814_vm0, %v10565_v12 }
 0x43e   : > { %5464 = vmatpush1.bf16.msra.mxu0 %v7995_v63  ;;  %5577 = vmatpush1.bf16.msra.mxu1 %v8001_v55  ;;  %v8063_v63 = vld [vmem:[%s11475_s8 + $0x394] ss:$28 sps:$4 sm:$0xff]  }
 0x43f   : > { %5465 = vmatprep.subr.bf16.mxu0 %v8000_v52  ;;  %5578 = vmatprep.subr.bf16.mxu1 %v8012_v15  ;;  %v8025_v55 = vld [vmem:[%s11475_s8 + $0x10] ss:$28 sps:$4 sm:$0xff]   ;;  %v8033_v15 = vld [vmem:[%s11475_s8 + $0x35c] ss:$28 sps:$4 sm:$0xff]  }
 0x440   : > { %v8061_v52 = vld [vmem:[%s11475_s8 + $0x390] ss:$28 sps:$4 sm:$0xff]  }
 0x442   : > { %5466 = vmatpush1.bf16.msra.mxu0 %v7998_v56  ;;  %5579 = vmatpush1.bf16.msra.mxu1 %v8010_v36  ;;  %v8069_v56 = vld [vmem:[%s11475_s8 + $0x554] ss:$28 sps:$4 sm:$0xff]  }
 0x443   : > { %5467 = vmatprep.subr.bf16.mxu0 %v8006_v20  ;;  %5580 = vmatprep.subr.bf16.mxu1 %v8021_v48  ;;  %v8031_v36 = vld [vmem:[%s11475_s8 + $0x358] ss:$28 sps:$4 sm:$0xff]   ;;  %v8067_v20 = vld [vmem:[%s11475_s8 + $0x550] ss:$28 sps:$4 sm:$0xff]   ;;  %v8039_v48 = vld [vmem:[%s11475_s8 + $0x324] ss:$28 sps:$4 sm:$0xff]  }
 0x444   : > { %5280 = vmatmul.mubr.bf16.gmra.mxu0 %v10573_v53  ;;  %5393 = vmatmul.mubr.bf16.gmra.mxu1 %v10575_v35 }
 0x445   : > { %5289 = vmatprep.mubr.bf16.mxu0 %v10608_v16  ;;  %7241 = vmatprep.mubr.msk.bf16.mxu1 %vm1814_vm0, %v10610_v45 }
 0x446   : > { %5468 = vmatpush1.bf16.msra.mxu0 %v8004_v14  ;;  %5581 = vmatpush1.bf16.msra.mxu1 %v8019_v49  ;;  %v8037_v14 = vld [vmem:[%s11475_s8 + $0x320] ss:$28 sps:$4 sm:$0xff]   ;;  %v8042_v49 = vld [vmem:[%s11475_s8 + $0x2ec] ss:$28 sps:$4 sm:$0xff]  }
 0x447   : > { %5469 = vmatprep.subr.bf16.mxu0 %v8009_v1  ;;  %5582 = vmatprep.subr.bf16.mxu1 %v8030_v46  ;;  %v8040_v1 = vld [vmem:[%s11475_s8 + $0x2e8] ss:$28 sps:$4 sm:$0xff]   ;;  %v8048_v46 = vld [vmem:[%s11475_s8 + $0x2b4] ss:$28 sps:$4 sm:$0xff]  }
 0x44a   : > { %5470 = vmatpush1.bf16.msra.mxu0 %v8007_v11  ;;  %5583 = vmatpush1.bf16.msra.mxu1 %v8028_v22  ;;  %v8046_v11 = vld [vmem:[%s11475_s8 + $0x2b0] ss:$28 sps:$4 sm:$0xff]   ;;  %v8051_v22 = vld [vmem:[%s11475_s8 + $0x27c] ss:$28 sps:$4 sm:$0xff]  }
 0x44b   : > { %5471 = vmatprep.subr.bf16.mxu0 %v8015_v54  ;;  %5584 = vmatprep.subr.bf16.mxu1 %v8036_v41  ;;  %v8049_v54 = vld [vmem:[%s11475_s8 + $0x278] ss:$28 sps:$4 sm:$0xff]   ;;  %v8057_v41 = vld [vmem:[%s11475_s8 + $0x244] ss:$28 sps:$4 sm:$0xff]  }
 0x44c   : > { %5290 = vmatmul.mubr.bf16.gmra.mxu0 %v10618_v19  ;;  %5403 = vmatmul.mubr.bf16.gmra.mxu1 %v10620_v39 }
 0x44d   : > { %5299 = vmatprep.mubr.bf16.mxu0 %v10653_v29  ;;  %7242 = vmatprep.mubr.msk.bf16.mxu1 %vm1814_vm0, %v10655_v31 }
 0x44e   : > { %5472 = vmatpush1.bf16.msra.mxu0 %v8013_v62  ;;  %5585 = vmatpush1.bf16.msra.mxu1 %v8034_v57  ;;  %v8055_v62 = vld [vmem:[%s11475_s8 + $0x240] ss:$28 sps:$4 sm:$0xff]   ;;  %v8060_v57 = vld [vmem:[%s11475_s8 + $0x20c] ss:$28 sps:$4 sm:$0xff]  }
 0x44f   : > { %5473 = vmatprep.subr.bf16.mxu0 %v8018_v26  ;;  %5586 = vmatprep.subr.bf16.mxu1 %v8045_v60  ;;  %v8058_v26 = vld [vmem:[%s11475_s8 + $0x208] ss:$28 sps:$4 sm:$0xff]   ;;  %v8066_v60 = vld [vmem:[%s11475_s8 + $0x1d4] ss:$28 sps:$4 sm:$0xff]  }
 0x452   : > { %5474 = vmatpush1.bf16.msra.mxu0 %v8016_v47  ;;  %5587 = vmatpush1.bf16.msra.mxu1 %v8043_v38  ;;  %v8064_v47 = vld [vmem:[%s11475_s8 + $0x1d0] ss:$28 sps:$4 sm:$0xff]   ;;  %v8070_v38 = vld [vmem:[%s11475_s8 + $0x360] ss:$28 sps:$4 sm:$0xff]  }
 0x453   : > { %5475 = vmatprep.subr.bf16.mxu0 %v8024_v59  ;;  %5588 = vmatprep.subr.bf16.mxu1 %v8054_v40  ;;  %v8071_v59 = vld [vmem:[%s11475_s8 + $0x1a0] ss:$28 sps:$4 sm:$0xff]  }
 0x454   : > { %5300 = vmatmul.mubr.bf16.gmra.mxu0 %v10663_v7  ;;  %5413 = vmatmul.mubr.bf16.gmra.mxu1 %v10665_v24  ;;  %v8072_v40 = vld [vmem:[%s11475_s8 + $0x520] ss:$28 sps:$4 sm:$0xff]  }
 0x455   : > { %5309 = vmatprep.mubr.bf16.mxu0 %v10698_v13  ;;  %7243 = vmatprep.mubr.msk.bf16.mxu1 %vm1814_vm0, %v10700_v23 }
 0x456   : > { %5476 = vmatpush1.bf16.msra.mxu0 %v8022_v50  ;;  %5589 = vmatpush1.bf16.msra.mxu1 %v8052_v3  ;;  %v8073_v50 = vld [vmem:[%s11475_s8 + $0x328] ss:$28 sps:$4 sm:$0xff]  }
 0x457   : > { %5477 = vmatprep.subr.bf16.mxu0 %v8027_v27  ;;  %5590 = vmatprep.subr.bf16.mxu1 %v8063_v63  ;;  %v8074_v3 = vld [vmem:[%s11475_s8 + $0x168] ss:$28 sps:$4 sm:$0xff]   ;;  %v8076_v63 = vld [vmem:[%s11475_s8 + $0x2f0] ss:$28 sps:$4 sm:$0xff]  }
 0x458   : > { %v8075_v27 = vld [vmem:[%s11475_s8 + $0x4e8] ss:$28 sps:$4 sm:$0xff]  }
 0x45a   : > { %5478 = vmatpush1.bf16.msra.mxu0 %v8025_v55  ;;  %5591 = vmatpush1.bf16.msra.mxu1 %v8061_v52  ;;  %v8077_v55 = vld [vmem:[%s11475_s8 + $0x130] ss:$28 sps:$4 sm:$0xff]  }
 0x45b   : > { %5479 = vmatprep.subr.bf16.mxu0 %v8033_v15  ;;  %5606 = vmatprep.subr.bf16.mxu1 %v8069_v56  ;;  %v8078_v52 = vld [vmem:[%s11475_s8 + $0x4b0] ss:$28 sps:$4 sm:$0xff]   ;;  %v8079_v15 = vld [vmem:[%s11475_s8 + $0x2b8] ss:$28 sps:$4 sm:$0xff]  }
 0x45c   : > { %5310 = vmatmul.mubr.bf16.gmra.mxu0 %v10708_v18  ;;  %5423 = vmatmul.mubr.bf16.gmra.mxu1 %v10710_v43  ;;  %v8080_v56 = vld [vmem:[%s11475_s8 + $0xf8] ss:$28 sps:$4 sm:$0xff]  }
 0x45d   : > { %5319 = vmatprep.mubr.bf16.mxu0 %v10740_v8  ;;  %7244 = vmatprep.mubr.msk.bf16.mxu1 %vm1814_vm0, %v10742_v21 }
 0x45e   : > { %5480 = vmatpush2.bf16.msra.mxu0 %v8031_v36  ;;  %5607 = vmatpush2.bf16.msra.mxu1 %v8067_v20  ;;  %v8081_v36 = vld [vmem:[%s11475_s8 + $0x478] ss:$28 sps:$4 sm:$0xff]   ;;  %v8082_v20 = vld [vmem:[%s11475_s8 + $0x280] ss:$28 sps:$4 sm:$0xff]  }
 0x45f   : > { %5481 = vmatprep.subr.bf16.mxu0 %v8039_v48  ;;  %5786 = vmatprep.subr.bf16.mxu1 %v11540_v51  ;;  %v8083_v48 = vld [vmem:[%s11475_s8 + $0xc0] ss:$28 sps:$4 sm:$0xff]  }
 0x462   : > { %5482 = vmatpush2.bf16.msra.mxu0 %v8037_v14  ;;  %v8084_v14 = vld [vmem:[%s11475_s8 + $0x440] ss:$28 sps:$4 sm:$0xff]  }
 0x463   : > { %5483 = vmatprep.subr.bf16.mxu0 %v8042_v49  ;;  %v8085_v49 = vld [vmem:[%s11475_s8 + $0x248] ss:$28 sps:$4 sm:$0xff]  }
 0x464   : > { %5320 = vmatmul.mubr.bf16.gmra.mxu0 %v10747_v17  ;;  %5433 = vmatmul.mubr.bf16.gmra.mxu1 %v10749_v44 }
 0x465   : > { %5329 = vmatprep.mubr.bf16.mxu0 %v10773_v5  ;;  %7245 = vmatprep.mubr.msk.bf16.mxu1 %vm1814_vm0, %v10775_v30 }
 0x466   : > { %5484 = vmatpush2.bf16.msra.mxu0 %v8040_v1  ;;  %v8086_v1 = vld [vmem:[%s11475_s8 + $0x88] ss:$28 sps:$4 sm:$0xff]  }
 0x467   : > { %5485 = vmatprep.subr.bf16.mxu0 %v8048_v46  ;;  %v8087_v46 = vld [vmem:[%s11475_s8 + $0x408] ss:$28 sps:$4 sm:$0xff]  }
 0x46a   : > { %5486 = vmatpush2.bf16.msra.mxu0 %v8046_v11  ;;  %v8088_v11 = vld [vmem:[%s11475_s8 + $0x210] ss:$28 sps:$4 sm:$0xff]  }
 0x46b   : > { %5487 = vmatprep.subr.bf16.mxu0 %v8051_v22  ;;  %v8089_v22 = vld [vmem:[%s11475_s8 + $0x50] ss:$28 sps:$4 sm:$0xff]  }
 0x46c   : > { %5330 = vmatmul.mubr.bf16.gmra.mxu0 %v10780_v2  ;;  %5443 = vmatmul.mubr.bf16.gmra.mxu1 %v10782_v34 }
 0x46d   : > { %5339 = vmatprep.mubr.bf16.mxu0 %v10806_v25  ;;  %7246 = vmatprep.mubr.msk.bf16.mxu1 %vm1814_vm0, %v10808_v4 }
 0x46e   : > { %5488 = vmatpush2.bf16.msra.mxu0 %v8049_v54  ;;  %v8090_v54 = vld [vmem:[%s11475_s8 + $0x3d0] ss:$28 sps:$4 sm:$0xff]  }
 0x46f   : > { %5489 = vmatprep.subr.bf16.mxu0 %v8057_v41  ;;  %v8091_v41 = vld [vmem:[%s11475_s8 + $0x1d8] ss:$28 sps:$4 sm:$0xff]  }
 0x472   : > { %5490 = vmatpush2.bf16.msra.mxu0 %v8055_v62  ;;  %v8092_v62 = vld [vmem:[%s11475_s8 + $0x18] ss:$28 sps:$4 sm:$0xff]  }
 0x473   : > { %5491 = vmatprep.subr.bf16.mxu0 %v8060_v57  ;;  %v8093_v57 = vld [vmem:[%s11475_s8 + $0x398] ss:$28 sps:$4 sm:$0xff]  }
 0x474   : > { %5340 = vmatmul.mubr.bf16.gmra.mxu0 %v10813_v58  ;;  %5453 = vmatmul.mubr.bf16.gmra.mxu1 %v10815_v6 }
 0x475   : > { %5495 = vmatprep.mubr.bf16.mxu0 %v10521_v0  ;;  %7247 = vmatprep.mubr.msk.bf16.mxu1 %vm1814_vm0, %v10523_v42 }
 0x476   : > { %5492 = vmatpush2.bf16.msra.mxu0 %v8058_v26  ;;  %v8094_v26 = vld [vmem:[%s11475_s8 + $0x558] ss:$28 sps:$4 sm:$0xff]  }
 0x477   : > { %5493 = vmatprep.subr.bf16.mxu0 %v8066_v60 }
 0x47a   : > { %5494 = vmatpush2.bf16.msra.mxu0 %v8064_v47 }
 0x47b   : > { %7441 = vmatprep.subr.bf16.mxu0 %v8070_v38 }
 0x47c   : > { %5609 = vmatmul.mubr.bf16.vlgmr.msra.gmra.mxu1 %v10533_v28 }
 0x47d   : > { %5496 = vmatmul.mubr.bf16.vlgmr.msra.gmra.mxu0 %v10531_v33  ;;  %7248 = vmatprep.mubr.msk.bf16.mxu1 %vm1814_vm0, %v10565_v12 }
 0x47e   : > { %5505 = vmatprep.mubr.bf16.mxu0 %v10563_v10  ;;  %7442 = vmatpush3.bf16.msra.mxu0 %v8071_v59 }
 0x47f   : > { %5787 = vmatpush1.bf16.msra.mxu1 %v8072_v40  ;;  %7443 = vmatprep.subr.bf16.mxu0 %v8073_v50 }
 0x480   : > { %5788 = vmatprep.subr.bf16.mxu1 %v11540_v51 }
 0x482   : > { %7444 = vmatpush3.bf16.msra.mxu0 %v8074_v3 }
 0x483   : > { %5789 = vmatpush1.bf16.msra.mxu1 %v8075_v27  ;;  %7445 = vmatprep.subr.bf16.mxu0 %v8076_v63 }
 0x484   : > { %5619 = vmatmul.mubr.bf16.gmra.mxu1 %v10575_v35  ;;  %5790 = vmatprep.subr.bf16.mxu1 %v11540_v51 }
 0x485   : > { %5506 = vmatmul.mubr.bf16.gmra.mxu0 %v10573_v53  ;;  %7249 = vmatprep.mubr.msk.bf16.mxu1 %vm1814_vm0, %v10610_v45 }
 0x486   : > { %5515 = vmatprep.mubr.bf16.mxu0 %v10608_v16  ;;  %7446 = vmatpush3.bf16.msra.mxu0 %v8077_v55 }
 0x487   : > { %5791 = vmatpush1.bf16.msra.mxu1 %v8078_v52  ;;  %7447 = vmatprep.subr.bf16.mxu0 %v8079_v15 }
 0x488   : > { %5792 = vmatprep.subr.bf16.mxu1 %v11540_v51 }
 0x48a   : > { %7448 = vmatpush3.bf16.msra.mxu0 %v8080_v56 }
 0x48b   : > { %5793 = vmatpush1.bf16.msra.mxu1 %v8081_v36  ;;  %7449 = vmatprep.subr.bf16.mxu0 %v8082_v20 }
 0x48c   : > { %5629 = vmatmul.mubr.bf16.gmra.mxu1 %v10620_v39  ;;  %5794 = vmatprep.subr.bf16.mxu1 %v11540_v51 }
 0x48d   : > { %5516 = vmatmul.mubr.bf16.gmra.mxu0 %v10618_v19  ;;  %7250 = vmatprep.mubr.msk.bf16.mxu1 %vm1814_vm0, %v10655_v31 }
 0x48e   : > { %5525 = vmatprep.mubr.bf16.mxu0 %v10653_v29  ;;  %7450 = vmatpush3.bf16.msra.mxu0 %v8083_v48 }
 0x48f   : > { %5795 = vmatpush1.bf16.msra.mxu1 %v8084_v14  ;;  %7451 = vmatprep.subr.bf16.mxu0 %v8085_v49 }
 0x490   : > { %5796 = vmatprep.subr.bf16.mxu1 %v11540_v51 }
 0x492   : > { %7452 = vmatpush3.bf16.msra.mxu0 %v8086_v1 }
 0x493   : > { %5797 = vmatpush1.bf16.msra.mxu1 %v8087_v46  ;;  %7453 = vmatprep.subr.bf16.mxu0 %v8088_v11 }
 0x494   : > { %5639 = vmatmul.mubr.bf16.gmra.mxu1 %v10665_v24  ;;  %5798 = vmatprep.subr.bf16.mxu1 %v11540_v51 }
 0x495   : > { %5526 = vmatmul.mubr.bf16.gmra.mxu0 %v10663_v7  ;;  %7251 = vmatprep.mubr.msk.bf16.mxu1 %vm1814_vm0, %v10700_v23 }
 0x496   : > { %5535 = vmatprep.mubr.bf16.mxu0 %v10698_v13  ;;  %7454 = vmatpush3.bf16.msra.mxu0 %v8089_v22 }
 0x497   : > { %5799 = vmatpush1.bf16.msra.mxu1 %v8090_v54  ;;  %7455 = vmatprep.subr.bf16.mxu0 %v8091_v41 }
 0x498   : > { %5800 = vmatprep.subr.bf16.mxu1 %v11540_v51 }
 0x49a   : > { %7456 = vmatpush3.bf16.msra.mxu0 %v8092_v62 }
 0x49b   : > { %5801 = vmatpush1.bf16.msra.mxu1 %v8093_v57 }
 0x49c   : > { %5649 = vmatmul.mubr.bf16.gmra.mxu1 %v10710_v43  ;;  %5816 = vmatprep.subr.bf16.mxu1 %v11540_v51  ;;  %v11145_v51 = vld [vmem:[%s11476_s9] sm:$0x7f] }
 0x49d   : > { %5536 = vmatmul.mubr.bf16.gmra.mxu0 %v10708_v18  ;;  %7252 = vmatprep.mubr.msk.bf16.mxu1 %vm1814_vm0, %v10742_v21  ;;  %v11149_v60 = vrot.slane %v11145_v51, %v11543_v9  ;;  %v11153_v47 = vrot.slane %v11145_v51, %v11541_v61 }
 0x49e   : > { %5545 = vmatprep.mubr.bf16.mxu0 %v10740_v8 }
 0x49f   : > { %5817 = vmatpush2.bf16.msra.mxu1 %v8094_v26 }
 0x4a4   : > { %5659 = vmatmul.mubr.bf16.gmra.mxu1 %v10749_v44 }
 0x4a5   : > { %5546 = vmatmul.mubr.bf16.gmra.mxu0 %v10747_v17  ;;  %7253 = vmatprep.mubr.msk.bf16.mxu1 %vm1814_vm0, %v10775_v30 }
 0x4a6   : > { %5555 = vmatprep.mubr.bf16.mxu0 %v10773_v5 }
 0x4ac   : > { %5669 = vmatmul.mubr.bf16.gmra.mxu1 %v10782_v34 }
 0x4ad   : > { %5556 = vmatmul.mubr.bf16.gmra.mxu0 %v10780_v2  ;;  %7254 = vmatprep.mubr.msk.bf16.mxu1 %vm1814_vm0, %v10808_v4 }
 0x4ae   : > { %5565 = vmatprep.mubr.bf16.mxu0 %v10806_v25 }
 0x4b4   : > { %5679 = vmatmul.mubr.bf16.gmra.mxu1 %v10815_v6 }
 0x4b5   : > { %5566 = vmatmul.mubr.bf16.gmra.mxu0 %v10813_v58  ;;  %7255 = vmatprep.mubr.msk.bf16.mxu1 %vm1814_vm0, %v10523_v42 }
 0x4b6   : > { %5721 = vmatprep.mubr.bf16.mxu0 %v10521_v0 }
 0x4bc   : > { %v5045_v38 = vpop.f32.mrf.mxu0  ;;  %v5158_v59 = vpop.f32.mrf.mxu1  ;;  %5819 = vmatmul.mubr.bf16.vlgmr.msra.gmra.mxu1 %v10533_v28 }
 0x4bd   : > { %v5046_v42 = vadd.f32 %v5045_v38, %v11149_v60  ;;  %5722 = vmatmul.mubr.bf16.vlgmr.msra.gmra.mxu0 %v10531_v33  ;;  %7256 = vmatprep.mubr.msk.bf16.mxu1 %vm1814_vm0, %v10565_v12 }
 0x4be   : > { %5729 = vmatprep.mubr.bf16.mxu0 %v10563_v10  ;;  %v5047_v0 = vpop.f32.mrf.mxu0  ;;  %v5160_v9 = vpop.f32.mrf.mxu1 }
 0x4bf   : > { %v5159_v40 = vadd.f32 %v5158_v59, %v5046_v42  ;;  %v5048_v50 = vadd.f32 %v5047_v0, %v11153_v47 }
 0x4c0   : > { %v5049_v61 = vpop.f32.mrf.mxu0  ;;  %v5162_v3 = vpop.f32.mrf.mxu1 }
 0x4c1   : > { %v7263_v27 = vmul.f32 -1.442695, %v5159_v40  ;;  %v5161_v63 = vadd.f32 %v5160_v9, %v5048_v50  ;;  %v5050_v28 = vadd.f32 %v5049_v61, %v11149_v60 }
 0x4c2   : > { %v5051_v55 = vpop.f32.mrf.mxu0  ;;  %v5164_v52 = vpop.f32.mrf.mxu1 }
 0x4c3   : > { %8127 = vpow2.f32 %v7263_v27  ;;  %v7264_v33 = vmul.f32 -1.442695, %v5161_v63  ;;  %v5163_v15 = vadd.f32 %v5162_v3, %v5050_v28  ;;  %v5052_v12 = vadd.f32 %v5051_v55, %v11153_v47 }
 0x4c4   : > { %v5055_v56 = vpop.f32.mrf.mxu0  ;;  %v5168_v10 = vpop.f32.mrf.mxu1  ;;  %5827 = vmatmul.mubr.bf16.gmra.mxu1 %v10575_v35 }
 0x4c5   : > { %8129 = vpow2.f32 %v7264_v33  ;;  %v7270_v36 = vmul.f32 -1.442695, %v5163_v15  ;;  %v5165_v20 = vadd.f32 %v5164_v52, %v5052_v12  ;;  %v5056_v48 = vadd.f32 %v5055_v56, %v11149_v60  ;;  %5730 = vmatmul.mubr.bf16.gmra.mxu0 %v10573_v53  ;;  %7257 = vmatprep.mubr.msk.bf16.mxu1 %vm1814_vm0, %v10610_v45 }
 0x4c6   : > { %5737 = vmatprep.mubr.bf16.mxu0 %v10608_v16  ;;  %v5057_v14 = vpop.f32.mrf.mxu0  ;;  %v5170_v49 = vpop.f32.mrf.mxu1 }
 0x4c7   : > { %8131 = vpow2.f32 %v7270_v36  ;;  %v7271_v1 = vmul.f32 -1.442695, %v5165_v20  ;;  %v5169_v46 = vadd.f32 %v5168_v10, %v5056_v48  ;;  %v5058_v11 = vadd.f32 %v5057_v14, %v11153_v47 }
 0x4c8   : > { %v5059_v35 = vpop.f32.mrf.mxu0  ;;  %v5172_v22 = vpop.f32.mrf.mxu1 }
 0x4c9   : > { %8133 = vpow2.f32 %v7271_v1  ;;  %v7277_v54 = vmul.f32 -1.442695, %v5169_v46  ;;  %v5171_v41 = vadd.f32 %v5170_v49, %v5058_v11  ;;  %v5060_v62 = vadd.f32 %v5059_v35, %v11149_v60 }
 0x4ca   : > { %v5061_v53 = vpop.f32.mrf.mxu0  ;;  %v5174_v57 = vpop.f32.mrf.mxu1 }
 0x4cb   : > { %8135 = vpow2.f32 %v7277_v54  ;;  %v7278_v45 = vmul.f32 -1.442695, %v5171_v41  ;;  %v5173_v26 = vadd.f32 %v5172_v22, %v5060_v62  ;;  %v5062_v16 = vadd.f32 %v5061_v53, %v11153_v47 }
 0x4cc   : > { %v5065_v38 = vpop.f32.mrf.mxu0  ;;  %v5178_v59 = vpop.f32.mrf.mxu1  ;;  %5835 = vmatmul.mubr.bf16.gmra.mxu1 %v10620_v39 }
 0x4cd   : > { %8137 = vpow2.f32 %v7278_v45  ;;  %v7284_v42 = vmul.f32 -1.442695, %v5173_v26  ;;  %v5175_v0 = vadd.f32 %v5174_v57, %v5062_v16  ;;  %v5066_v9 = vadd.f32 %v5065_v38, %v11149_v60  ;;  %5738 = vmatmul.mubr.bf16.gmra.mxu0 %v10618_v19  ;;  %7258 = vmatprep.mubr.msk.bf16.mxu1 %vm1814_vm0, %v10655_v31 }
 0x4ce   : > { %5745 = vmatprep.mubr.bf16.mxu0 %v10653_v29  ;;  %v5067_v40 = vpop.f32.mrf.mxu0  ;;  %v5180_v50 = vpop.f32.mrf.mxu1 }
 0x4cf   : > { %8139 = vpow2.f32 %v7284_v42  ;;  %v7285_v61 = vmul.f32 -1.442695, %v5175_v0  ;;  %v5179_v3 = vadd.f32 %v5178_v59, %v5066_v9  ;;  %v5068_v27 = vadd.f32 %v5067_v40, %v11153_v47 }
 0x4d0   : > { %v8128_v39 = vpop.eup %8127  ;;  %v5069_v63 = vpop.f32.mrf.mxu0 }
 0x4d1   : > { %v5182_v28 = vpop.f32.mrf.mxu1  ;;  %v6219_v55 = vadd.f32 1.0, %v8128_v39  ;;  %8141 = vpow2.f32 %v7285_v61  ;;  %v7291_v52 = vmul.f32 -1.442695, %v5179_v3  ;;  %v5181_v33 = vadd.f32 %v5180_v50, %v5068_v27 }
 0x4d2   : > { %v8130_v19 = vpop.eup %8129  ;;  %v5070_v15 = vadd.f32 %v5069_v63, %v11149_v60  ;;  %v5071_v31 = vpop.f32.mrf.mxu0 }
 0x4d3   : > { %v5184_v12 = vpop.f32.mrf.mxu1  ;;  %8143 = vrcp.f32 %v6219_v55  ;;  %v6220_v29 = vadd.f32 1.0, %v8130_v19  ;;  %v7292_v56 = vmul.f32 -1.442695, %v5181_v33  ;;  %v5072_v10 = vadd.f32 %v5071_v31, %v11153_v47 }
 0x4d4   : > { %v8132_v36 = vpop.eup %8131  ;;  %8145 = vpow2.f32 %v7291_v52  ;;  %v5183_v20 = vadd.f32 %v5182_v28, %v5070_v15  ;;  %v5075_v48 = vpop.f32.mrf.mxu0  ;;  %5843 = vmatmul.mubr.bf16.gmra.mxu1 %v10665_v24 }
 0x4d5   : > { %v5188_v14 = vpop.f32.mrf.mxu1  ;;  %8147 = vrcp.f32 %v6220_v29  ;;  %v6226_v49 = vadd.f32 1.0, %v8132_v36  ;;  %v5185_v1 = vadd.f32 %v5184_v12, %v5072_v10  ;;  %v5076_v46 = vadd.f32 %v5075_v48, %v11149_v60  ;;  %5746 = vmatmul.mubr.bf16.gmra.mxu0 %v10663_v7  ;;  %7259 = vmatprep.mubr.msk.bf16.mxu1 %vm1814_vm0, %v10700_v23 }
 0x4d6   : > { %v8134_v11 = vpop.eup %8133  ;;  %8149 = vpow2.f32 %v7292_v56  ;;  %v7298_v35 = vmul.f32 -1.442695, %v5183_v20  ;;  %5753 = vmatprep.mubr.bf16.mxu0 %v10698_v13  ;;  %v5077_v22 = vpop.f32.mrf.mxu0 }
 0x4d7   : > { %v5190_v54 = vpop.f32.mrf.mxu1  ;;  %8151 = vrcp.f32 %v6226_v49  ;;  %v6227_v41 = vadd.f32 1.0, %v8134_v11  ;;  %v7299_v24 = vmul.f32 -1.442695, %v5185_v1  ;;  %v5189_v62 = vadd.f32 %v5188_v14, %v5076_v46 }
 0x4d8   : > { %v8136_v53 = vpop.eup %8135  ;;  %8153 = vpow2.f32 %v7298_v35  ;;  %v5078_v57 = vadd.f32 %v5077_v22, %v11153_v47  ;;  %v5079_v45 = vpop.f32.mrf.mxu0 }
 0x4d9   : > { %v5192_v7 = vpop.f32.mrf.mxu1  ;;  %8155 = vrcp.f32 %v6227_v41  ;;  %v6233_v26 = vadd.f32 1.0, %v8136_v53  ;;  %v7305_v23 = vmul.f32 -1.442695, %v5189_v62  ;;  %v5080_v16 = vadd.f32 %v5079_v45, %v11149_v60 }
 0x4da   : > { %v8138_v38 = vpop.eup %8137  ;;  %8157 = vpow2.f32 %v7299_v24  ;;  %v5191_v13 = vadd.f32 %v5190_v54, %v5078_v57  ;;  %v5081_v59 = vpop.f32.mrf.mxu0 }
 0x4db   : > { %v5194_v42 = vpop.f32.mrf.mxu1  ;;  %8159 = vrcp.f32 %v6233_v26  ;;  %v6234_v0 = vadd.f32 1.0, %v8138_v38  ;;  %v5193_v9 = vadd.f32 %v5192_v7, %v5080_v16  ;;  %v5082_v40 = vadd.f32 %v5081_v59, %v11153_v47 }
 0x4dc   : > { %v8140_v50 = vpop.eup %8139  ;;  %8161 = vpow2.f32 %v7305_v23  ;;  %v7306_v61 = vmul.f32 -1.442695, %v5191_v13  ;;  %v5085_v3 = vpop.f32.mrf.mxu0  ;;  %5851 = vmatmul.mubr.bf16.gmra.mxu1 %v10710_v43 }
 0x4dd   : > { %v5198_v27 = vpop.f32.mrf.mxu1  ;;  %8163 = vrcp.f32 %v6234_v0  ;;  %v6240_v39 = vadd.f32 1.0, %v8140_v50  ;;  %v7312_v63 = vmul.f32 -1.442695, %v5193_v9  ;;  %v5195_v28 = vadd.f32 %v5194_v42, %v5082_v40  ;;  %5754 = vmatmul.mubr.bf16.gmra.mxu0 %v10708_v18  ;;  %7260 = vmatprep.mubr.msk.bf16.mxu1 %vm1814_vm0, %v10742_v21 }
 0x4de   : > { %v8142_v55 = vpop.eup %8141  ;;  %8165 = vpow2.f32 %v7306_v61  ;;  %v5086_v43 = vadd.f32 %v5085_v3, %v11149_v60  ;;  %5761 = vmatprep.mubr.bf16.mxu0 %v10740_v8  ;;  %v5087_v52 = vpop.f32.mrf.mxu0 }
 0x4df   : > { %v5200_v33 = vpop.f32.mrf.mxu1  ;;  %8167 = vrcp.f32 %v6240_v39  ;;  %v6241_v18 = vadd.f32 1.0, %v8142_v55  ;;  %v7313_v19 = vmul.f32 -1.442695, %v5195_v28  ;;  %v5088_v21 = vadd.f32 %v5087_v52, %v11153_v47 }
 0x4e0   : > { %v8144_v15 = vpop.eup %8143  ;;  %8169 = vpow2.f32 %v7312_v63  ;;  %v5199_v31 = vadd.f32 %v5198_v27, %v5086_v43  ;;  %v5089_v12 = vpop.f32.mrf.mxu0 }
 0x4e1   : > { %v5202_v29 = vpop.f32.mrf.mxu1  ;;  %v8146_v56 = vpop.eup %8145  ;;  %6555 = vst [vmem:[%s11200_s27] sm:$0xff] %v8144_v15  ;;  %8171 = vrcp.f32 %v6241_v18  ;;  %v5201_v10 = vadd.f32 %v5200_v33, %v5088_v21  ;;  %v5090_v36 = vadd.f32 %v5089_v12, %v11149_v60 }
 0x4e2   : > { %v8148_v8 = vpop.eup %8147  ;;  %v6247_v20 = vadd.f32 1.0, %v8146_v56  ;;  %8173 = vpow2.f32 %v7313_v19  ;;  %v7319_v48 = vmul.f32 -1.442695, %v5199_v31  ;;  %v5091_v14 = vpop.f32.mrf.mxu0 }
 0x4e3   : > { %v5204_v49 = vpop.f32.mrf.mxu1  ;;  %v8150_v1 = vpop.eup %8149  ;;  %6556 = vst [vmem:[%s11200_s27 + $0x8] sm:$0xff] %v8148_v8  ;;  %v7320_v46 = vmul.f32 -1.442695, %v5201_v10  ;;  %v5203_v11 = vadd.f32 %v5202_v29, %v5090_v36  ;;  %v5092_v35 = vadd.f32 %v5091_v14, %v11153_v47 }
 0x4e4   : > { %v8152_v22 = vpop.eup %8151  ;;  %8175 = vrcp.f32 %v6247_v20  ;;  %v6248_v54 = vadd.f32 1.0, %v8150_v1  ;;  %v5095_v41 = vpop.f32.mrf.mxu0  ;;  %5859 = vmatmul.mubr.bf16.gmra.mxu1 %v10749_v44 }
 0x4e5   : > { %v5208_v24 = vpop.f32.mrf.mxu1  ;;  %v8154_v62 = vpop.eup %8153  ;;  %6562 = vst [vmem:[%s11200_s27 + $0x38] sm:$0xff] %v8152_v22  ;;  %8177 = vpow2.f32 %v7319_v48  ;;  %v7326_v53 = vmul.f32 -1.442695, %v5203_v11  ;;  %v5205_v57 = vadd.f32 %v5204_v49, %v5092_v35  ;;  %v5096_v45 = vadd.f32 %v5095_v41, %v11149_v60  ;;  %5762 = vmatmul.mubr.bf16.gmra.mxu0 %v10747_v17  ;;  %7261 = vmatprep.mubr.msk.bf16.mxu1 %vm1814_vm0, %v10775_v30 }
 0x4e6   : > { %v8156_v7 = vpop.eup %8155  ;;  %8179 = vrcp.f32 %v6248_v54  ;;  %v6254_v26 = vadd.f32 1.0, %v8154_v62  ;;  %5769 = vmatprep.mubr.bf16.mxu0 %v10773_v5  ;;  %v5097_v44 = vpop.f32.mrf.mxu0 }
 0x4e7   : > { %v5210_v23 = vpop.f32.mrf.mxu1  ;;  %v8158_v16 = vpop.eup %8157  ;;  %6563 = vst [vmem:[%s11200_s27 + $0x40] sm:$0xff] %v8156_v7  ;;  %8181 = vpow2.f32 %v7320_v46  ;;  %v7327_v38 = vmul.f32 -1.442695, %v5205_v57  ;;  %v5209_v13 = vadd.f32 %v5208_v24, %v5096_v45  ;;  %v5098_v59 = vadd.f32 %v5097_v44, %v11153_v47 }
 0x4e8   : > { %v8160_v42 = vpop.eup %8159  ;;  %8183 = vrcp.f32 %v6254_v26  ;;  %v6255_v17 = vadd.f32 1.0, %v8158_v16  ;;  %v5099_v30 = vpop.f32.mrf.mxu0 }
 0x4e9   : > { %v5212_v0 = vpop.f32.mrf.mxu1  ;;  %v8162_v9 = vpop.eup %8161  ;;  %6569 = vst [vmem:[%s11200_s27 + $0x70] sm:$0xff] %v8160_v42  ;;  %8185 = vpow2.f32 %v7326_v53  ;;  %v7333_v40 = vmul.f32 -1.442695, %v5209_v13  ;;  %v5211_v5 = vadd.f32 %v5210_v23, %v5098_v59  ;;  %v5100_v50 = vadd.f32 %v5099_v30, %v11149_v60 }
 0x4ea   : > { %v8164_v61 = vpop.eup %8163  ;;  %8187 = vrcp.f32 %v6255_v17  ;;  %v6261_v3 = vadd.f32 1.0, %v8162_v9  ;;  %v5101_v27 = vpop.f32.mrf.mxu0 }
 0x4eb   : > { %v5214_v39 = vpop.f32.mrf.mxu1  ;;  %v8166_v63 = vpop.eup %8165  ;;  %6570 = vst [vmem:[%s11200_s27 + $0x78] sm:$0xff] %v8164_v61  ;;  %8189 = vpow2.f32 %v7327_v38  ;;  %v7334_v28 = vmul.f32 -1.442695, %v5211_v5  ;;  %v5213_v55 = vadd.f32 %v5212_v0, %v5100_v50  ;;  %v5102_v43 = vadd.f32 %v5101_v27, %v11153_v47 }
 0x4ec   : > { %v8168_v52 = vpop.eup %8167  ;;  %8191 = vrcp.f32 %v6261_v3  ;;  %v6262_v33 = vadd.f32 1.0, %v8166_v63  ;;  %v5105_v18 = vpop.f32.mrf.mxu0  ;;  %5867 = vmatmul.mubr.bf16.gmra.mxu1 %v10782_v34 }
 0x4ed   : > { %v5218_v19 = vpop.f32.mrf.mxu1  ;;  %v8170_v21 = vpop.eup %8169  ;;  %6576 = vst [vmem:[%s11200_s27 + $0xa8] sm:$0xff] %v8168_v52  ;;  %8193 = vpow2.f32 %v7333_v40  ;;  %v7340_v15 = vmul.f32 -1.442695, %v5213_v55  ;;  %v5215_v31 = vadd.f32 %v5214_v39, %v5102_v43  ;;  %v5106_v12 = vadd.f32 %v5105_v18, %v11149_v60  ;;  %5770 = vmatmul.mubr.bf16.gmra.mxu0 %v10780_v2  ;;  %7262 = vmatprep.mubr.msk.bf16.mxu1 %vm1814_vm0, %v10808_v4 }
 0x4ee   : > { %v8172_v29 = vpop.eup %8171  ;;  %8195 = vrcp.f32 %v6262_v33  ;;  %v6268_v56 = vadd.f32 1.0, %v8170_v21  ;;  %5777 = vmatprep.mubr.bf16.mxu0 %v10806_v25  ;;  %v5107_v10 = vpop.f32.mrf.mxu0 }
 0x4ef   : > { %v5220_v34 = vpop.f32.mrf.mxu1  ;;  %v8174_v36 = vpop.eup %8173  ;;  %6577 = vst [vmem:[%s11200_s27 + $0xb0] sm:$0xff] %v8172_v29  ;;  %8197 = vpow2.f32 %v7334_v28  ;;  %v7341_v8 = vmul.f32 -1.442695, %v5215_v31  ;;  %v5219_v20 = vadd.f32 %v5218_v19, %v5106_v12  ;;  %v5108_v48 = vadd.f32 %v5107_v10, %v11153_v47 }
 0x4f0   : > { %8199 = vrcp.f32 %v6268_v56  ;;  %v6269_v2 = vadd.f32 1.0, %v8174_v36  ;;  %v5109_v14 = vpop.f32.mrf.mxu0  ;;  %v11251_v12 = vrot.slane %v11145_v51, %v11542_v32 }
 0x4f1   : > { %v5222_v49 = vpop.f32.mrf.mxu1  ;;  %v8176_v4 = vpop.eup %8175  ;;  %8201 = vpow2.f32 %v7340_v15  ;;  %v7347_v1 = vmul.f32 -1.442695, %v5219_v20  ;;  %v5221_v46 = vadd.f32 %v5220_v34, %v5108_v48  ;;  %v5110_v25 = vadd.f32 %v5109_v14, %v11149_v60 }
 0x4f2   : > { %v8178_v11 = vpop.eup %8177  ;;  %6583 = vst [vmem:[%s11200_s27 + $0xe0] sm:$0xff] %v8176_v4  ;;  %8203 = vrcp.f32 %v6269_v2  ;;  %v5111_v35 = vpop.f32.mrf.mxu0 }
 0x4f3   : > { %v5224_v22 = vpop.f32.mrf.mxu1  ;;  %v8180_v54 = vpop.eup %8179  ;;  %v6275_v41 = vadd.f32 1.0, %v8178_v11  ;;  %8205 = vpow2.f32 %v7341_v8  ;;  %v7348_v24 = vmul.f32 -1.442695, %v5221_v46  ;;  %v5223_v62 = vadd.f32 %v5222_v49, %v5110_v25 }
 0x4f4   : > { %v8182_v53 = vpop.eup %8181  ;;  %6584 = vst [vmem:[%s11200_s27 + $0xe8] sm:$0xff] %v8180_v54  ;;  %8207 = vpow2.f32 %v7347_v1  ;;  %v5112_v57 = vadd.f32 %v5111_v35, %v11153_v47  ;;  %v5115_v45 = vpop.f32.mrf.mxu0  ;;  %5875 = vmatmul.mubr.bf16.gmra.mxu1 %v10815_v6 }
 0x4f5   : > { %v5228_v7 = vpop.f32.mrf.mxu1  ;;  %v8184_v26 = vpop.eup %8183  ;;  %8209 = vrcp.f32 %v6275_v41  ;;  %v6276_v44 = vadd.f32 1.0, %v8182_v53  ;;  %v7354_v23 = vmul.f32 -1.442695, %v5223_v62  ;;  %v5116_v16 = vadd.f32 %v5115_v45, %v11149_v60  ;;  %5778 = vmatmul.mubr.bf16.gmra.mxu0 %v10813_v58 }
 0x4f6   : > { %v8186_v38 = vpop.eup %8185  ;;  %6590 = vst [vmem:[%s11200_s27 + $0x118] sm:$0xff] %v8184_v26  ;;  %8211 = vpow2.f32 %v7348_v24  ;;  %v5225_v13 = vadd.f32 %v5224_v22, %v5112_v57  ;;  %v5117_v59 = vpop.f32.mrf.mxu0  ;;  %v11243_v58 = vrot.slane %v11145_v51, %v11544_v37 }
 0x4f7   : > { %v5230_v42 = vpop.f32.mrf.mxu1  ;;  %v8188_v17 = vpop.eup %8187  ;;  %8213 = vrcp.f32 %v6276_v44  ;;  %v6282_v30 = vadd.f32 1.0, %v8186_v38  ;;  %v5229_v6 = vadd.f32 %v5228_v7, %v5116_v16  ;;  %v5118_v0 = vadd.f32 %v5117_v59, %v11153_v47 }
 0x4f8   : > { %v8190_v9 = vpop.eup %8189  ;;  %6591 = vst [vmem:[%s11200_s27 + $0x120] sm:$0xff] %v8188_v17  ;;  %8215 = vpow2.f32 %v7354_v23  ;;  %v7355_v40 = vmul.f32 -1.442695, %v5225_v13  ;;  %v5119_v5 = vpop.f32.mrf.mxu0 }
 0x4f9   : > { %v5232_v50 = vpop.f32.mrf.mxu1  ;;  %v8192_v61 = vpop.eup %8191  ;;  %8217 = vrcp.f32 %v6282_v30  ;;  %v6283_v3 = vadd.f32 1.0, %v8190_v9  ;;  %v7361_v27 = vmul.f32 -1.442695, %v5229_v6  ;;  %v5231_v39 = vadd.f32 %v5230_v42, %v5118_v0 }
 0x4fa   : > { %v8194_v63 = vpop.eup %8193  ;;  %6597 = vst [vmem:[%s11200_s27 + $0x150] sm:$0xff] %v8192_v61  ;;  %8219 = vpow2.f32 %v7355_v40  ;;  %v5120_v28 = vadd.f32 %v5119_v5, %v11149_v60  ;;  %v5121_v55 = vpop.f32.mrf.mxu0 }
 0x4fb   : > { %v5234_v43 = vpop.f32.mrf.mxu1  ;;  %v8196_v52 = vpop.eup %8195  ;;  %8221 = vrcp.f32 %v6283_v3  ;;  %v6289_v33 = vadd.f32 1.0, %v8194_v63  ;;  %v7362_v18 = vmul.f32 -1.442695, %v5231_v39  ;;  %v5122_v37 = vadd.f32 %v5121_v55, %v11153_v47 }
 0x4fc   : > { %v8198_v19 = vpop.eup %8197  ;;  %6598 = vst [vmem:[%s11200_s27 + $0x158] sm:$0xff] %v8196_v52  ;;  %8223 = vpow2.f32 %v7361_v27  ;;  %v5233_v21 = vadd.f32 %v5232_v50, %v5120_v28  ;;  %v5271_v15 = vpop.f32.mrf.mxu0 }
 0x4fd   : > { %v5384_v31 = vpop.f32.mrf.mxu1  ;;  %v8200_v60 = vpop.eup %8199  ;;  %8225 = vrcp.f32 %v6289_v33  ;;  %v6290_v29 = vadd.f32 1.0, %v8198_v19  ;;  %v5235_v56 = vadd.f32 %v5234_v43, %v5122_v37  ;;  %v5272_v10 = vadd.f32 %v5271_v15, %v11243_v58 }
 0x4fe   : > { %v8202_v34 = vpop.eup %8201  ;;  %6604 = vst [vmem:[%s11200_s27 + $0x188] sm:$0xff] %v8200_v60  ;;  %8227 = vpow2.f32 %v7362_v18  ;;  %v7368_v47 = vmul.f32 -1.442695, %v5233_v21  ;;  %v5273_v36 = vpop.f32.mrf.mxu0 }
 0x4ff   : > { %v5386_v8 = vpop.f32.mrf.mxu1  ;;  %v8204_v20 = vpop.eup %8203  ;;  %8229 = vrcp.f32 %v6290_v29  ;;  %v6296_v48 = vadd.f32 1.0, %v8202_v34  ;;  %v7369_v2 = vmul.f32 -1.442695, %v5235_v56  ;;  %v5385_v14 = vadd.f32 %v5384_v31, %v5272_v10 }
 0x500   : > { %v8206_v32 = vpop.eup %8205  ;;  %6605 = vst [vmem:[%s11200_s27 + $0x190] sm:$0xff] %v8204_v20  ;;  %8231 = vpow2.f32 %v7368_v47  ;;  %v5274_v51 = vadd.f32 %v5273_v36, %v11251_v12  ;;  %v5275_v49 = vpop.f32.mrf.mxu0 }
 0x501   : > { %v5388_v4 = vpop.f32.mrf.mxu1  ;;  %v8208_v1 = vpop.eup %8207  ;;  %8233 = vrcp.f32 %v6296_v48  ;;  %v6297_v46 = vadd.f32 1.0, %v8206_v32  ;;  %v7265_v25 = vmul.f32 -1.442695, %v5385_v14  ;;  %v5276_v11 = vadd.f32 %v5275_v49, %v11243_v58 }
 0x502   : > { %v8210_v35 = vpop.eup %8209  ;;  %v6303_v22 = vadd.f32 1.0, %v8208_v1  ;;  %8235 = vpow2.f32 %v7369_v2  ;;  %v5387_v54 = vadd.f32 %v5386_v8, %v5274_v51  ;;  %v5277_v41 = vpop.f32.mrf.mxu0 }
 0x503   : > { %v5390_v24 = vpop.f32.mrf.mxu1  ;;  %v8212_v62 = vpop.eup %8211  ;;  %6611 = vst [vmem:[%s11200_s27 + $0x1c0] sm:$0xff] %v8210_v35  ;;  %8237 = vrcp.f32 %v6297_v46  ;;  %v5389_v53 = vadd.f32 %v5388_v4, %v5276_v11  ;;  %v5278_v57 = vadd.f32 %v5277_v41, %v11251_v12 }
 0x504   : > { %v8214_v45 = vpop.eup %8213  ;;  %8239 = vrcp.f32 %v6303_v22  ;;  %v6304_v7 = vadd.f32 1.0, %v8212_v62  ;;  %v7266_v26 = vmul.f32 -1.442695, %v5387_v54  ;;  %v5281_v44 = vpop.f32.mrf.mxu0 }
 0x505   : > { %v5394_v23 = vpop.f32.mrf.mxu1  ;;  %v8216_v16 = vpop.eup %8215  ;;  %6612 = vst [vmem:[%s11200_s27 + $0x1c8] sm:$0xff] %v8214_v45  ;;  %8241 = vpow2.f32 %v7265_v25  ;;  %v7272_v38 = vmul.f32 -1.442695, %v5389_v53  ;;  %v5391_v13 = vadd.f32 %v5390_v24, %v5278_v57  ;;  %v5282_v59 = vadd.f32 %v5281_v44, %v11243_v58 }
 0x506   : > { %v8218_v42 = vpop.eup %8217  ;;  %8243 = vrcp.f32 %v6304_v7  ;;  %v6310_v17 = vadd.f32 1.0, %v8216_v16  ;;  %v5283_v30 = vpop.f32.mrf.mxu0 }
 0x507   : > { %v5396_v6 = vpop.f32.mrf.mxu1  ;;  %v8220_v0 = vpop.eup %8219  ;;  %6618 = vst [vmem:[%s11200_s27 + $0x1f8] sm:$0xff] %v8218_v42  ;;  %8245 = vpow2.f32 %v7266_v26  ;;  %v7273_v9 = vmul.f32 -1.442695, %v5391_v13  ;;  %v5395_v40 = vadd.f32 %v5394_v23, %v5282_v59  ;;  %v5284_v5 = vadd.f32 %v5283_v30, %v11251_v12 }
 0x508   : > { %v8222_v50 = vpop.eup %8221  ;;  %8247 = vrcp.f32 %v6310_v17  ;;  %v6311_v61 = vadd.f32 1.0, %v8220_v0  ;;  %v5285_v3 = vpop.f32.mrf.mxu0 }
 0x509   : > { %v5398_v27 = vpop.f32.mrf.mxu1  ;;  %v8224_v39 = vpop.eup %8223  ;;  %6619 = vst [vmem:[%s11200_s27 + $0x200] sm:$0xff] %v8222_v50  ;;  %8249 = vpow2.f32 %v7272_v38  ;;  %v7279_v63 = vmul.f32 -1.442695, %v5395_v40  ;;  %v5397_v28 = vadd.f32 %v5396_v6, %v5284_v5  ;;  %v5286_v55 = vadd.f32 %v5285_v3, %v11243_v58 }
 0x50a   : > { %v8226_v43 = vpop.eup %8225  ;;  %8251 = vrcp.f32 %v6311_v61  ;;  %v6317_v52 = vadd.f32 1.0, %v8224_v39  ;;  %v5287_v33 = vpop.f32.mrf.mxu0 }
 0x50b   : > { %v5400_v18 = vpop.f32.mrf.mxu1  ;;  %v8228_v37 = vpop.eup %8227  ;;  %6625 = vst [vmem:[%s11200_s27 + $0x230] sm:$0xff] %v8226_v43  ;;  %8253 = vpow2.f32 %v7273_v9  ;;  %v7280_v19 = vmul.f32 -1.442695, %v5397_v28  ;;  %v5399_v21 = vadd.f32 %v5398_v27, %v5286_v55  ;;  %v5288_v15 = vadd.f32 %v5287_v33, %v11251_v12 }
 0x50c   : > { %v8230_v31 = vpop.eup %8229  ;;  %8255 = vrcp.f32 %v6317_v52  ;;  %v6318_v60 = vadd.f32 1.0, %v8228_v37  ;;  %v5291_v29 = vpop.f32.mrf.mxu0 }
 0x50d   : > { %v5404_v56 = vpop.f32.mrf.mxu1  ;;  %v8232_v10 = vpop.eup %8231  ;;  %6626 = vst [vmem:[%s11200_s27 + $0x238] sm:$0xff] %v8230_v31  ;;  %8257 = vpow2.f32 %v7279_v63  ;;  %v7286_v34 = vmul.f32 -1.442695, %v5399_v21  ;;  %v5401_v47 = vadd.f32 %v5400_v18, %v5288_v15  ;;  %v5292_v36 = vadd.f32 %v5291_v29, %v11243_v58 }
 0x50e   : > { %v8234_v8 = vpop.eup %8233  ;;  %8259 = vrcp.f32 %v6318_v60  ;;  %v6324_v20 = vadd.f32 1.0, %v8232_v10  ;;  %v5293_v48 = vpop.f32.mrf.mxu0 }
 0x50f   : > { %v5406_v2 = vpop.f32.mrf.mxu1  ;;  %v8236_v14 = vpop.eup %8235  ;;  %6632 = vst [vmem:[%s11200_s27 + $0x268] sm:$0xff] %v8234_v8  ;;  %8261 = vpow2.f32 %v7280_v19  ;;  %v7287_v32 = vmul.f32 -1.442695, %v5401_v47  ;;  %v5405_v51 = vadd.f32 %v5404_v56, %v5292_v36  ;;  %v5294_v49 = vadd.f32 %v5293_v48, %v11251_v12 }
 0x510   : > { %v8238_v4 = vpop.eup %8237  ;;  %8263 = vrcp.f32 %v6324_v20  ;;  %v6325_v1 = vadd.f32 1.0, %v8236_v14  ;;  %v5295_v46 = vpop.f32.mrf.mxu0 }
 0x511   : > { %v5408_v25 = vpop.f32.mrf.mxu1  ;;  %v8240_v11 = vpop.eup %8239  ;;  %6633 = vst [vmem:[%s11200_s27 + $0x270] sm:$0xff] %v8238_v4  ;;  %8265 = vpow2.f32 %v7286_v34  ;;  %v7293_v35 = vmul.f32 -1.442695, %v5405_v51  ;;  %v5407_v22 = vadd.f32 %v5406_v2, %v5294_v49  ;;  %v5296_v54 = vadd.f32 %v5295_v46, %v11243_v58 }
 0x512   : > { %v8242_v41 = vpop.eup %8241  ;;  %6639 = vst [vmem:[%s11200_s27 + $0x2a0] sm:$0xff] %v8240_v11  ;;  %8267 = vrcp.f32 %v6325_v1  ;;  %v5297_v24 = vpop.f32.mrf.mxu0 }
 0x513   : > { %v5410_v62 = vpop.f32.mrf.mxu1  ;;  %v8244_v53 = vpop.eup %8243  ;;  %v6221_v57 = vadd.f32 1.0, %v8242_v41  ;;  %8269 = vpow2.f32 %v7287_v32  ;;  %v7294_v45 = vmul.f32 -1.442695, %v5407_v22  ;;  %v5409_v7 = vadd.f32 %v5408_v25, %v5296_v54 }
 0x514   : > { %v8246_v26 = vpop.eup %8245  ;;  %6640 = vst [vmem:[%s11200_s27 + $0x2a8] sm:$0xff] %v8244_v53  ;;  %8271 = vpow2.f32 %v7293_v35  ;;  %v5298_v44 = vadd.f32 %v5297_v24, %v11251_v12  ;;  %v5301_v23 = vpop.f32.mrf.mxu0 }
 0x515   : > { %v5414_v16 = vpop.f32.mrf.mxu1  ;;  %v8248_v38 = vpop.eup %8247  ;;  %8273 = vrcp.f32 %v6221_v57  ;;  %v6222_v13 = vadd.f32 1.0, %v8246_v26  ;;  %v7300_v59 = vmul.f32 -1.442695, %v5409_v7  ;;  %v5302_v42 = vadd.f32 %v5301_v23, %v11243_v58 }
 0x516   : > { %v8250_v17 = vpop.eup %8249  ;;  %6646 = vst [vmem:[%s11200_s27 + $0x2d8] sm:$0xff] %v8248_v38  ;;  %8275 = vpow2.f32 %v7294_v45  ;;  %v5411_v30 = vadd.f32 %v5410_v62, %v5298_v44  ;;  %v5303_v6 = vpop.f32.mrf.mxu0 }
 0x517   : > { %v5416_v0 = vpop.f32.mrf.mxu1  ;;  %v8252_v9 = vpop.eup %8251  ;;  %8277 = vrcp.f32 %v6222_v13  ;;  %v6228_v40 = vadd.f32 1.0, %v8250_v17  ;;  %v5415_v5 = vadd.f32 %v5414_v16, %v5302_v42  ;;  %v5304_v50 = vadd.f32 %v5303_v6, %v11251_v12 }
 0x518   : > { %v8254_v61 = vpop.eup %8253  ;;  %6647 = vst [vmem:[%s11200_s27 + $0x2e0] sm:$0xff] %v8252_v9  ;;  %8279 = vpow2.f32 %v7300_v59  ;;  %v7301_v3 = vmul.f32 -1.442695, %v5411_v30  ;;  %v5305_v27 = vpop.f32.mrf.mxu0 }
 0x519   : > { %v5418_v39 = vpop.f32.mrf.mxu1  ;;  %v8256_v63 = vpop.eup %8255  ;;  %8281 = vrcp.f32 %v6228_v40  ;;  %v6229_v28 = vadd.f32 1.0, %v8254_v61  ;;  %v7307_v55 = vmul.f32 -1.442695, %v5415_v5  ;;  %v5417_v43 = vadd.f32 %v5416_v0, %v5304_v50 }
 0x51a   : > { %v8258_v52 = vpop.eup %8257  ;;  %6653 = vst [vmem:[%s11200_s27 + $0x310] sm:$0xff] %v8256_v63  ;;  %8283 = vpow2.f32 %v7301_v3  ;;  %v5306_v33 = vadd.f32 %v5305_v27, %v11243_v58  ;;  %v5307_v18 = vpop.f32.mrf.mxu0 }
 0x51b   : > { %v5420_v37 = vpop.f32.mrf.mxu1  ;;  %v8260_v19 = vpop.eup %8259  ;;  %8285 = vrcp.f32 %v6229_v28  ;;  %v6235_v21 = vadd.f32 1.0, %v8258_v52  ;;  %v7308_v15 = vmul.f32 -1.442695, %v5417_v43  ;;  %v5308_v31 = vadd.f32 %v5307_v18, %v11251_v12 }
 0x51c   : > { %v8262_v60 = vpop.eup %8261  ;;  %6654 = vst [vmem:[%s11200_s27 + $0x318] sm:$0xff] %v8260_v19  ;;  %8287 = vpow2.f32 %v7307_v55  ;;  %v5419_v29 = vadd.f32 %v5418_v39, %v5306_v33  ;;  %v5311_v56 = vpop.f32.mrf.mxu0 }
 0x51d   : > { %v5424_v10 = vpop.f32.mrf.mxu1  ;;  %v8264_v34 = vpop.eup %8263  ;;  %8289 = vrcp.f32 %v6235_v21  ;;  %v6236_v47 = vadd.f32 1.0, %v8262_v60  ;;  %v5421_v36 = vadd.f32 %v5420_v37, %v5308_v31  ;;  %v5312_v8 = vadd.f32 %v5311_v56, %v11243_v58 }
 0x51e   : > { %v8266_v20 = vpop.eup %8265  ;;  %6660 = vst [vmem:[%s11200_s27 + $0x348] sm:$0xff] %v8264_v34  ;;  %8291 = vpow2.f32 %v7308_v15  ;;  %v7314_v48 = vmul.f32 -1.442695, %v5419_v29  ;;  %v5313_v2 = vpop.f32.mrf.mxu0 }
 0x51f   : > { %v5426_v14 = vpop.f32.mrf.mxu1  ;;  %v8268_v32 = vpop.eup %8267  ;;  %8293 = vrcp.f32 %v6236_v47  ;;  %v6242_v51 = vadd.f32 1.0, %v8266_v20  ;;  %v7315_v49 = vmul.f32 -1.442695, %v5421_v36  ;;  %v5425_v4 = vadd.f32 %v5424_v10, %v5312_v8 }
 0x520   : > { %v8270_v1 = vpop.eup %8269  ;;  %6661 = vst [vmem:[%s11200_s27 + $0x350] sm:$0xff] %v8268_v32  ;;  %8295 = vpow2.f32 %v7314_v48  ;;  %v5314_v46 = vadd.f32 %v5313_v2, %v11251_v12  ;;  %v5315_v25 = vpop.f32.mrf.mxu0 }
 0x521   : > { %v5428_v11 = vpop.f32.mrf.mxu1  ;;  %v8272_v35 = vpop.eup %8271  ;;  %8297 = vrcp.f32 %v6242_v51  ;;  %v6243_v22 = vadd.f32 1.0, %v8270_v1  ;;  %v7321_v54 = vmul.f32 -1.442695, %v5425_v4  ;;  %v5316_v41 = vadd.f32 %v5315_v25, %v11243_v58 }
 0x522   : > { %v8274_v24 = vpop.eup %8273  ;;  %v6249_v62 = vadd.f32 1.0, %v8272_v35  ;;  %8299 = vpow2.f32 %v7315_v49  ;;  %v5427_v53 = vadd.f32 %v5426_v14, %v5314_v46  ;;  %v5317_v57 = vpop.f32.mrf.mxu0 }
 0x523   : > { %v5430_v45 = vpop.f32.mrf.mxu1  ;;  %v8276_v7 = vpop.eup %8275  ;;  %6557 = vst [vmem:[%s11200_s27 + $0x10] sm:$0xff] %v8274_v24  ;;  %8301 = vrcp.f32 %v6243_v22  ;;  %v5429_v26 = vadd.f32 %v5428_v11, %v5316_v41  ;;  %v5318_v44 = vadd.f32 %v5317_v57, %v11251_v12 }
 0x524   : > { %v8278_v23 = vpop.eup %8277  ;;  %8303 = vrcp.f32 %v6249_v62  ;;  %v6250_v16 = vadd.f32 1.0, %v8276_v7  ;;  %v7322_v38 = vmul.f32 -1.442695, %v5427_v53  ;;  %v5321_v13 = vpop.f32.mrf.mxu0 }
 0x525   : > { %v5434_v59 = vpop.f32.mrf.mxu1  ;;  %v8280_v42 = vpop.eup %8279  ;;  %6558 = vst [vmem:[%s11200_s27 + $0x18] sm:$0xff] %v8278_v23  ;;  %8305 = vpow2.f32 %v7321_v54  ;;  %v7328_v17 = vmul.f32 -1.442695, %v5429_v26  ;;  %v5431_v30 = vadd.f32 %v5430_v45, %v5318_v44  ;;  %v5322_v6 = vadd.f32 %v5321_v13, %v11243_v58 }
 0x526   : > { %v8282_v0 = vpop.eup %8281  ;;  %8307 = vrcp.f32 %v6250_v16  ;;  %v6256_v9 = vadd.f32 1.0, %v8280_v42  ;;  %v5323_v40 = vpop.f32.mrf.mxu0 }
 0x527   : > { %v5436_v5 = vpop.f32.mrf.mxu1  ;;  %v8284_v50 = vpop.eup %8283  ;;  %6564 = vst [vmem:[%s11200_s27 + $0x48] sm:$0xff] %v8282_v0  ;;  %8309 = vpow2.f32 %v7322_v38  ;;  %v7329_v61 = vmul.f32 -1.442695, %v5431_v30  ;;  %v5435_v3 = vadd.f32 %v5434_v59, %v5322_v6  ;;  %v5324_v27 = vadd.f32 %v5323_v40, %v11251_v12 }
 0x528   : > { %v8286_v39 = vpop.eup %8285  ;;  %8311 = vrcp.f32 %v6256_v9  ;;  %v6257_v63 = vadd.f32 1.0, %v8284_v50  ;;  %v5325_v28 = vpop.f32.mrf.mxu0 }
 0x529   : > { %v5438_v55 = vpop.f32.mrf.mxu1  ;;  %v8288_v43 = vpop.eup %8287  ;;  %6565 = vst [vmem:[%s11200_s27 + $0x50] sm:$0xff] %v8286_v39  ;;  %8313 = vpow2.f32 %v7328_v17  ;;  %v7335_v52 = vmul.f32 -1.442695, %v5435_v3  ;;  %v5437_v33 = vadd.f32 %v5436_v5, %v5324_v27  ;;  %v5326_v18 = vadd.f32 %v5325_v28, %v11243_v58 }
 0x52a   : > { %v8290_v37 = vpop.eup %8289  ;;  %8315 = vrcp.f32 %v6257_v63  ;;  %v6263_v19 = vadd.f32 1.0, %v8288_v43  ;;  %v5327_v21 = vpop.f32.mrf.mxu0 }
 0x52b   : > { %v5440_v15 = vpop.f32.mrf.mxu1  ;;  %v8292_v31 = vpop.eup %8291  ;;  %6571 = vst [vmem:[%s11200_s27 + $0x80] sm:$0xff] %v8290_v37  ;;  %8317 = vpow2.f32 %v7329_v61  ;;  %v7336_v60 = vmul.f32 -1.442695, %v5437_v33  ;;  %v5439_v29 = vadd.f32 %v5438_v55, %v5326_v18  ;;  %v5328_v56 = vadd.f32 %v5327_v21, %v11251_v12  ;;  %v11545_v61 = vld [vmem:[#allocation8_spill] sm:$0xff] }
 0x52c   : > { %v8294_v10 = vpop.eup %8293  ;;  %8319 = vrcp.f32 %v6263_v19  ;;  %v6264_v34 = vadd.f32 1.0, %v8292_v31  ;;  %v5331_v47 = vpop.f32.mrf.mxu0  ;;  %v4070_v3 = vsub.s32 4, %v11545_v61  ;;  %v4074_v18 = vsub.s32 5, %v11545_v61 }
 0x52d   : > { %v5444_v36 = vpop.f32.mrf.mxu1  ;;  %v8296_v8 = vpop.eup %8295  ;;  %6572 = vst [vmem:[%s11200_s27 + $0x88] sm:$0xff] %v8294_v10  ;;  %8321 = vpow2.f32 %v7335_v52  ;;  %v7342_v20 = vmul.f32 -1.442695, %v5439_v29  ;;  %v5441_v48 = vadd.f32 %v5440_v15, %v5328_v56  ;;  %v5332_v2 = vadd.f32 %v5331_v47, %v11243_v58  ;;  %v11320_v10 = vld [vmem:[%s11476_s9] sm:$0x7f] }
 0x52e   : > { %v8298_v14 = vpop.eup %8297  ;;  %8323 = vrcp.f32 %v6264_v34  ;;  %v6270_v32 = vadd.f32 1.0, %v8296_v8  ;;  %v5333_v51 = vpop.f32.mrf.mxu0  ;;  %v11323_v34 = vrot.slane %v11320_v10, %v4070_v3 }
 0x52f   : > { %v5446_v49 = vpop.f32.mrf.mxu1  ;;  %v8300_v4 = vpop.eup %8299  ;;  %6578 = vst [vmem:[%s11200_s27 + $0xb8] sm:$0xff] %v8298_v14  ;;  %8325 = vpow2.f32 %v7336_v60  ;;  %v7343_v1 = vmul.f32 -1.442695, %v5441_v48  ;;  %v5445_v46 = vadd.f32 %v5444_v36, %v5332_v2  ;;  %v5334_v25 = vadd.f32 %v5333_v51, %v11251_v12 }
 0x530   : > { %v8302_v11 = vpop.eup %8301  ;;  %8327 = vrcp.f32 %v6270_v32  ;;  %v6271_v35 = vadd.f32 1.0, %v8300_v4  ;;  %v5335_v22 = vpop.f32.mrf.mxu0  ;;  %v11328_v14 = vrot.slane %v11320_v10, %v4074_v18 }
 0x531   : > { %v5448_v54 = vpop.f32.mrf.mxu1  ;;  %v8304_v41 = vpop.eup %8303  ;;  %6579 = vst [vmem:[%s11200_s27 + $0xc0] sm:$0xff] %v8302_v11  ;;  %8329 = vpow2.f32 %v7342_v20  ;;  %v7349_v24 = vmul.f32 -1.442695, %v5445_v46  ;;  %v5447_v62 = vadd.f32 %v5446_v49, %v5334_v25  ;;  %v5336_v53 = vadd.f32 %v5335_v22, %v11243_v58 }
 0x532   : > { %v8306_v57 = vpop.eup %8305  ;;  %6585 = vst [vmem:[%s11200_s27 + $0xf0] sm:$0xff] %v8304_v41  ;;  %8331 = vrcp.f32 %v6271_v35  ;;  %v5337_v45 = vpop.f32.mrf.mxu0 }
 0x533   : > { %v5450_v7 = vpop.f32.mrf.mxu1  ;;  %v8308_v26 = vpop.eup %8307  ;;  %v6277_v44 = vadd.f32 1.0, %v8306_v57  ;;  %8333 = vpow2.f32 %v7343_v1  ;;  %v7350_v23 = vmul.f32 -1.442695, %v5447_v62  ;;  %v5449_v16 = vadd.f32 %v5448_v54, %v5336_v53 }
 0x534   : > { %v8310_v38 = vpop.eup %8309  ;;  %6586 = vst [vmem:[%s11200_s27 + $0xf8] sm:$0xff] %v8308_v26  ;;  %8335 = vpow2.f32 %v7349_v24  ;;  %v5338_v13 = vadd.f32 %v5337_v45, %v11251_v12  ;;  %v5341_v59 = vpop.f32.mrf.mxu0 }
 0x535   : > { %v5454_v42 = vpop.f32.mrf.mxu1  ;;  %v8312_v17 = vpop.eup %8311  ;;  %8337 = vrcp.f32 %v6277_v44  ;;  %v6278_v30 = vadd.f32 1.0, %v8310_v38  ;;  %v7356_v6 = vmul.f32 -1.442695, %v5449_v16  ;;  %v5342_v0 = vadd.f32 %v5341_v59, %v11243_v58 }
 0x536   : > { %v8314_v9 = vpop.eup %8313  ;;  %6592 = vst [vmem:[%s11200_s27 + $0x128] sm:$0xff] %v8312_v17  ;;  %8339 = vpow2.f32 %v7350_v23  ;;  %v5451_v40 = vadd.f32 %v5450_v7, %v5338_v13  ;;  %v5343_v5 = vpop.f32.mrf.mxu0 }
 0x537   : > { %v5456_v50 = vpop.f32.mrf.mxu1  ;;  %v8316_v27 = vpop.eup %8315  ;;  %8341 = vrcp.f32 %v6278_v30  ;;  %v6284_v39 = vadd.f32 1.0, %v8314_v9  ;;  %v5455_v63 = vadd.f32 %v5454_v42, %v5342_v0  ;;  %v5344_v28 = vadd.f32 %v5343_v5, %v11251_v12 }
 0x538   : > { %v8318_v55 = vpop.eup %8317  ;;  %6593 = vst [vmem:[%s11200_s27 + $0x130] sm:$0xff] %v8316_v27  ;;  %8343 = vpow2.f32 %v7356_v6  ;;  %v7357_v43 = vmul.f32 -1.442695, %v5451_v40  ;;  %v5345_v52 = vpop.f32.mrf.mxu0 }
 0x539   : > { %v5458_v33 = vpop.f32.mrf.mxu1  ;;  %v8320_v37 = vpop.eup %8319  ;;  %8345 = vrcp.f32 %v6284_v39  ;;  %v6285_v19 = vadd.f32 1.0, %v8318_v55  ;;  %v7363_v21 = vmul.f32 -1.442695, %v5455_v63  ;;  %v5457_v15 = vadd.f32 %v5456_v50, %v5344_v28 }
 0x53a   : > { %v8322_v31 = vpop.eup %8321  ;;  %6599 = vst [vmem:[%s11200_s27 + $0x160] sm:$0xff] %v8320_v37  ;;  %8347 = vpow2.f32 %v7357_v43  ;;  %v5346_v60 = vadd.f32 %v5345_v52, %v11243_v58  ;;  %v5347_v29 = vpop.f32.mrf.mxu0 }
 0x53b   : > { %v5460_v56 = vpop.f32.mrf.mxu1  ;;  %v8324_v47 = vpop.eup %8323  ;;  %8349 = vrcp.f32 %v6285_v19  ;;  %v6291_v36 = vadd.f32 1.0, %v8322_v31  ;;  %v7364_v8 = vmul.f32 -1.442695, %v5457_v15  ;;  %v5348_v20 = vadd.f32 %v5347_v29, %v11251_v12 }
 0x53c   : > { %v8326_v48 = vpop.eup %8325  ;;  %6600 = vst [vmem:[%s11200_s27 + $0x168] sm:$0xff] %v8324_v47  ;;  %8351 = vpow2.f32 %v7363_v21  ;;  %v5459_v58 = vadd.f32 %v5458_v33, %v5346_v60 }
 0x53d   : > { %v5610_v2 = vpop.f32.mrf.mxu1  ;;  %v8328_v32 = vpop.eup %8327  ;;  %8353 = vrcp.f32 %v6291_v36  ;;  %v6292_v51 = vadd.f32 1.0, %v8326_v48  ;;  %v5461_v49 = vadd.f32 %v5460_v56, %v5348_v20 }
 0x53e   : > { %v5497_v4 = vpop.f32.mrf.mxu0  ;;  %v8330_v1 = vpop.eup %8329  ;;  %6606 = vst [vmem:[%s11200_s27 + $0x198] sm:$0xff] %v8328_v32  ;;  %8355 = vpow2.f32 %v7364_v8  ;;  %v7370_v46 = vmul.f32 -1.442695, %v5459_v58 }
 0x53f   : > { %v5498_v12 = vadd.f32 %v5497_v4, %v11323_v34  ;;  %v5612_v25 = vpop.f32.mrf.mxu1  ;;  %v8332_v11 = vpop.eup %8331  ;;  %8357 = vrcp.f32 %v6292_v51  ;;  %v6298_v35 = vadd.f32 1.0, %v8330_v1  ;;  %v7371_v22 = vmul.f32 -1.442695, %v5461_v49 }
 0x540   : > { %v5499_v54 = vpop.f32.mrf.mxu0  ;;  %v8334_v41 = vpop.eup %8333  ;;  %6607 = vst [vmem:[%s11200_s27 + $0x1a0] sm:$0xff] %v8332_v11  ;;  %8359 = vpow2.f32 %v7370_v46 }
 0x541   : > { %v5611_v24 = vadd.f32 %v5610_v2, %v5498_v12  ;;  %v5500_v62 = vadd.f32 %v5499_v54, %v11328_v14  ;;  %v5614_v53 = vpop.f32.mrf.mxu1  ;;  %v8336_v57 = vpop.eup %8335  ;;  %8361 = vrcp.f32 %v6298_v35  ;;  %v6299_v45 = vadd.f32 1.0, %v8334_v41 }
 0x542   : > { %v5501_v7 = vpop.f32.mrf.mxu0  ;;  %v8338_v26 = vpop.eup %8337  ;;  %v6305_v44 = vadd.f32 1.0, %v8336_v57  ;;  %8363 = vpow2.f32 %v7371_v22 }
 0x543   : > { %v7267_v23 = vmul.f32 -1.442695, %v5611_v24  ;;  %v5613_v16 = vadd.f32 %v5612_v25, %v5500_v62  ;;  %v5616_v38 = vpop.f32.mrf.mxu1  ;;  %v8340_v13 = vpop.eup %8339  ;;  %6613 = vst [vmem:[%s11200_s27 + $0x1d0] sm:$0xff] %v8338_v26  ;;  %8365 = vrcp.f32 %v6299_v45  ;;  %v5502_v59 = vadd.f32 %v5501_v7, %v11323_v34 }
 0x544   : > { %v5503_v42 = vpop.f32.mrf.mxu0  ;;  %v8342_v17 = vpop.eup %8341  ;;  %8367 = vrcp.f32 %v6305_v44  ;;  %v6306_v30 = vadd.f32 1.0, %v8340_v13 }
 0x545   : > { %v7268_v6 = vmul.f32 -1.442695, %v5613_v16  ;;  %v5504_v0 = vadd.f32 %v5503_v42, %v11328_v14  ;;  %v5620_v9 = vpop.f32.mrf.mxu1  ;;  %v8344_v40 = vpop.eup %8343  ;;  %6614 = vst [vmem:[%s11200_s27 + $0x1d8] sm:$0xff] %v8342_v17  ;;  %8369 = vpow2.f32 %v7267_v23  ;;  %v5615_v5 = vadd.f32 %v5614_v53, %v5502_v59 }
 0x546   : > { %v5507_v50 = vpop.f32.mrf.mxu0  ;;  %v8346_v3 = vpop.eup %8345  ;;  %8371 = vrcp.f32 %v6306_v30  ;;  %v6312_v27 = vadd.f32 1.0, %v8344_v40 }
 0x547   : > { %v5617_v39 = vadd.f32 %v5616_v38, %v5504_v0  ;;  %v5508_v63 = vadd.f32 %v5507_v50, %v11323_v34  ;;  %v5622_v28 = vpop.f32.mrf.mxu1  ;;  %v8348_v55 = vpop.eup %8347  ;;  %6620 = vst [vmem:[%s11200_s27 + $0x208] sm:$0xff] %v8346_v3  ;;  %8373 = vpow2.f32 %v7268_v6  ;;  %v7274_v43 = vmul.f32 -1.442695, %v5615_v5 }
 0x548   : > { %v5509_v52 = vpop.f32.mrf.mxu0  ;;  %v8350_v33 = vpop.eup %8349  ;;  %8375 = vrcp.f32 %v6312_v27  ;;  %v6313_v18 = vadd.f32 1.0, %v8348_v55 }
 0x549   : > { %v7275_v37 = vmul.f32 -1.442695, %v5617_v39  ;;  %v5621_v19 = vadd.f32 %v5620_v9, %v5508_v63  ;;  %v5624_v21 = vpop.f32.mrf.mxu1  ;;  %v8352_v15 = vpop.eup %8351  ;;  %6621 = vst [vmem:[%s11200_s27 + $0x210] sm:$0xff] %v8350_v33  ;;  %8377 = vpow2.f32 %v7274_v43  ;;  %v5510_v31 = vadd.f32 %v5509_v52, %v11328_v14 }
 0x54a   : > { %v5511_v60 = vpop.f32.mrf.mxu0  ;;  %v8354_v29 = vpop.eup %8353  ;;  %8379 = vrcp.f32 %v6313_v18  ;;  %v6319_v56 = vadd.f32 1.0, %v8352_v15 }
 0x54b   : > { %v7281_v47 = vmul.f32 -1.442695, %v5621_v19  ;;  %v5512_v36 = vadd.f32 %v5511_v60, %v11323_v34  ;;  %v5626_v8 = vpop.f32.mrf.mxu1  ;;  %v8356_v20 = vpop.eup %8355  ;;  %6627 = vst [vmem:[%s11200_s27 + $0x240] sm:$0xff] %v8354_v29  ;;  %8381 = vpow2.f32 %v7275_v37  ;;  %v5623_v48 = vadd.f32 %v5622_v28, %v5510_v31 }
 0x54c   : > { %v5513_v58 = vpop.f32.mrf.mxu0  ;;  %v8358_v2 = vpop.eup %8357  ;;  %8383 = vrcp.f32 %v6319_v56  ;;  %v6320_v32 = vadd.f32 1.0, %v8356_v20 }
 0x54d   : > { %v5625_v51 = vadd.f32 %v5624_v21, %v5512_v36  ;;  %v5514_v49 = vadd.f32 %v5513_v58, %v11328_v14  ;;  %v5630_v4 = vpop.f32.mrf.mxu1  ;;  %v8360_v1 = vpop.eup %8359  ;;  %6628 = vst [vmem:[%s11200_s27 + $0x248] sm:$0xff] %v8358_v2  ;;  %8385 = vpow2.f32 %v7281_v47  ;;  %v7282_v46 = vmul.f32 -1.442695, %v5623_v48 }
 0x54e   : > { %v5517_v12 = vpop.f32.mrf.mxu0  ;;  %v8362_v25 = vpop.eup %8361  ;;  %8387 = vrcp.f32 %v6320_v32  ;;  %v6326_v11 = vadd.f32 1.0, %v8360_v1 }
 0x54f   : > { %v7288_v35 = vmul.f32 -1.442695, %v5625_v51  ;;  %v5627_v22 = vadd.f32 %v5626_v8, %v5514_v49  ;;  %v5632_v54 = vpop.f32.mrf.mxu1  ;;  %v8364_v41 = vpop.eup %8363  ;;  %6634 = vst [vmem:[%s11200_s27 + $0x278] sm:$0xff] %v8362_v25  ;;  %8389 = vpow2.f32 %v7282_v46  ;;  %v5518_v24 = vadd.f32 %v5517_v12, %v11323_v34 }
 0x550   : > { %v5519_v62 = vpop.f32.mrf.mxu0  ;;  %v8366_v53 = vpop.eup %8365  ;;  %8391 = vrcp.f32 %v6326_v11  ;;  %v6327_v57 = vadd.f32 1.0, %v8364_v41 }
 0x551   : > { %v7289_v45 = vmul.f32 -1.442695, %v5627_v22  ;;  %v5520_v7 = vadd.f32 %v5519_v62, %v11328_v14  ;;  %v5634_v26 = vpop.f32.mrf.mxu1  ;;  %v8368_v44 = vpop.eup %8367  ;;  %6635 = vst [vmem:[%s11200_s27 + $0x280] sm:$0xff] %v8366_v53  ;;  %8393 = vpow2.f32 %v7288_v35  ;;  %v5631_v23 = vadd.f32 %v5630_v4, %v5518_v24 }
 0x552   : > { %v5521_v16 = vpop.f32.mrf.mxu0  ;;  %v8370_v38 = vpop.eup %8369  ;;  %6641 = vst [vmem:[%s11200_s27 + $0x2b0] sm:$0xff] %v8368_v44  ;;  %8395 = vrcp.f32 %v6327_v57 }
 0x553   : > { %v5633_v13 = vadd.f32 %v5632_v54, %v5520_v7  ;;  %v5522_v59 = vadd.f32 %v5521_v16, %v11323_v34  ;;  %v5636_v42 = vpop.f32.mrf.mxu1  ;;  %v8372_v17 = vpop.eup %8371  ;;  %v6223_v30 = vadd.f32 1.0, %v8370_v38  ;;  %8397 = vpow2.f32 %v7289_v45 }
 0x554   : > { %v7295_v6 = vmul.f32 -1.442695, %v5631_v23  ;;  %v5523_v0 = vpop.f32.mrf.mxu0  ;;  %v8374_v9 = vpop.eup %8373  ;;  %6642 = vst [vmem:[%s11200_s27 + $0x2b8] sm:$0xff] %v8372_v17 }
 0x555   : > { %v7296_v40 = vmul.f32 -1.442695, %v5633_v13  ;;  %v5635_v5 = vadd.f32 %v5634_v26, %v5522_v59  ;;  %v5524_v50 = vadd.f32 %v5523_v0, %v11328_v14  ;;  %v5640_v3 = vpop.f32.mrf.mxu1  ;;  %v8376_v27 = vpop.eup %8375  ;;  %8399 = vrcp.f32 %v6223_v30 }
 0x556   : > { %v6224_v39 = vadd.f32 1.0, %v8374_v9  ;;  %v5527_v63 = vpop.f32.mrf.mxu0  ;;  %v8378_v28 = vpop.eup %8377  ;;  %6648 = vst [vmem:[%s11200_s27 + $0x2e8] sm:$0xff] %v8376_v27  ;;  %8401 = vpow2.f32 %v7295_v6 }
 0x557   : > { %v7302_v55 = vmul.f32 -1.442695, %v5635_v5  ;;  %v5637_v43 = vadd.f32 %v5636_v42, %v5524_v50  ;;  %v5528_v52 = vadd.f32 %v5527_v63, %v11323_v34  ;;  %v5642_v33 = vpop.f32.mrf.mxu1  ;;  %v8380_v18 = vpop.eup %8379  ;;  %v6230_v37 = vadd.f32 1.0, %v8378_v28 }
 0x558   : > { %8403 = vrcp.f32 %v6224_v39  ;;  %v5529_v19 = vpop.f32.mrf.mxu0  ;;  %v8382_v21 = vpop.eup %8381  ;;  %6649 = vst [vmem:[%s11200_s27 + $0x2f0] sm:$0xff] %v8380_v18 }
 0x559   : > { %8405 = vpow2.f32 %v7296_v40  ;;  %v7303_v15 = vmul.f32 -1.442695, %v5637_v43  ;;  %v5641_v31 = vadd.f32 %v5640_v3, %v5528_v52  ;;  %v5530_v60 = vadd.f32 %v5529_v19, %v11328_v14  ;;  %v5644_v29 = vpop.f32.mrf.mxu1  ;;  %v8384_v56 = vpop.eup %8383 }
 0x55a   : > { %8407 = vrcp.f32 %v6230_v37  ;;  %v6231_v47 = vadd.f32 1.0, %v8382_v21  ;;  %v5531_v36 = vpop.f32.mrf.mxu0  ;;  %v8386_v8 = vpop.eup %8385  ;;  %6655 = vst [vmem:[%s11200_s27 + $0x320] sm:$0xff] %v8384_v56 }
 0x55b   : > { %8409 = vpow2.f32 %v7302_v55  ;;  %v7309_v20 = vmul.f32 -1.442695, %v5641_v31  ;;  %v5643_v48 = vadd.f32 %v5642_v33, %v5530_v60  ;;  %v5532_v58 = vadd.f32 %v5531_v36, %v11323_v34  ;;  %v5646_v2 = vpop.f32.mrf.mxu1  ;;  %v8388_v32 = vpop.eup %8387 }
 0x55c   : > { %8411 = vrcp.f32 %v6231_v47  ;;  %v6237_v51 = vadd.f32 1.0, %v8386_v8  ;;  %v5533_v49 = vpop.f32.mrf.mxu0  ;;  %v8390_v4 = vpop.eup %8389  ;;  %6656 = vst [vmem:[%s11200_s27 + $0x328] sm:$0xff] %v8388_v32 }
 0x55d   : > { %8413 = vpow2.f32 %v7303_v15  ;;  %v7310_v1 = vmul.f32 -1.442695, %v5643_v48  ;;  %v5645_v46 = vadd.f32 %v5644_v29, %v5532_v58  ;;  %v5534_v12 = vadd.f32 %v5533_v49, %v11328_v14  ;;  %v5650_v25 = vpop.f32.mrf.mxu1  ;;  %v8392_v11 = vpop.eup %8391 }
 0x55e   : > { %8415 = vrcp.f32 %v6237_v51  ;;  %v6238_v35 = vadd.f32 1.0, %v8390_v4  ;;  %v5537_v22 = vpop.f32.mrf.mxu0  ;;  %v8394_v54 = vpop.eup %8393  ;;  %6662 = vst [vmem:[%s11200_s27 + $0x358] sm:$0xff] %v8392_v11 }
 0x55f   : > { %8417 = vpow2.f32 %v7309_v20  ;;  %v7316_v41 = vmul.f32 -1.442695, %v5645_v46  ;;  %v5647_v24 = vadd.f32 %v5646_v2, %v5534_v12  ;;  %v5538_v62 = vadd.f32 %v5537_v22, %v11323_v34  ;;  %v5652_v53 = vpop.f32.mrf.mxu1  ;;  %v8396_v57 = vpop.eup %8395 }
 0x560   : > { %8419 = vrcp.f32 %v6238_v35  ;;  %v6244_v45 = vadd.f32 1.0, %v8394_v54  ;;  %v5539_v7 = vpop.f32.mrf.mxu0  ;;  %v8398_v26 = vpop.eup %8397  ;;  %6663 = vst [vmem:[%s11200_s27 + $0x360] sm:$0xff] %v8396_v57 }
 0x561   : > { %8421 = vpow2.f32 %v7310_v1  ;;  %v7317_v44 = vmul.f32 -1.442695, %v5647_v24  ;;  %v5651_v23 = vadd.f32 %v5650_v25, %v5538_v62  ;;  %v5540_v16 = vadd.f32 %v5539_v7, %v11328_v14  ;;  %v5654_v38 = vpop.f32.mrf.mxu1 }
 0x562   : > { %8423 = vrcp.f32 %v6244_v45  ;;  %v6245_v13 = vadd.f32 1.0, %v8398_v26  ;;  %v5541_v59 = vpop.f32.mrf.mxu0  ;;  %v8400_v42 = vpop.eup %8399 }
 0x563   : > { %8425 = vpow2.f32 %v7316_v41  ;;  %v7323_v17 = vmul.f32 -1.442695, %v5651_v23  ;;  %v5653_v30 = vadd.f32 %v5652_v53, %v5540_v16  ;;  %v5542_v6 = vadd.f32 %v5541_v59, %v11323_v34  ;;  %v5656_v0 = vpop.f32.mrf.mxu1  ;;  %v8402_v9 = vpop.eup %8401  ;;  %6559 = vst [vmem:[%s11200_s27 + $0x20] sm:$0xff] %v8400_v42 }
 0x564   : > { %8427 = vrcp.f32 %v6245_v13  ;;  %v5543_v40 = vpop.f32.mrf.mxu0  ;;  %v6251_v50 = vadd.f32 1.0, %v8402_v9 }
 0x565   : > { %v8404_v5 = vpop.eup %8403  ;;  %8429 = vpow2.f32 %v7317_v44  ;;  %v7324_v3 = vmul.f32 -1.442695, %v5653_v30  ;;  %v5655_v27 = vadd.f32 %v5654_v38, %v5542_v6  ;;  %v5660_v39 = vpop.f32.mrf.mxu1  ;;  %v5544_v28 = vadd.f32 %v5543_v40, %v11328_v14 }
 0x566   : > { %v8406_v63 = vpop.eup %8405  ;;  %6560 = vst [vmem:[%s11200_s27 + $0x28] sm:$0xff] %v8404_v5  ;;  %8431 = vpow2.f32 %v7323_v17  ;;  %v5547_v55 = vpop.f32.mrf.mxu0 }
 0x567   : > { %v8408_v43 = vpop.eup %8407  ;;  %8433 = vrcp.f32 %v6251_v50  ;;  %v6252_v52 = vadd.f32 1.0, %v8406_v63  ;;  %v7330_v33 = vmul.f32 -1.442695, %v5655_v27  ;;  %v5548_v18 = vadd.f32 %v5547_v55, %v11323_v34  ;;  %v5662_v37 = vpop.f32.mrf.mxu1 }
 0x568   : > { %v8410_v19 = vpop.eup %8409  ;;  %6566 = vst [vmem:[%s11200_s27 + $0x58] sm:$0xff] %v8408_v43  ;;  %8435 = vpow2.f32 %v7324_v3  ;;  %v5657_v21 = vadd.f32 %v5656_v0, %v5544_v28  ;;  %v5549_v15 = vpop.f32.mrf.mxu0 }
 0x569   : > { %v8412_v31 = vpop.eup %8411  ;;  %8437 = vrcp.f32 %v6252_v52  ;;  %v6258_v60 = vadd.f32 1.0, %v8410_v19  ;;  %v5661_v29 = vadd.f32 %v5660_v39, %v5548_v18  ;;  %v5550_v56 = vadd.f32 %v5549_v15, %v11328_v14  ;;  %v5664_v47 = vpop.f32.mrf.mxu1 }
 0x56a   : > { %v8414_v36 = vpop.eup %8413  ;;  %6567 = vst [vmem:[%s11200_s27 + $0x60] sm:$0xff] %v8412_v31  ;;  %8439 = vpow2.f32 %v7330_v33  ;;  %v7331_v8 = vmul.f32 -1.442695, %v5657_v21  ;;  %v5551_v20 = vpop.f32.mrf.mxu0 }
 0x56b   : > { %v8416_v48 = vpop.eup %8415  ;;  %8441 = vrcp.f32 %v6258_v60  ;;  %v6259_v58 = vadd.f32 1.0, %v8414_v36  ;;  %v7337_v2 = vmul.f32 -1.442695, %v5661_v29  ;;  %v5663_v32 = vadd.f32 %v5662_v37, %v5550_v56  ;;  %v5666_v51 = vpop.f32.mrf.mxu1 }
 0x56c   : > { %v8418_v49 = vpop.eup %8417  ;;  %6573 = vst [vmem:[%s11200_s27 + $0x90] sm:$0xff] %v8416_v48  ;;  %8443 = vpow2.f32 %v7331_v8  ;;  %v5552_v4 = vadd.f32 %v5551_v20, %v11323_v34  ;;  %v5553_v1 = vpop.f32.mrf.mxu0 }
 0x56d   : > { %v8420_v46 = vpop.eup %8419  ;;  %8445 = vrcp.f32 %v6259_v58  ;;  %v6265_v12 = vadd.f32 1.0, %v8418_v49  ;;  %v7338_v25 = vmul.f32 -1.442695, %v5663_v32  ;;  %v5554_v11 = vadd.f32 %v5553_v1, %v11328_v14  ;;  %v5670_v35 = vpop.f32.mrf.mxu1 }
 0x56e   : > { %v8422_v22 = vpop.eup %8421  ;;  %6574 = vst [vmem:[%s11200_s27 + $0x98] sm:$0xff] %v8420_v46  ;;  %8447 = vpow2.f32 %v7337_v2  ;;  %v5665_v54 = vadd.f32 %v5664_v47, %v5552_v4  ;;  %v5557_v41 = vpop.f32.mrf.mxu0  ;;  %v4078_v49 = vsub.s32 6, %v11545_v61 }
 0x56f   : > { %v8424_v24 = vpop.eup %8423  ;;  %8449 = vrcp.f32 %v6265_v12  ;;  %v6266_v62 = vadd.f32 1.0, %v8422_v22  ;;  %v5667_v53 = vadd.f32 %v5666_v51, %v5554_v11  ;;  %v5558_v57 = vadd.f32 %v5557_v41, %v11323_v34  ;;  %v5672_v45 = vpop.f32.mrf.mxu1 }
 0x570   : > { %v8426_v7 = vpop.eup %8425  ;;  %6580 = vst [vmem:[%s11200_s27 + $0xc8] sm:$0xff] %v8424_v24  ;;  %8451 = vpow2.f32 %v7338_v25  ;;  %v7344_v26 = vmul.f32 -1.442695, %v5665_v54  ;;  %v5559_v44 = vpop.f32.mrf.mxu0 }
 0x571   : > { %v8428_v23 = vpop.eup %8427  ;;  %8453 = vrcp.f32 %v6266_v62  ;;  %v6272_v16 = vadd.f32 1.0, %v8426_v7  ;;  %v7345_v38 = vmul.f32 -1.442695, %v5667_v53  ;;  %v5671_v13 = vadd.f32 %v5670_v35, %v5558_v57  ;;  %v5674_v59 = vpop.f32.mrf.mxu1 }
 0x572   : > { %v8430_v42 = vpop.eup %8429  ;;  %6581 = vst [vmem:[%s11200_s27 + $0xd0] sm:$0xff] %v8428_v23  ;;  %8455 = vpow2.f32 %v7344_v26  ;;  %v5560_v17 = vadd.f32 %v5559_v44, %v11328_v14  ;;  %v5561_v30 = vpop.f32.mrf.mxu0  ;;  %v11396_v44 = vrot.slane %v11320_v10, %v4078_v49 }
 0x573   : > { %v8432_v6 = vpop.eup %8431  ;;  %8457 = vrcp.f32 %v6272_v16  ;;  %v6273_v0 = vadd.f32 1.0, %v8430_v42  ;;  %v7351_v9 = vmul.f32 -1.442695, %v5671_v13  ;;  %v5562_v40 = vadd.f32 %v5561_v30, %v11323_v34  ;;  %v5676_v5 = vpop.f32.mrf.mxu1 }
 0x574   : > { %v8434_v50 = vpop.eup %8433  ;;  %v6279_v3 = vadd.f32 1.0, %v8432_v6  ;;  %8459 = vpow2.f32 %v7345_v38  ;;  %v5673_v27 = vadd.f32 %v5672_v45, %v5560_v17  ;;  %v5563_v39 = vpop.f32.mrf.mxu0 }
 0x575   : > { %v8436_v63 = vpop.eup %8435  ;;  %6587 = vst [vmem:[%s11200_s27 + $0x100] sm:$0xff] %v8434_v50  ;;  %8461 = vrcp.f32 %v6273_v0  ;;  %v5675_v28 = vadd.f32 %v5674_v59, %v5562_v40  ;;  %v5564_v55 = vadd.f32 %v5563_v39, %v11328_v14  ;;  %v5680_v43 = vpop.f32.mrf.mxu1 }
 0x576   : > { %v8438_v52 = vpop.eup %8437  ;;  %8463 = vrcp.f32 %v6279_v3  ;;  %v6280_v33 = vadd.f32 1.0, %v8436_v63  ;;  %v7352_v18 = vmul.f32 -1.442695, %v5673_v27  ;;  %v5567_v37 = vpop.f32.mrf.mxu0 }
 0x577   : > { %v8440_v19 = vpop.eup %8439  ;;  %6588 = vst [vmem:[%s11200_s27 + $0x108] sm:$0xff] %v8438_v52  ;;  %8465 = vpow2.f32 %v7351_v9  ;;  %v7358_v21 = vmul.f32 -1.442695, %v5675_v28  ;;  %v5677_v15 = vadd.f32 %v5676_v5, %v5564_v55  ;;  %v5568_v31 = vadd.f32 %v5567_v37, %v11323_v34  ;;  %v5682_v60 = vpop.f32.mrf.mxu1 }
 0x578   : > { %v8442_v29 = vpop.eup %8441  ;;  %8467 = vrcp.f32 %v6280_v33  ;;  %v6286_v56 = vadd.f32 1.0, %v8440_v19  ;;  %v5569_v47 = vpop.f32.mrf.mxu0 }
 0x579   : > { %v8444_v36 = vpop.eup %8443  ;;  %6594 = vst [vmem:[%s11200_s27 + $0x138] sm:$0xff] %v8442_v29  ;;  %8469 = vpow2.f32 %v7352_v18  ;;  %v7359_v8 = vmul.f32 -1.442695, %v5677_v15  ;;  %v5681_v20 = vadd.f32 %v5680_v43, %v5568_v31  ;;  %v5570_v48 = vadd.f32 %v5569_v47, %v11328_v14  ;;  %v5684_v58 = vpop.f32.mrf.mxu1 }
 0x57a   : > { %v8446_v2 = vpop.eup %8445  ;;  %8471 = vrcp.f32 %v6286_v56  ;;  %v6287_v32 = vadd.f32 1.0, %v8444_v36  ;;  %v5571_v51 = vpop.f32.mrf.mxu0 }
 0x57b   : > { %v8448_v4 = vpop.eup %8447  ;;  %6595 = vst [vmem:[%s11200_s27 + $0x140] sm:$0xff] %v8446_v2  ;;  %8473 = vpow2.f32 %v7358_v21  ;;  %v7365_v1 = vmul.f32 -1.442695, %v5681_v20  ;;  %v5683_v46 = vadd.f32 %v5682_v60, %v5570_v48  ;;  %v5572_v12 = vadd.f32 %v5571_v51, %v11323_v34  ;;  %v5686_v25 = vpop.f32.mrf.mxu1 }
 0x57c   : > { %v8450_v11 = vpop.eup %8449  ;;  %8475 = vrcp.f32 %v6287_v32  ;;  %v6293_v35 = vadd.f32 1.0, %v8448_v4  ;;  %v5573_v22 = vpop.f32.mrf.mxu0 }
 0x57d   : > { %v8452_v54 = vpop.eup %8451  ;;  %6601 = vst [vmem:[%s11200_s27 + $0x170] sm:$0xff] %v8450_v11  ;;  %8477 = vpow2.f32 %v7359_v8  ;;  %v7366_v41 = vmul.f32 -1.442695, %v5683_v46  ;;  %v5685_v24 = vadd.f32 %v5684_v58, %v5572_v12  ;;  %v5574_v61 = vadd.f32 %v5573_v22, %v11328_v14  ;;  %v5820_v62 = vpop.f32.mrf.mxu1 }
 0x57e   : > { %v8454_v53 = vpop.eup %8453  ;;  %8479 = vrcp.f32 %v6293_v35  ;;  %v6294_v57 = vadd.f32 1.0, %v8452_v54  ;;  %v7457_v45 = vpop.f32.mrf.mxu0 }
 0x57f   : > { %v8456_v34 = vpop.eup %8455  ;;  %6602 = vst [vmem:[%s11200_s27 + $0x178] sm:$0xff] %v8454_v53  ;;  %8481 = vpow2.f32 %v7365_v1  ;;  %v7372_v7 = vmul.f32 -1.442695, %v5685_v24  ;;  %v5687_v26 = vadd.f32 %v5686_v25, %v5574_v61  ;;  %v5822_v23 = vpop.f32.mrf.mxu1 }
 0x580   : > { %v8458_v16 = vpop.eup %8457  ;;  %8483 = vrcp.f32 %v6294_v57  ;;  %v6300_v38 = vadd.f32 1.0, %v8456_v34  ;;  %v7458_v14 = vpop.f32.mrf.mxu0 }
 0x581   : > { %v8460_v13 = vpop.eup %8459  ;;  %6608 = vst [vmem:[%s11200_s27 + $0x1a8] sm:$0xff] %v8458_v16  ;;  %8485 = vpow2.f32 %v7366_v41  ;;  %v7373_v59 = vmul.f32 -1.442695, %v5687_v26  ;;  %v7459_v42 = vadd.f32 %v7458_v14, %v7457_v45  ;;  %v5823_v17 = vpop.f32.mrf.mxu1 }
 0x582   : > { %v8462_v30 = vpop.eup %8461  ;;  %8487 = vrcp.f32 %v6300_v38  ;;  %v6301_v6 = vadd.f32 1.0, %v8460_v13  ;;  %v7460_v0 = vpop.f32.mrf.mxu0 }
 0x583   : > { %v8464_v9 = vpop.eup %8463  ;;  %6609 = vst [vmem:[%s11200_s27 + $0x1b0] sm:$0xff] %v8462_v30  ;;  %8489 = vpow2.f32 %v7372_v7  ;;  %v5724_v10 = vadd.f32 %v7459_v42, %v11396_v44  ;;  %v5825_v40 = vpop.f32.mrf.mxu1 }
 0x584   : > { %v8466_v5 = vpop.eup %8465  ;;  %6615 = vst [vmem:[%s11200_s27 + $0x1e0] sm:$0xff] %v8464_v9  ;;  %8491 = vrcp.f32 %v6301_v6  ;;  %v7461_v50 = vpop.f32.mrf.mxu0 }
 0x585   : > { %v8468_v3 = vpop.eup %8467  ;;  %v6307_v27 = vadd.f32 1.0, %v8466_v5  ;;  %8493 = vpow2.f32 %v7373_v59  ;;  %v5821_v39 = vadd.f32 %v5820_v62, %v5724_v10  ;;  %v7462_v63 = vadd.f32 %v7461_v50, %v7460_v0  ;;  %v5828_v28 = vpop.f32.mrf.mxu1 }
 0x586   : > { %v8470_v55 = vpop.eup %8469  ;;  %6616 = vst [vmem:[%s11200_s27 + $0x1e8] sm:$0xff] %v8468_v3  ;;  %v7463_v43 = vpop.f32.mrf.mxu0 }
 0x587   : > { %v8472_v52 = vpop.eup %8471  ;;  %8495 = vrcp.f32 %v6307_v27  ;;  %v6308_v33 = vadd.f32 1.0, %v8470_v55  ;;  %v7269_v18 = vmul.f32 -1.442695, %v5821_v39  ;;  %v5727_v37 = vadd.f32 %v7462_v63, %v11396_v44  ;;  %v5830_v19 = vpop.f32.mrf.mxu1 }
 0x588   : > { %v8474_v21 = vpop.eup %8473  ;;  %6622 = vst [vmem:[%s11200_s27 + $0x218] sm:$0xff] %v8472_v52  ;;  %v7464_v15 = vpop.f32.mrf.mxu0 }
 0x589   : > { %v8476_v31 = vpop.eup %8475  ;;  %8497 = vrcp.f32 %v6308_v33  ;;  %v6314_v60 = vadd.f32 1.0, %v8474_v21  ;;  %v5824_v29 = vadd.f32 %v5823_v17, %v5727_v37  ;;  %v7465_v56 = vadd.f32 %v7464_v15, %v7463_v43  ;;  %v5831_v47 = vpop.f32.mrf.mxu1 }
 0x58a   : > { %v8478_v36 = vpop.eup %8477  ;;  %6623 = vst [vmem:[%s11200_s27 + $0x220] sm:$0xff] %v8476_v31  ;;  %8499 = vpow2.f32 %v7269_v18  ;;  %v7466_v8 = vpop.f32.mrf.mxu0 }
 0x58b   : > { %v8480_v20 = vpop.eup %8479  ;;  %8501 = vrcp.f32 %v6314_v60  ;;  %v6315_v48 = vadd.f32 1.0, %v8478_v36  ;;  %v7276_v58 = vmul.f32 -1.442695, %v5824_v29  ;;  %v5732_v2 = vadd.f32 %v7465_v56, %v11396_v44  ;;  %v5833_v32 = vpop.f32.mrf.mxu1 }
 0x58c   : > { %v8482_v51 = vpop.eup %8481  ;;  %6629 = vst [vmem:[%s11200_s27 + $0x250] sm:$0xff] %v8480_v20  ;;  %v7467_v49 = vpop.f32.mrf.mxu0 }
 0x58d   : > { %v8484_v4 = vpop.eup %8483  ;;  %8503 = vrcp.f32 %v6315_v48  ;;  %v6321_v1 = vadd.f32 1.0, %v8482_v51  ;;  %v5829_v46 = vadd.f32 %v5828_v28, %v5732_v2  ;;  %v7468_v12 = vadd.f32 %v7467_v49, %v7466_v8  ;;  %v5836_v25 = vpop.f32.mrf.mxu1 }
 0x58e   : > { %v8486_v11 = vpop.eup %8485  ;;  %6630 = vst [vmem:[%s11200_s27 + $0x258] sm:$0xff] %v8484_v4  ;;  %8505 = vpow2.f32 %v7276_v58  ;;  %v7469_v35 = vpop.f32.mrf.mxu0 }
 0x58f   : > { %v8488_v22 = vpop.eup %8487  ;;  %8507 = vrcp.f32 %v6321_v1  ;;  %v6322_v54 = vadd.f32 1.0, %v8486_v11  ;;  %v7283_v41 = vmul.f32 -1.442695, %v5829_v46  ;;  %v5735_v24 = vadd.f32 %v7468_v12, %v11396_v44  ;;  %v5838_v61 = vpop.f32.mrf.mxu1 }
 0x590   : > { %v8490_v62 = vpop.eup %8489  ;;  %6636 = vst [vmem:[%s11200_s27 + $0x288] sm:$0xff] %v8488_v22  ;;  %v7470_v53 = vpop.f32.mrf.mxu0 }
 0x591   : > { %v8492_v57 = vpop.eup %8491  ;;  %8509 = vrcp.f32 %v6322_v54  ;;  %v6328_v45 = vadd.f32 1.0, %v8490_v62  ;;  %v5832_v34 = vadd.f32 %v5831_v47, %v5735_v24  ;;  %v7471_v7 = vadd.f32 %v7470_v53, %v7469_v35  ;;  %v5839_v26 = vpop.f32.mrf.mxu1 }
 0x592   : > { %v8494_v23 = vpop.eup %8493  ;;  %6637 = vst [vmem:[%s11200_s27 + $0x290] sm:$0xff] %v8492_v57  ;;  %8511 = vpow2.f32 %v7283_v41  ;;  %v7472_v16 = vpop.f32.mrf.mxu0 }
 0x593   : > { %8513 = vrcp.f32 %v6328_v45  ;;  %v6329_v38 = vadd.f32 1.0, %v8494_v23  ;;  %v7290_v14 = vmul.f32 -1.442695, %v5832_v34  ;;  %v5740_v13 = vadd.f32 %v7471_v7, %v11396_v44  ;;  %v5841_v59 = vpop.f32.mrf.mxu1 }
 0x594   : > { %v8496_v42 = vpop.eup %8495  ;;  %v7473_v17 = vpop.f32.mrf.mxu0 }
 0x595   : > { %6643 = vst [vmem:[%s11200_s27 + $0x2c0] sm:$0xff] %v8496_v42  ;;  %8515 = vrcp.f32 %v6329_v38  ;;  %v5837_v30 = vadd.f32 %v5836_v25, %v5740_v13  ;;  %v7474_v6 = vadd.f32 %v7473_v17, %v7472_v16  ;;  %v5844_v0 = vpop.f32.mrf.mxu1 }
 0x596   : > { %v8498_v9 = vpop.eup %8497  ;;  %8517 = vpow2.f32 %v7290_v14  ;;  %v7475_v10 = vpop.f32.mrf.mxu0 }
 0x597   : > { %v8500_v40 = vpop.eup %8499  ;;  %6644 = vst [vmem:[%s11200_s27 + $0x2c8] sm:$0xff] %v8498_v9  ;;  %v7297_v5 = vmul.f32 -1.442695, %v5837_v30  ;;  %v5743_v50 = vadd.f32 %v7474_v6, %v11396_v44  ;;  %v5846_v3 = vpop.f32.mrf.mxu1 }
 0x598   : > { %v8502_v27 = vpop.eup %8501  ;;  %v6225_v39 = vadd.f32 1.0, %v8500_v40  ;;  %v7476_v63 = vpop.f32.mrf.mxu0 }
 0x599   : > { %6650 = vst [vmem:[%s11200_s27 + $0x2f8] sm:$0xff] %v8502_v27  ;;  %8519 = vpow2.f32 %v7297_v5  ;;  %v5840_v28 = vadd.f32 %v5839_v26, %v5743_v50  ;;  %v7477_v55 = vadd.f32 %v7476_v63, %v7475_v10  ;;  %v5847_v43 = vpop.f32.mrf.mxu1 }
 0x59a   : > { %v8504_v52 = vpop.eup %8503  ;;  %8521 = vrcp.f32 %v6225_v39  ;;  %v7478_v33 = vpop.f32.mrf.mxu0 }
 0x59b   : > { %v8506_v18 = vpop.eup %8505  ;;  %6651 = vst [vmem:[%s11200_s27 + $0x300] sm:$0xff] %v8504_v52  ;;  %v7304_v37 = vmul.f32 -1.442695, %v5840_v28  ;;  %v5748_v19 = vadd.f32 %v7477_v55, %v11396_v44  ;;  %v5849_v21 = vpop.f32.mrf.mxu1 }
 0x59c   : > { %v8508_v15 = vpop.eup %8507  ;;  %v6232_v31 = vadd.f32 1.0, %v8506_v18  ;;  %v7479_v60 = vpop.f32.mrf.mxu0 }
 0x59d   : > { %6657 = vst [vmem:[%s11200_s27 + $0x330] sm:$0xff] %v8508_v15  ;;  %8523 = vpow2.f32 %v7304_v37  ;;  %v5845_v29 = vadd.f32 %v5844_v0, %v5748_v19  ;;  %v7480_v56 = vadd.f32 %v7479_v60, %v7478_v33  ;;  %v5852_v47 = vpop.f32.mrf.mxu1 }
 0x59e   : > { %v8510_v36 = vpop.eup %8509  ;;  %8525 = vrcp.f32 %v6232_v31  ;;  %v7481_v8 = vpop.f32.mrf.mxu0 }
 0x59f   : > { %v8512_v20 = vpop.eup %8511  ;;  %6658 = vst [vmem:[%s11200_s27 + $0x338] sm:$0xff] %v8510_v36  ;;  %v7311_v48 = vmul.f32 -1.442695, %v5845_v29  ;;  %v5751_v58 = vadd.f32 %v7480_v56, %v11396_v44  ;;  %v5854_v2 = vpop.f32.mrf.mxu1 }
 0x5a0   : > { %v8514_v32 = vpop.eup %8513  ;;  %v6239_v51 = vadd.f32 1.0, %v8512_v20  ;;  %v7482_v49 = vpop.f32.mrf.mxu0 }
 0x5a1   : > { %6664 = vst [vmem:[%s11200_s27 + $0x368] sm:$0xff] %v8514_v32  ;;  %8527 = vpow2.f32 %v7311_v48  ;;  %v5848_v4 = vadd.f32 %v5847_v43, %v5751_v58  ;;  %v7483_v1 = vadd.f32 %v7482_v49, %v7481_v8  ;;  %v5855_v46 = vpop.f32.mrf.mxu1 }
 0x5a2   : > { %v8516_v12 = vpop.eup %8515  ;;  %8529 = vrcp.f32 %v6239_v51  ;;  %v7484_v25 = vpop.f32.mrf.mxu0 }
 0x5a3   : > { %v8518_v11 = vpop.eup %8517  ;;  %6665 = vst [vmem:[%s11200_s27 + $0x370] sm:$0xff] %v8516_v12  ;;  %v7318_v35 = vmul.f32 -1.442695, %v5848_v4  ;;  %v5756_v22 = vadd.f32 %v7483_v1, %v11396_v44  ;;  %v5857_v54 = vpop.f32.mrf.mxu1 }
 0x5a4   : > { %v6246_v41 = vadd.f32 1.0, %v8518_v11  ;;  %v7485_v24 = vpop.f32.mrf.mxu0 }
 0x5a5   : > { %8531 = vpow2.f32 %v7318_v35  ;;  %v5853_v61 = vadd.f32 %v5852_v47, %v5756_v22  ;;  %v7486_v62 = vadd.f32 %v7485_v24, %v7484_v25  ;;  %v5860_v53 = vpop.f32.mrf.mxu1 }
 0x5a6   : > { %v8520_v57 = vpop.eup %8519  ;;  %8533 = vrcp.f32 %v6246_v41  ;;  %v7487_v45 = vpop.f32.mrf.mxu0 }
 0x5a7   : > { %v8522_v34 = vpop.eup %8521  ;;  %v6253_v7 = vadd.f32 1.0, %v8520_v57  ;;  %v7325_v26 = vmul.f32 -1.442695, %v5853_v61  ;;  %v5759_v23 = vadd.f32 %v7486_v62, %v11396_v44  ;;  %v5862_v16 = vpop.f32.mrf.mxu1 }
 0x5a8   : > { %6561 = vst.msk [vmem:[%s11200_s27 + $0x30] sm:$0xff] %vm1814_vm0, %v8522_v34  ;;  %v7488_v38 = vpop.f32.mrf.mxu0 }
 0x5a9   : > { %8535 = vrcp.f32 %v6253_v7  ;;  %v5856_v14 = vadd.f32 %v5855_v46, %v5759_v23  ;;  %v7489_v13 = vadd.f32 %v7488_v38, %v7487_v45  ;;  %v5863_v59 = vpop.f32.mrf.mxu1 }
 0x5aa   : > { %v8524_v42 = vpop.eup %8523  ;;  %8537 = vpow2.f32 %v7325_v26  ;;  %v7490_v17 = vpop.f32.mrf.mxu0 }
 0x5ab   : > { %v8526_v30 = vpop.eup %8525  ;;  %v6260_v6 = vadd.f32 1.0, %v8524_v42  ;;  %v7332_v0 = vmul.f32 -1.442695, %v5856_v14  ;;  %v5764_v9 = vadd.f32 %v7489_v13, %v11396_v44  ;;  %v5865_v10 = vpop.f32.mrf.mxu1 }
 0x5ac   : > { %6568 = vst.msk [vmem:[%s11200_s27 + $0x68] sm:$0xff] %vm1814_vm0, %v8526_v30  ;;  %v7491_v40 = vpop.f32.mrf.mxu0 }
 0x5ad   : > { %8539 = vrcp.f32 %v6260_v6  ;;  %v5861_v5 = vadd.f32 %v5860_v53, %v5764_v9  ;;  %v7492_v50 = vadd.f32 %v7491_v40, %v7490_v17  ;;  %v5868_v3 = vpop.f32.mrf.mxu1 }
 0x5ae   : > { %v8528_v27 = vpop.eup %8527  ;;  %8541 = vpow2.f32 %v7332_v0  ;;  %v7493_v39 = vpop.f32.mrf.mxu0 }
 0x5af   : > { %v8530_v63 = vpop.eup %8529  ;;  %v6267_v28 = vadd.f32 1.0, %v8528_v27  ;;  %v7339_v55 = vmul.f32 -1.442695, %v5861_v5  ;;  %v5767_v43 = vadd.f32 %v7492_v50, %v11396_v44  ;;  %v5870_v52 = vpop.f32.mrf.mxu1 }
 0x5b0   : > { %6575 = vst.msk [vmem:[%s11200_s27 + $0xa0] sm:$0xff] %vm1814_vm0, %v8530_v63  ;;  %v7494_v33 = vpop.f32.mrf.mxu0 }
 0x5b1   : > { %8543 = vrcp.f32 %v6267_v28  ;;  %v5864_v18 = vadd.f32 %v5863_v59, %v5767_v43  ;;  %v7495_v37 = vadd.f32 %v7494_v33, %v7493_v39  ;;  %v5871_v19 = vpop.f32.mrf.mxu1 }
 0x5b2   : > { %v8532_v21 = vpop.eup %8531  ;;  %8545 = vpow2.f32 %v7339_v55  ;;  %v7496_v15 = vpop.f32.mrf.mxu0 }
 0x5b3   : > { %v8534_v31 = vpop.eup %8533  ;;  %v6274_v60 = vadd.f32 1.0, %v8532_v21  ;;  %v7346_v29 = vmul.f32 -1.442695, %v5864_v18  ;;  %v5772_v56 = vadd.f32 %v7495_v37, %v11396_v44  ;;  %v5873_v47 = vpop.f32.mrf.mxu1 }
 0x5b4   : > { %6582 = vst.msk [vmem:[%s11200_s27 + $0xd8] sm:$0xff] %vm1814_vm0, %v8534_v31  ;;  %v7497_v36 = vpop.f32.mrf.mxu0 }
 0x5b5   : > { %8547 = vrcp.f32 %v6274_v60  ;;  %v5869_v8 = vadd.f32 %v5868_v3, %v5772_v56  ;;  %v7498_v20 = vadd.f32 %v7497_v36, %v7496_v15  ;;  %v5876_v48 = vpop.f32.mrf.mxu1 }
 0x5b6   : > { %v8536_v58 = vpop.eup %8535  ;;  %8549 = vpow2.f32 %v7346_v29  ;;  %v7499_v2 = vpop.f32.mrf.mxu0 }
 0x5b7   : > { %v8538_v32 = vpop.eup %8537  ;;  %6589 = vst.msk [vmem:[%s11200_s27 + $0x110] sm:$0xff] %vm1814_vm0, %v8536_v58  ;;  %v7353_v51 = vmul.f32 -1.442695, %v5869_v8  ;;  %v5775_v49 = vadd.f32 %v7498_v20, %v11396_v44  ;;  %v5878_v4 = vpop.f32.mrf.mxu1 }
 0x5b8   : > { %v6281_v1 = vadd.f32 1.0, %v8538_v32  ;;  %v7500_v46 = vpop.f32.mrf.mxu0 }
 0x5b9   : > { %8551 = vpow2.f32 %v7353_v51  ;;  %v5872_v12 = vadd.f32 %v5871_v19, %v5775_v49  ;;  %v7501_v25 = vadd.f32 %v7500_v46, %v7499_v2  ;;  %v5879_v11 = vpop.f32.mrf.mxu1 }
 0x5ba   : > { %v8540_v35 = vpop.eup %8539  ;;  %8553 = vrcp.f32 %v6281_v1  ;;  %v7502_v22 = vpop.f32.mrf.mxu0 }
 0x5bb   : > { %v8542_v54 = vpop.eup %8541  ;;  %6596 = vst.msk [vmem:[%s11200_s27 + $0x148] sm:$0xff] %vm1814_vm0, %v8540_v35  ;;  %v7360_v41 = vmul.f32 -1.442695, %v5872_v12  ;;  %v5780_v24 = vadd.f32 %v7501_v25, %v11396_v44  ;;  %v5881_v61 = vpop.f32.mrf.mxu1 }
 0x5bc   : > { %v6288_v62 = vadd.f32 1.0, %v8542_v54  ;;  %v7503_v53 = vpop.f32.mrf.mxu0 }
 0x5bd   : > { %8555 = vpow2.f32 %v7360_v41  ;;  %v5877_v57 = vadd.f32 %v5876_v48, %v5780_v24  ;;  %v7504_v45 = vadd.f32 %v7503_v53, %v7502_v22 }
 0x5be   : > { %v8544_v34 = vpop.eup %8543  ;;  %8557 = vrcp.f32 %v6288_v62 }
 0x5bf   : > { %v8546_v7 = vpop.eup %8545  ;;  %6603 = vst.msk [vmem:[%s11200_s27 + $0x180] sm:$0xff] %vm1814_vm0, %v8544_v34  ;;  %v7367_v26 = vmul.f32 -1.442695, %v5877_v57  ;;  %v5783_v23 = vadd.f32 %v7504_v45, %v11396_v44 }
 0x5c0   : > { %v6295_v16 = vadd.f32 1.0, %v8546_v7 }
 0x5c1   : > { %8559 = vpow2.f32 %v7367_v26  ;;  %v5880_v38 = vadd.f32 %v5879_v11, %v5783_v23 }
 0x5c2   : > { %v8548_v14 = vpop.eup %8547  ;;  %8561 = vrcp.f32 %v6295_v16 }
 0x5c3   : > { %v8550_v13 = vpop.eup %8549  ;;  %6610 = vst.msk [vmem:[%s11200_s27 + $0x1b8] sm:$0xff] %vm1814_vm0, %v8548_v14  ;;  %v7374_v59 = vmul.f32 -1.442695, %v5880_v38 }
 0x5c4   : > { %v6302_v42 = vadd.f32 1.0, %v8550_v13 }
 0x5c5   : > { %8563 = vpow2.f32 %v7374_v59 }
 0x5c6   : > { %v8552_v17 = vpop.eup %8551  ;;  %8565 = vrcp.f32 %v6302_v42 }
 0x5c7   : > { %v8554_v30 = vpop.eup %8553  ;;  %v6309_v6 = vadd.f32 1.0, %v8552_v17 }
 0x5c8   : > { %6617 = vst.msk [vmem:[%s11200_s27 + $0x1f0] sm:$0xff] %vm1814_vm0, %v8554_v30 }
 0x5c9   : > { %8567 = vrcp.f32 %v6309_v6 }
 0x5ca   : > { %v8556_v44 = vpop.eup %8555 }
 0x5cb   : > { %v8558_v0 = vpop.eup %8557  ;;  %v6316_v9 = vadd.f32 1.0, %v8556_v44 }
 0x5cc   : > { %6624 = vst.msk [vmem:[%s11200_s27 + $0x228] sm:$0xff] %vm1814_vm0, %v8558_v0 }
 0x5cd   : > { %8569 = vrcp.f32 %v6316_v9 }
 0x5ce   : > { %v8560_v10 = vpop.eup %8559 }
 0x5cf   : > { %v8562_v40 = vpop.eup %8561  ;;  %v6323_v5 = vadd.f32 1.0, %v8560_v10 }
 0x5d0   : > { %6631 = vst.msk [vmem:[%s11200_s27 + $0x260] sm:$0xff] %vm1814_vm0, %v8562_v40 }
 0x5d1   : > { %8571 = vrcp.f32 %v6323_v5 }
 0x5d2   : > { %v8564_v50 = vpop.eup %8563 }
 0x5d3   : > { %v8566_v3 = vpop.eup %8565  ;;  %v6330_v27 = vadd.f32 1.0, %v8564_v50 }
 0x5d4   : > { %6638 = vst.msk [vmem:[%s11200_s27 + $0x298] sm:$0xff] %vm1814_vm0, %v8566_v3 }
 0x5d5   : > { %8573 = vrcp.f32 %v6330_v27 }
 0x5d6   : > { %v8568_v39 = vpop.eup %8567 }
 0x5d7   : > { %6645 = vst.msk [vmem:[%s11200_s27 + $0x2d0] sm:$0xff] %vm1814_vm0, %v8568_v39 }
 0x5da   : > { %v8570_v63 = vpop.eup %8569 }
 0x5db   : > { %6652 = vst.msk [vmem:[%s11200_s27 + $0x308] sm:$0xff] %vm1814_vm0, %v8570_v63 }
 0x5de   : > { %v8572_v28 = vpop.eup %8571 }
 0x5df   : > { %6659 = vst.msk [vmem:[%s11200_s27 + $0x340] sm:$0xff] %vm1814_vm0, %v8572_v28 }
 0x5e2   : > { %v8574_v55 = vpop.eup %8573 }
 0x5e3   : > { %6666 = vst.msk [vmem:[%s11200_s27 + $0x378] sm:$0xff] %vm1814_vm0, %v8574_v55 }
 0x5e4 PF: > { %s22_s17 = sadd.s32 1, %s8582_s17  }
 0x5e5   : > { %p19_p4 = scmp.ge.s32.totalorder %s22_s17, 4  }
 0x5e7   :  { %21 = sbr.rel (!%p19_p4) target bundleno = 1 (0x1), region = 105 }

</bundles_post_ra>
